<compile_context>
chip_gen: v7x
topology: tpu7x:2x2x1
jax: 0.10.0
libtpu: 0.0.40
codegen_flags: <defaults>
</compile_context>

<pallas_src>
from functools import partial

import jax
import jax.numpy as jnp
from jax import lax
from jax.experimental import pallas as pl
from jax.experimental.pallas import tpu as pltpu


# ----------------------------------------------------------------------------
# Fused Conv2d('same', bias dropped) + BatchNorm2d(train stats) + LeakyReLU.
# ----------------------------------------------------------------------------
def _fused_conv_bn_act_kernel(x_ref, m_ref, gamma_ref, beta_ref, o_ref, xp_ref,
                              *, N, H, W, Hp, Wp, Cin, Cout, K, pad,
                              eps, slope, apply_act):
    # x_ref  : (N*H, W*Cin)         packed input activation
    # m_ref  : (K, Wp*Cin, W*Cout)  block-banded weight matrix per kh
    # gamma_ref, beta_ref : (1, Cout)
    # o_ref  : (N*H, W*Cout)        packed output activation
    # xp_ref : (N, Hp, Wp*Cin)      VMEM scratch for the zero-padded input

    # ---- zero-pad the input spatially, entirely inside VMEM -----------------
    xp_ref[...] = jnp.zeros_like(xp_ref)
    xp_ref[:, pad:pad + H, pad * Cin:pad * Cin + W * Cin] = (
        x_ref[...].reshape(N, H, W * Cin))

    # ---- convolution: K row-band matmuls, accumulated in f32 ----------------
    # out[(n,y), (x,co)] = sum_kh  xp[n, y+kh, :] @ m[kh]
    acc = jnp.zeros((N * H, W * Cout), jnp.float32)
    for kh in range(K):                                   # static unroll, K = 9
        xrow = xp_ref[:, kh:kh + H, :].reshape(N * H, Wp * Cin)
        acc = acc + jnp.dot(xrow, m_ref[kh],
                            preferred_element_type=jnp.float32)

    # ---- BatchNorm2d with training-mode batch statistics --------------------
    count = float(N * H * W)
    col_sum = jnp.sum(acc, axis=0, keepdims=True)         # (1, W*Cout)
    ch_sum = col_sum[:, 0:Cout]                            # fold W groups -> channel
    for xi in range(1, W):
        ch_sum = ch_sum + col_sum[:, xi * Cout:(xi + 1) * Cout]
    mean = ch_sum / count                                  # (1, Cout)
    mean_t = jnp.concatenate([mean] * W, axis=1)           # (1, W*Cout)

    xc = acc - mean_t
    col_sq = jnp.sum(xc * xc, axis=0, keepdims=True)       # (1, W*Cout)
    ch_sq = col_sq[:, 0:Cout]
    for xi in range(1, W):
        ch_sq = ch_sq + col_sq[:, xi * Cout:(xi + 1) * Cout]
    var = ch_sq / count                                    # biased variance (1, Cout)

    scale = gamma_ref[...] * lax.rsqrt(var + eps)          # (1, Cout)
    shift = beta_ref[...] - mean * scale
    scale_t = jnp.concatenate([scale] * W, axis=1)         # (1, W*Cout)
    shift_t = jnp.concatenate([shift] * W, axis=1)

    y = acc * scale_t + shift_t
    if apply_act:
        y = jnp.where(y >= 0.0, y, slope * y)              # LeakyReLU(0.01)
    o_ref[...] = y.astype(o_ref.dtype)


def _banded_weights(w_hwio, W, Wp):
    """(K, K, Cin, Cout) conv weights -> (K, Wp*Cin, W*Cout) block-banded matrices.

    m[kh, xin*Cin + c, xout*Cout + d] = w[kh, xin - xout, c, d] if 0 <= xin-xout < K
    so that  sum_kh (row-band kh of padded input) @ m[kh]  is exactly the
    'same'-padded 2-D cross-correlation, already in packed (x, cout) order.
    """
    K, _, _, _ = w_hwio.shape
    Cin, Cout = w_hwio.shape[2], w_hwio.shape[3]
    xin = jnp.arange(Wp)
    xout = jnp.arange(W)
    kw = jnp.arange(K)
    sel = ((xin[:, None, None] - xout[None, :, None]) ==
           kw[None, None, :]).astype(w_hwio.dtype)          # (Wp, W, K)
    m = jnp.einsum('ioq,hqcd->hicod', sel, w_hwio)           # (K, Wp, Cin, W, Cout)
    return m.reshape(K, Wp * Cin, W * Cout)


def fused_conv_bn_act(x_packed, w_hwio, gamma, beta, *, N, H, W,
                      apply_act, eps=1e-5, slope=0.01):
    K = w_hwio.shape[0]
    Cin, Cout = w_hwio.shape[2], w_hwio.shape[3]
    pad = K // 2                      # 'same' padding for odd kernel, stride 1
    Hp, Wp = H + 2 * pad, W + 2 * pad
    m = _banded_weights(w_hwio, W, Wp)

    kern = partial(_fused_conv_bn_act_kernel, N=N, H=H, W=W, Hp=Hp, Wp=Wp,
                   Cin=Cin, Cout=Cout, K=K, pad=pad, eps=eps, slope=slope,
                   apply_act=apply_act)

    return pl.pallas_call(
        kern,
        out_shape=jax.ShapeDtypeStruct((N * H, W * Cout), x_packed.dtype),
        grid=(1,),
        in_specs=[
            pl.BlockSpec((N * H, W * Cin), lambda i: (0, 0)),
            pl.BlockSpec((K, Wp * Cin, W * Cout), lambda i: (0, 0, 0)),
            pl.BlockSpec((1, Cout), lambda i: (0, 0)),
            pl.BlockSpec((1, Cout), lambda i: (0, 0)),
        ],
        out_specs=pl.BlockSpec((N * H, W * Cout), lambda i: (0, 0)),
        scratch_shapes=[pltpu.VMEM((N, Hp, Wp * Cin), jnp.float32)],
        compiler_params=pltpu.CompilerParams(
            dimension_semantics=("arbitrary",)),
    )(x_packed, m, gamma.reshape(1, Cout), beta.reshape(1, Cout))


# ----------------------------------------------------------------------------
# Dense2D module equivalent.
# ----------------------------------------------------------------------------
class Dense2DPallas:
    def __init__(self, layer_structure, kernel_size=9, key=None):
        self.kernel_size = kernel_size
        self.num_pairs = len(layer_structure) - 1
        self.params = []
        for back, front in zip(layer_structure[:-1], layer_structure[1:]):
            key, kw_, kb_ = jax.random.split(key, 3)
            fan_in = back * kernel_size * kernel_size
            bound = 1.0 / (fan_in ** 0.5)   # torch Conv2d default init range
            w = jax.random.uniform(kw_, (kernel_size, kernel_size, back, front),
                                   jnp.float32, minval=-bound, maxval=bound)
            # Conv bias is kept as a parameter for structural fidelity with
            # nn.Conv2d, but it is NOT applied in the kernel: a per-channel
            # additive bias is exactly cancelled by the training-mode
            # BatchNorm2d that immediately follows (its batch mean absorbs it).
            b = jax.random.uniform(kb_, (front,), jnp.float32,
                                   minval=-bound, maxval=bound)
            gamma = jnp.ones((front,), jnp.float32)   # BatchNorm2d default weight
            beta = jnp.zeros((front,), jnp.float32)   # BatchNorm2d default bias
            self.params.append((w, b, gamma, beta))

    def __call__(self, x_nchw):
        N, C, H, W = x_nchw.shape
        # NCHW -> lane-dense packed layout (N*H, W*C); stays packed between layers.
        x = jnp.transpose(x_nchw, (0, 2, 3, 1)).reshape(N * H, W * C)
        for idx, (w, _b, gamma, beta) in enumerate(self.params):
            apply_act = idx < self.num_pairs - 1    # no LeakyReLU after last pair
            x = fused_conv_bn_act(x, w, gamma, beta, N=N, H=H, W=W,
                                  apply_act=apply_act)
        c_out = self.params[-1][0].shape[3]
        return jnp.transpose(x.reshape(N, H, W, c_out), (0, 3, 1, 2))


if __name__ == "__main__":
    key = jax.random.PRNGKey(0)
    kparams, kx = jax.random.split(key)

    layer_structure = [4, 8, 4]  # Conv(4->8)+BN+LeakyReLU, Conv(8->4)+BN
    model = Dense2DPallas(layer_structure, kernel_size=9, key=kparams)

    x = jax.random.normal(kx, (2, 4, 16, 16), jnp.float32)  # NCHW like PyTorch

    fwd = jax.jit(model.__call__)
    out = fwd(x)
    jax.block_until_ready(out)
    assert out.shape == (2, 4, 16, 16), out.shape
    assert out.dtype == jnp.float32
    print("KERNEL_OK")
</pallas_src>

<mosaic_0001>
module attributes {stable_mosaic.version = 11 : i64} {
  func.func @_fused_conv_bn_act_kernel(%arg0: i32, %arg1: memref<32x64xf32, #tpu.memory_space<vmem>>, %arg2: memref<9x96x128xf32, #tpu.memory_space<vmem>>, %arg3: memref<1x8xf32, #tpu.memory_space<vmem>>, %arg4: memref<1x8xf32, #tpu.memory_space<vmem>>, %arg5: memref<32x128xf32, #tpu.memory_space<vmem>>, %arg6: memref<2x24x96xf32, #tpu.memory_space<vmem>>) attributes {dimension_semantics = [#tpu.dimension_semantics<arbitrary>], iteration_bounds = array<i64: 1>, scalar_prefetch = 0 : i64, scratch_operands = 1 : i64, tpu.core_type = #tpu.core_type<tc>, window_params = [{pipeline_mode = #tpu.pipeline_mode<synchronous>, transform_indices = @transform_0, window_bounds = array<i64: 32, 64>}, {pipeline_mode = #tpu.pipeline_mode<synchronous>, transform_indices = @transform_1, window_bounds = array<i64: 9, 96, 128>}, {pipeline_mode = #tpu.pipeline_mode<synchronous>, transform_indices = @transform_2, window_bounds = array<i64: 1, 8>}, {pipeline_mode = #tpu.pipeline_mode<synchronous>, transform_indices = @transform_3, window_bounds = array<i64: 1, 8>}, {pipeline_mode = #tpu.pipeline_mode<synchronous>, transform_indices = @transform_4, window_bounds = array<i64: 32, 128>}]} {
    %cst = arith.constant 0.000000e+00 : f32
    %0 = vector.broadcast %cst : f32 to vector<2x24x96xf32>
    %c0 = arith.constant 0 : index
    %c0_0 = arith.constant 0 : index
    %c0_1 = arith.constant 0 : index
    %1 = vector.load %arg6[%c0, %c0_0, %c0_1] : memref<2x24x96xf32, #tpu.memory_space<vmem>>, vector<2x24x96xf32>
    tpu.vector_store %arg6[%c0, %c0_0, %c0_1], %0 {strides = array<i32>} : memref<2x24x96xf32, #tpu.memory_space<vmem>>, vector<2x24x96xf32>,
    %c0_2 = arith.constant 0 : index
    %c0_3 = arith.constant 0 : index
    %2 = vector.load %arg1[%c0_2, %c0_3] : memref<32x64xf32, #tpu.memory_space<vmem>>, vector<32x64xf32>
    %3 = vector.shape_cast %2 : vector<32x64xf32> to vector<2x16x64xf32>
    %c0_4 = arith.constant 0 : index
    %c4 = arith.constant 4 : index
    %c16 = arith.constant 16 : index
    %4 = vector.load %arg6[%c0_4, %c4, %c16] : memref<2x24x96xf32, #tpu.memory_space<vmem>>, vector<2x16x64xf32>
    tpu.vector_store %arg6[%c0_4, %c4, %c16], %3 {strides = array<i32>} : memref<2x24x96xf32, #tpu.memory_space<vmem>>, vector<2x16x64xf32>,
    %cst_5 = arith.constant 0.000000e+00 : f32
    %5 = vector.broadcast %cst_5 : f32 to vector<32x128xf32>
    %c0_6 = arith.constant 0 : index
    %c0_7 = arith.constant 0 : index
    %c0_8 = arith.constant 0 : index
    %6 = vector.load %arg6[%c0_6, %c0_7, %c0_8] : memref<2x24x96xf32, #tpu.memory_space<vmem>>, vector<2x16x96xf32>
    %7 = vector.shape_cast %6 : vector<2x16x96xf32> to vector<32x96xf32>
    %c0_9 = arith.constant 0 : index
    %c0_10 = arith.constant 0 : index
    %c0_11 = arith.constant 0 : index
    %8 = vector.load %arg2[%c0_9, %c0_10, %c0_11] : memref<9x96x128xf32, #tpu.memory_space<vmem>>, vector<1x96x128xf32>
    %9 = vector.shape_cast %8 : vector<1x96x128xf32> to vector<96x128xf32>
    %cst_12 = arith.constant dense<0.000000e+00> : vector<32x128xf32>
    %10 = tpu.matmul %7, %9, %cst_12 {dimension_numbers = #tpu.dot_dimension_numbers<[1], [0], [0], [1], [0, 0, 1, 1], [], []>} : vector<32x96xf32>, vector<96x128xf32>, vector<32x128xf32> -> vector<32x128xf32>
    %11 = arith.addf %5, %10 : vector<32x128xf32>
    %c0_13 = arith.constant 0 : index
    %c1 = arith.constant 1 : index
    %c0_14 = arith.constant 0 : index
    %12 = vector.load %arg6[%c0_13, %c1, %c0_14] : memref<2x24x96xf32, #tpu.memory_space<vmem>>, vector<2x16x96xf32>
    %13 = vector.shape_cast %12 : vector<2x16x96xf32> to vector<32x96xf32>
    %c1_15 = arith.constant 1 : index
    %c0_16 = arith.constant 0 : index
    %c0_17 = arith.constant 0 : index
    %14 = vector.load %arg2[%c1_15, %c0_16, %c0_17] : memref<9x96x128xf32, #tpu.memory_space<vmem>>, vector<1x96x128xf32>
    %15 = vector.shape_cast %14 : vector<1x96x128xf32> to vector<96x128xf32>
    %cst_18 = arith.constant dense<0.000000e+00> : vector<32x128xf32>
    %16 = tpu.matmul %13, %15, %cst_18 {dimension_numbers = #tpu.dot_dimension_numbers<[1], [0], [0], [1], [0, 0, 1, 1], [], []>} : vector<32x96xf32>, vector<96x128xf32>, vector<32x128xf32> -> vector<32x128xf32>
    %17 = arith.addf %11, %16 : vector<32x128xf32>
    %c0_19 = arith.constant 0 : index
    %c2 = arith.constant 2 : index
    %c0_20 = arith.constant 0 : index
    %18 = vector.load %arg6[%c0_19, %c2, %c0_20] : memref<2x24x96xf32, #tpu.memory_space<vmem>>, vector<2x16x96xf32>
    %19 = vector.shape_cast %18 : vector<2x16x96xf32> to vector<32x96xf32>
    %c2_21 = arith.constant 2 : index
    %c0_22 = arith.constant 0 : index
    %c0_23 = arith.constant 0 : index
    %20 = vector.load %arg2[%c2_21, %c0_22, %c0_23] : memref<9x96x128xf32, #tpu.memory_space<vmem>>, vector<1x96x128xf32>
    %21 = vector.shape_cast %20 : vector<1x96x128xf32> to vector<96x128xf32>
    %cst_24 = arith.constant dense<0.000000e+00> : vector<32x128xf32>
    %22 = tpu.matmul %19, %21, %cst_24 {dimension_numbers = #tpu.dot_dimension_numbers<[1], [0], [0], [1], [0, 0, 1, 1], [], []>} : vector<32x96xf32>, vector<96x128xf32>, vector<32x128xf32> -> vector<32x128xf32>
    %23 = arith.addf %17, %22 : vector<32x128xf32>
    %c0_25 = arith.constant 0 : index
    %c3 = arith.constant 3 : index
    %c0_26 = arith.constant 0 : index
    %24 = vector.load %arg6[%c0_25, %c3, %c0_26] : memref<2x24x96xf32, #tpu.memory_space<vmem>>, vector<2x16x96xf32>
    %25 = vector.shape_cast %24 : vector<2x16x96xf32> to vector<32x96xf32>
    %c3_27 = arith.constant 3 : index
    %c0_28 = arith.constant 0 : index
    %c0_29 = arith.constant 0 : index
    %26 = vector.load %arg2[%c3_27, %c0_28, %c0_29] : memref<9x96x128xf32, #tpu.memory_space<vmem>>, vector<1x96x128xf32>
    %27 = vector.shape_cast %26 : vector<1x96x128xf32> to vector<96x128xf32>
    %cst_30 = arith.constant dense<0.000000e+00> : vector<32x128xf32>
    %28 = tpu.matmul %25, %27, %cst_30 {dimension_numbers = #tpu.dot_dimension_numbers<[1], [0], [0], [1], [0, 0, 1, 1], [], []>} : vector<32x96xf32>, vector<96x128xf32>, vector<32x128xf32> -> vector<32x128xf32>
    %29 = arith.addf %23, %28 : vector<32x128xf32>
    %c0_31 = arith.constant 0 : index
    %c4_32 = arith.constant 4 : index
    %c0_33 = arith.constant 0 : index
    %30 = vector.load %arg6[%c0_31, %c4_32, %c0_33] : memref<2x24x96xf32, #tpu.memory_space<vmem>>, vector<2x16x96xf32>
    %31 = vector.shape_cast %30 : vector<2x16x96xf32> to vector<32x96xf32>
    %c4_34 = arith.constant 4 : index
    %c0_35 = arith.constant 0 : index
    %c0_36 = arith.constant 0 : index
    %32 = vector.load %arg2[%c4_34, %c0_35, %c0_36] : memref<9x96x128xf32, #tpu.memory_space<vmem>>, vector<1x96x128xf32>
    %33 = vector.shape_cast %32 : vector<1x96x128xf32> to vector<96x128xf32>
    %cst_37 = arith.constant dense<0.000000e+00> : vector<32x128xf32>
    %34 = tpu.matmul %31, %33, %cst_37 {dimension_numbers = #tpu.dot_dimension_numbers<[1], [0], [0], [1], [0, 0, 1, 1], [], []>} : vector<32x96xf32>, vector<96x128xf32>, vector<32x128xf32> -> vector<32x128xf32>
    %35 = arith.addf %29, %34 : vector<32x128xf32>
    %c0_38 = arith.constant 0 : index
    %c5 = arith.constant 5 : index
    %c0_39 = arith.constant 0 : index
    %36 = vector.load %arg6[%c0_38, %c5, %c0_39] : memref<2x24x96xf32, #tpu.memory_space<vmem>>, vector<2x16x96xf32>
    %37 = vector.shape_cast %36 : vector<2x16x96xf32> to vector<32x96xf32>
    %c5_40 = arith.constant 5 : index
    %c0_41 = arith.constant 0 : index
    %c0_42 = arith.constant 0 : index
    %38 = vector.load %arg2[%c5_40, %c0_41, %c0_42] : memref<9x96x128xf32, #tpu.memory_space<vmem>>, vector<1x96x128xf32>
    %39 = vector.shape_cast %38 : vector<1x96x128xf32> to vector<96x128xf32>
    %cst_43 = arith.constant dense<0.000000e+00> : vector<32x128xf32>
    %40 = tpu.matmul %37, %39, %cst_43 {dimension_numbers = #tpu.dot_dimension_numbers<[1], [0], [0], [1], [0, 0, 1, 1], [], []>} : vector<32x96xf32>, vector<96x128xf32>, vector<32x128xf32> -> vector<32x128xf32>
    %41 = arith.addf %35, %40 : vector<32x128xf32>
    %c0_44 = arith.constant 0 : index
    %c6 = arith.constant 6 : index
    %c0_45 = arith.constant 0 : index
    %42 = vector.load %arg6[%c0_44, %c6, %c0_45] : memref<2x24x96xf32, #tpu.memory_space<vmem>>, vector<2x16x96xf32>
    %43 = vector.shape_cast %42 : vector<2x16x96xf32> to vector<32x96xf32>
    %c6_46 = arith.constant 6 : index
    %c0_47 = arith.constant 0 : index
    %c0_48 = arith.constant 0 : index
    %44 = vector.load %arg2[%c6_46, %c0_47, %c0_48] : memref<9x96x128xf32, #tpu.memory_space<vmem>>, vector<1x96x128xf32>
    %45 = vector.shape_cast %44 : vector<1x96x128xf32> to vector<96x128xf32>
    %cst_49 = arith.constant dense<0.000000e+00> : vector<32x128xf32>
    %46 = tpu.matmul %43, %45, %cst_49 {dimension_numbers = #tpu.dot_dimension_numbers<[1], [0], [0], [1], [0, 0, 1, 1], [], []>} : vector<32x96xf32>, vector<96x128xf32>, vector<32x128xf32> -> vector<32x128xf32>
    %47 = arith.addf %41, %46 : vector<32x128xf32>
    %c0_50 = arith.constant 0 : index
    %c7 = arith.constant 7 : index
    %c0_51 = arith.constant 0 : index
    %48 = vector.load %arg6[%c0_50, %c7, %c0_51] : memref<2x24x96xf32, #tpu.memory_space<vmem>>, vector<2x16x96xf32>
    %49 = vector.shape_cast %48 : vector<2x16x96xf32> to vector<32x96xf32>
    %c7_52 = arith.constant 7 : index
    %c0_53 = arith.constant 0 : index
    %c0_54 = arith.constant 0 : index
    %50 = vector.load %arg2[%c7_52, %c0_53, %c0_54] : memref<9x96x128xf32, #tpu.memory_space<vmem>>, vector<1x96x128xf32>
    %51 = vector.shape_cast %50 : vector<1x96x128xf32> to vector<96x128xf32>
    %cst_55 = arith.constant dense<0.000000e+00> : vector<32x128xf32>
    %52 = tpu.matmul %49, %51, %cst_55 {dimension_numbers = #tpu.dot_dimension_numbers<[1], [0], [0], [1], [0, 0, 1, 1], [], []>} : vector<32x96xf32>, vector<96x128xf32>, vector<32x128xf32> -> vector<32x128xf32>
    %53 = arith.addf %47, %52 : vector<32x128xf32>
    %c0_56 = arith.constant 0 : index
    %c8 = arith.constant 8 : index
    %c0_57 = arith.constant 0 : index
    %54 = vector.load %arg6[%c0_56, %c8, %c0_57] : memref<2x24x96xf32, #tpu.memory_space<vmem>>, vector<2x16x96xf32>
    %55 = vector.shape_cast %54 : vector<2x16x96xf32> to vector<32x96xf32>
    %c8_58 = arith.constant 8 : index
    %c0_59 = arith.constant 0 : index
    %c0_60 = arith.constant 0 : index
    %56 = vector.load %arg2[%c8_58, %c0_59, %c0_60] : memref<9x96x128xf32, #tpu.memory_space<vmem>>, vector<1x96x128xf32>
    %57 = vector.shape_cast %56 : vector<1x96x128xf32> to vector<96x128xf32>
    %cst_61 = arith.constant dense<0.000000e+00> : vector<32x128xf32>
    %58 = tpu.matmul %55, %57, %cst_61 {dimension_numbers = #tpu.dot_dimension_numbers<[1], [0], [0], [1], [0, 0, 1, 1], [], []>} : vector<32x96xf32>, vector<96x128xf32>, vector<32x128xf32> -> vector<32x128xf32>
    %59 = arith.addf %53, %58 : vector<32x128xf32>
    %cst_62 = arith.constant dense<0.000000e+00> : vector<128xf32>
    %60 = vector.multi_reduction <add>, %59, %cst_62 [0] : vector<32x128xf32> to vector<128xf32>
    %61 = vector.shape_cast %60 : vector<128xf32> to vector<1x128xf32>
    %62 = vector.extract_strided_slice %61 {offsets = [0, 0], sizes = [1, 8], strides = [1, 1]} : vector<1x128xf32> to vector<1x8xf32>
    %63 = vector.extract_strided_slice %61 {offsets = [0, 8], sizes = [1, 8], strides = [1, 1]} : vector<1x128xf32> to vector<1x8xf32>
    %64 = arith.addf %62, %63 : vector<1x8xf32>
    %65 = vector.extract_strided_slice %61 {offsets = [0, 16], sizes = [1, 8], strides = [1, 1]} : vector<1x128xf32> to vector<1x8xf32>
    %66 = arith.addf %64, %65 : vector<1x8xf32>
    %67 = vector.extract_strided_slice %61 {offsets = [0, 24], sizes = [1, 8], strides = [1, 1]} : vector<1x128xf32> to vector<1x8xf32>
    %68 = arith.addf %66, %67 : vector<1x8xf32>
    %69 = vector.extract_strided_slice %61 {offsets = [0, 32], sizes = [1, 8], strides = [1, 1]} : vector<1x128xf32> to vector<1x8xf32>
    %70 = arith.addf %68, %69 : vector<1x8xf32>
    %71 = vector.extract_strided_slice %61 {offsets = [0, 40], sizes = [1, 8], strides = [1, 1]} : vector<1x128xf32> to vector<1x8xf32>
    %72 = arith.addf %70, %71 : vector<1x8xf32>
    %73 = vector.extract_strided_slice %61 {offsets = [0, 48], sizes = [1, 8], strides = [1, 1]} : vector<1x128xf32> to vector<1x8xf32>
    %74 = arith.addf %72, %73 : vector<1x8xf32>
    %75 = vector.extract_strided_slice %61 {offsets = [0, 56], sizes = [1, 8], strides = [1, 1]} : vector<1x128xf32> to vector<1x8xf32>
    %76 = arith.addf %74, %75 : vector<1x8xf32>
    %77 = vector.extract_strided_slice %61 {offsets = [0, 64], sizes = [1, 8], strides = [1, 1]} : vector<1x128xf32> to vector<1x8xf32>
    %78 = arith.addf %76, %77 : vector<1x8xf32>
    %79 = vector.extract_strided_slice %61 {offsets = [0, 72], sizes = [1, 8], strides = [1, 1]} : vector<1x128xf32> to vector<1x8xf32>
    %80 = arith.addf %78, %79 : vector<1x8xf32>
    %81 = vector.extract_strided_slice %61 {offsets = [0, 80], sizes = [1, 8], strides = [1, 1]} : vector<1x128xf32> to vector<1x8xf32>
    %82 = arith.addf %80, %81 : vector<1x8xf32>
    %83 = vector.extract_strided_slice %61 {offsets = [0, 88], sizes = [1, 8], strides = [1, 1]} : vector<1x128xf32> to vector<1x8xf32>
    %84 = arith.addf %82, %83 : vector<1x8xf32>
    %85 = vector.extract_strided_slice %61 {offsets = [0, 96], sizes = [1, 8], strides = [1, 1]} : vector<1x128xf32> to vector<1x8xf32>
    %86 = arith.addf %84, %85 : vector<1x8xf32>
    %87 = vector.extract_strided_slice %61 {offsets = [0, 104], sizes = [1, 8], strides = [1, 1]} : vector<1x128xf32> to vector<1x8xf32>
    %88 = arith.addf %86, %87 : vector<1x8xf32>
    %89 = vector.extract_strided_slice %61 {offsets = [0, 112], sizes = [1, 8], strides = [1, 1]} : vector<1x128xf32> to vector<1x8xf32>
    %90 = arith.addf %88, %89 : vector<1x8xf32>
    %91 = vector.extract_strided_slice %61 {offsets = [0, 120], sizes = [1, 8], strides = [1, 1]} : vector<1x128xf32> to vector<1x8xf32>
    %92 = arith.addf %90, %91 : vector<1x8xf32>
    %cst_63 = arith.constant 5.120000e+02 : f32
    %93 = vector.broadcast %cst_63 : f32 to vector<1x8xf32>
    %94 = arith.divf %92, %93 : vector<1x8xf32>
    %95 = tpu.concatenate %94, %94, %94, %94, %94, %94, %94, %94, %94, %94, %94, %94, %94, %94, %94, %94 in 1 : vector<1x8xf32>, vector<1x8xf32>, vector<1x8xf32>, vector<1x8xf32>, vector<1x8xf32>, vector<1x8xf32>, vector<1x8xf32>, vector<1x8xf32>, vector<1x8xf32>, vector<1x8xf32>, vector<1x8xf32>, vector<1x8xf32>, vector<1x8xf32>, vector<1x8xf32>, vector<1x8xf32>, vector<1x8xf32> -> vector<1x128xf32>
    %96 = vector.broadcast %95 : vector<1x128xf32> to vector<32x128xf32>
    %97 = arith.subf %59, %96 : vector<32x128xf32>
    %98 = arith.mulf %97, %97 : vector<32x128xf32>
    %cst_64 = arith.constant dense<0.000000e+00> : vector<128xf32>
    %99 = vector.multi_reduction <add>, %98, %cst_64 [0] : vector<32x128xf32> to vector<128xf32>
    %100 = vector.shape_cast %99 : vector<128xf32> to vector<1x128xf32>
    %101 = vector.extract_strided_slice %100 {offsets = [0, 0], sizes = [1, 8], strides = [1, 1]} : vector<1x128xf32> to vector<1x8xf32>
    %102 = vector.extract_strided_slice %100 {offsets = [0, 8], sizes = [1, 8], strides = [1, 1]} : vector<1x128xf32> to vector<1x8xf32>
    %103 = arith.addf %101, %102 : vector<1x8xf32>
    %104 = vector.extract_strided_slice %100 {offsets = [0, 16], sizes = [1, 8], strides = [1, 1]} : vector<1x128xf32> to vector<1x8xf32>
    %105 = arith.addf %103, %104 : vector<1x8xf32>
    %106 = vector.extract_strided_slice %100 {offsets = [0, 24], sizes = [1, 8], strides = [1, 1]} : vector<1x128xf32> to vector<1x8xf32>
    %107 = arith.addf %105, %106 : vector<1x8xf32>
    %108 = vector.extract_strided_slice %100 {offsets = [0, 32], sizes = [1, 8], strides = [1, 1]} : vector<1x128xf32> to vector<1x8xf32>
    %109 = arith.addf %107, %108 : vector<1x8xf32>
    %110 = vector.extract_strided_slice %100 {offsets = [0, 40], sizes = [1, 8], strides = [1, 1]} : vector<1x128xf32> to vector<1x8xf32>
    %111 = arith.addf %109, %110 : vector<1x8xf32>
    %112 = vector.extract_strided_slice %100 {offsets = [0, 48], sizes = [1, 8], strides = [1, 1]} : vector<1x128xf32> to vector<1x8xf32>
    %113 = arith.addf %111, %112 : vector<1x8xf32>
    %114 = vector.extract_strided_slice %100 {offsets = [0, 56], sizes = [1, 8], strides = [1, 1]} : vector<1x128xf32> to vector<1x8xf32>
    %115 = arith.addf %113, %114 : vector<1x8xf32>
    %116 = vector.extract_strided_slice %100 {offsets = [0, 64], sizes = [1, 8], strides = [1, 1]} : vector<1x128xf32> to vector<1x8xf32>
    %117 = arith.addf %115, %116 : vector<1x8xf32>
    %118 = vector.extract_strided_slice %100 {offsets = [0, 72], sizes = [1, 8], strides = [1, 1]} : vector<1x128xf32> to vector<1x8xf32>
    %119 = arith.addf %117, %118 : vector<1x8xf32>
    %120 = vector.extract_strided_slice %100 {offsets = [0, 80], sizes = [1, 8], strides = [1, 1]} : vector<1x128xf32> to vector<1x8xf32>
    %121 = arith.addf %119, %120 : vector<1x8xf32>
    %122 = vector.extract_strided_slice %100 {offsets = [0, 88], sizes = [1, 8], strides = [1, 1]} : vector<1x128xf32> to vector<1x8xf32>
    %123 = arith.addf %121, %122 : vector<1x8xf32>
    %124 = vector.extract_strided_slice %100 {offsets = [0, 96], sizes = [1, 8], strides = [1, 1]} : vector<1x128xf32> to vector<1x8xf32>
    %125 = arith.addf %123, %124 : vector<1x8xf32>
    %126 = vector.extract_strided_slice %100 {offsets = [0, 104], sizes = [1, 8], strides = [1, 1]} : vector<1x128xf32> to vector<1x8xf32>
    %127 = arith.addf %125, %126 : vector<1x8xf32>
    %128 = vector.extract_strided_slice %100 {offsets = [0, 112], sizes = [1, 8], strides = [1, 1]} : vector<1x128xf32> to vector<1x8xf32>
    %129 = arith.addf %127, %128 : vector<1x8xf32>
    %130 = vector.extract_strided_slice %100 {offsets = [0, 120], sizes = [1, 8], strides = [1, 1]} : vector<1x128xf32> to vector<1x8xf32>
    %131 = arith.addf %129, %130 : vector<1x8xf32>
    %cst_65 = arith.constant 5.120000e+02 : f32
    %132 = vector.broadcast %cst_65 : f32 to vector<1x8xf32>
    %133 = arith.divf %131, %132 : vector<1x8xf32>
    %c0_66 = arith.constant 0 : index
    %c0_67 = arith.constant 0 : index
    %134 = vector.load %arg3[%c0_66, %c0_67] : memref<1x8xf32, #tpu.memory_space<vmem>>, vector<1x8xf32>
    %cst_68 = arith.constant 9.99999974E-6 : f32
    %135 = vector.broadcast %cst_68 : f32 to vector<1x8xf32>
    %136 = arith.addf %133, %135 : vector<1x8xf32>
    %137 = math.rsqrt %136 : vector<1x8xf32>
    %138 = arith.mulf %134, %137 : vector<1x8xf32>
    %c0_69 = arith.constant 0 : index
    %c0_70 = arith.constant 0 : index
    %139 = vector.load %arg4[%c0_69, %c0_70] : memref<1x8xf32, #tpu.memory_space<vmem>>, vector<1x8xf32>
    %140 = arith.mulf %94, %138 : vector<1x8xf32>
    %141 = arith.subf %139, %140 : vector<1x8xf32>
    %142 = tpu.concatenate %138, %138, %138, %138, %138, %138, %138, %138, %138, %138, %138, %138, %138, %138, %138, %138 in 1 : vector<1x8xf32>, vector<1x8xf32>, vector<1x8xf32>, vector<1x8xf32>, vector<1x8xf32>, vector<1x8xf32>, vector<1x8xf32>, vector<1x8xf32>, vector<1x8xf32>, vector<1x8xf32>, vector<1x8xf32>, vector<1x8xf32>, vector<1x8xf32>, vector<1x8xf32>, vector<1x8xf32>, vector<1x8xf32> -> vector<1x128xf32>
    %143 = tpu.concatenate %141, %141, %141, %141, %141, %141, %141, %141, %141, %141, %141, %141, %141, %141, %141, %141 in 1 : vector<1x8xf32>, vector<1x8xf32>, vector<1x8xf32>, vector<1x8xf32>, vector<1x8xf32>, vector<1x8xf32>, vector<1x8xf32>, vector<1x8xf32>, vector<1x8xf32>, vector<1x8xf32>, vector<1x8xf32>, vector<1x8xf32>, vector<1x8xf32>, vector<1x8xf32>, vector<1x8xf32>, vector<1x8xf32> -> vector<1x128xf32>
    %144 = vector.broadcast %142 : vector<1x128xf32> to vector<32x128xf32>
    %145 = arith.mulf %59, %144 : vector<32x128xf32>
    %146 = vector.broadcast %143 : vector<1x128xf32> to vector<32x128xf32>
    %147 = arith.addf %145, %146 : vector<32x128xf32>
    %cst_71 = arith.constant 0.000000e+00 : f32
    %148 = vector.broadcast %cst_71 : f32 to vector<32x128xf32>
    %149 = arith.cmpf oge, %147, %148 : vector<32x128xf32>
    %cst_72 = arith.constant 0.00999999977 : f32
    %150 = vector.broadcast %cst_72 : f32 to vector<32x128xf32>
    %151 = arith.mulf %150, %147 : vector<32x128xf32>
    %152 = arith.select %149, %147, %151 : vector<32x128xi1>, vector<32x128xf32>
    %c0_73 = arith.constant 0 : index
    %c0_74 = arith.constant 0 : index
    %153 = vector.load %arg5[%c0_73, %c0_74] : memref<32x128xf32, #tpu.memory_space<vmem>>, vector<32x128xf32>
    tpu.vector_store %arg5[%c0_73, %c0_74], %152 {strides = array<i32>} : memref<32x128xf32, #tpu.memory_space<vmem>>, vector<32x128xf32>,
    return
  }
  func.func @transform_0(%arg0: i32) -> (i32, i32) {
    %c0_i32 = arith.constant 0 : i32
    %c0_i32_0 = arith.constant 0 : i32
    %c0_i32_1 = arith.constant 0 : i32
    return %c0_i32, %c0_i32_0 : i32, i32
  }
  func.func @transform_1(%arg0: i32) -> (i32, i32, i32) {
    %c0_i32 = arith.constant 0 : i32
    %c0_i32_0 = arith.constant 0 : i32
    %c0_i32_1 = arith.constant 0 : i32
    %c0_i32_2 = arith.constant 0 : i32
    return %c0_i32, %c0_i32_0, %c0_i32_1 : i32, i32, i32
  }
  func.func @transform_2(%arg0: i32) -> (i32, i32) {
    %c0_i32 = arith.constant 0 : i32
    %c0_i32_0 = arith.constant 0 : i32
    %c0_i32_1 = arith.constant 0 : i32
    return %c0_i32, %c0_i32_0 : i32, i32
  }
  func.func @transform_3(%arg0: i32) -> (i32, i32) {
    %c0_i32 = arith.constant 0 : i32
    %c0_i32_0 = arith.constant 0 : i32
    %c0_i32_1 = arith.constant 0 : i32
    return %c0_i32, %c0_i32_0 : i32, i32
  }
  func.func @transform_4(%arg0: i32) -> (i32, i32) {
    %c0_i32 = arith.constant 0 : i32
    %c0_i32_0 = arith.constant 0 : i32
    %c0_i32_1 = arith.constant 0 : i32
    return %c0_i32, %c0_i32_0 : i32, i32
  }
}

module attributes {stable_mosaic.version = 11 : i64} {
  func.func @_fused_conv_bn_act_kernel(%arg0: i32, %arg1: memref<32x128xf32, #tpu.memory_space<vmem>>, %arg2: memref<9x192x64xf32, #tpu.memory_space<vmem>>, %arg3: memref<1x4xf32, #tpu.memory_space<vmem>>, %arg4: memref<1x4xf32, #tpu.memory_space<vmem>>, %arg5: memref<32x64xf32, #tpu.memory_space<vmem>>, %arg6: memref<2x24x192xf32, #tpu.memory_space<vmem>>) attributes {dimension_semantics = [#tpu.dimension_semantics<arbitrary>], iteration_bounds = array<i64: 1>, scalar_prefetch = 0 : i64, scratch_operands = 1 : i64, tpu.core_type = #tpu.core_type<tc>, window_params = [{pipeline_mode = #tpu.pipeline_mode<synchronous>, transform_indices = @transform_0, window_bounds = array<i64: 32, 128>}, {pipeline_mode = #tpu.pipeline_mode<synchronous>, transform_indices = @transform_1, window_bounds = array<i64: 9, 192, 64>}, {pipeline_mode = #tpu.pipeline_mode<synchronous>, transform_indices = @transform_2, window_bounds = array<i64: 1, 4>}, {pipeline_mode = #tpu.pipeline_mode<synchronous>, transform_indices = @transform_3, window_bounds = array<i64: 1, 4>}, {pipeline_mode = #tpu.pipeline_mode<synchronous>, transform_indices = @transform_4, window_bounds = array<i64: 32, 64>}]} {
    %cst = arith.constant 0.000000e+00 : f32
    %0 = vector.broadcast %cst : f32 to vector<2x24x192xf32>
    %c0 = arith.constant 0 : index
    %c0_0 = arith.constant 0 : index
    %c0_1 = arith.constant 0 : index
    %1 = vector.load %arg6[%c0, %c0_0, %c0_1] : memref<2x24x192xf32, #tpu.memory_space<vmem>>, vector<2x24x192xf32>
    tpu.vector_store %arg6[%c0, %c0_0, %c0_1], %0 {strides = array<i32>} : memref<2x24x192xf32, #tpu.memory_space<vmem>>, vector<2x24x192xf32>,
    %c0_2 = arith.constant 0 : index
    %c0_3 = arith.constant 0 : index
    %2 = vector.load %arg1[%c0_2, %c0_3] : memref<32x128xf32, #tpu.memory_space<vmem>>, vector<32x128xf32>
    %3 = vector.shape_cast %2 : vector<32x128xf32> to vector<2x16x128xf32>
    %c0_4 = arith.constant 0 : index
    %c4 = arith.constant 4 : index
    %c32 = arith.constant 32 : index
    %4 = vector.load %arg6[%c0_4, %c4, %c32] : memref<2x24x192xf32, #tpu.memory_space<vmem>>, vector<2x16x128xf32>
    tpu.vector_store %arg6[%c0_4, %c4, %c32], %3 {strides = array<i32>} : memref<2x24x192xf32, #tpu.memory_space<vmem>>, vector<2x16x128xf32>,
    %cst_5 = arith.constant 0.000000e+00 : f32
    %5 = vector.broadcast %cst_5 : f32 to vector<32x64xf32>
    %c0_6 = arith.constant 0 : index
    %c0_7 = arith.constant 0 : index
    %c0_8 = arith.constant 0 : index
    %6 = vector.load %arg6[%c0_6, %c0_7, %c0_8] : memref<2x24x192xf32, #tpu.memory_space<vmem>>, vector<2x16x192xf32>
    %7 = vector.shape_cast %6 : vector<2x16x192xf32> to vector<32x192xf32>
    %c0_9 = arith.constant 0 : index
    %c0_10 = arith.constant 0 : index
    %c0_11 = arith.constant 0 : index
    %8 = vector.load %arg2[%c0_9, %c0_10, %c0_11] : memref<9x192x64xf32, #tpu.memory_space<vmem>>, vector<1x192x64xf32>
    %9 = vector.shape_cast %8 : vector<1x192x64xf32> to vector<192x64xf32>
    %cst_12 = arith.constant dense<0.000000e+00> : vector<32x64xf32>
    %10 = tpu.matmul %7, %9, %cst_12 {dimension_numbers = #tpu.dot_dimension_numbers<[1], [0], [0], [1], [0, 0, 1, 1], [], []>} : vector<32x192xf32>, vector<192x64xf32>, vector<32x64xf32> -> vector<32x64xf32>
    %11 = arith.addf %5, %10 : vector<32x64xf32>
    %c0_13 = arith.constant 0 : index
    %c1 = arith.constant 1 : index
    %c0_14 = arith.constant 0 : index
    %12 = vector.load %arg6[%c0_13, %c1, %c0_14] : memref<2x24x192xf32, #tpu.memory_space<vmem>>, vector<2x16x192xf32>
    %13 = vector.shape_cast %12 : vector<2x16x192xf32> to vector<32x192xf32>
    %c1_15 = arith.constant 1 : index
    %c0_16 = arith.constant 0 : index
    %c0_17 = arith.constant 0 : index
    %14 = vector.load %arg2[%c1_15, %c0_16, %c0_17] : memref<9x192x64xf32, #tpu.memory_space<vmem>>, vector<1x192x64xf32>
    %15 = vector.shape_cast %14 : vector<1x192x64xf32> to vector<192x64xf32>
    %cst_18 = arith.constant dense<0.000000e+00> : vector<32x64xf32>
    %16 = tpu.matmul %13, %15, %cst_18 {dimension_numbers = #tpu.dot_dimension_numbers<[1], [0], [0], [1], [0, 0, 1, 1], [], []>} : vector<32x192xf32>, vector<192x64xf32>, vector<32x64xf32> -> vector<32x64xf32>
    %17 = arith.addf %11, %16 : vector<32x64xf32>
    %c0_19 = arith.constant 0 : index
    %c2 = arith.constant 2 : index
    %c0_20 = arith.constant 0 : index
    %18 = vector.load %arg6[%c0_19, %c2, %c0_20] : memref<2x24x192xf32, #tpu.memory_space<vmem>>, vector<2x16x192xf32>
    %19 = vector.shape_cast %18 : vector<2x16x192xf32> to vector<32x192xf32>
    %c2_21 = arith.constant 2 : index
    %c0_22 = arith.constant 0 : index
    %c0_23 = arith.constant 0 : index
    %20 = vector.load %arg2[%c2_21, %c0_22, %c0_23] : memref<9x192x64xf32, #tpu.memory_space<vmem>>, vector<1x192x64xf32>
    %21 = vector.shape_cast %20 : vector<1x192x64xf32> to vector<192x64xf32>
    %cst_24 = arith.constant dense<0.000000e+00> : vector<32x64xf32>
    %22 = tpu.matmul %19, %21, %cst_24 {dimension_numbers = #tpu.dot_dimension_numbers<[1], [0], [0], [1], [0, 0, 1, 1], [], []>} : vector<32x192xf32>, vector<192x64xf32>, vector<32x64xf32> -> vector<32x64xf32>
    %23 = arith.addf %17, %22 : vector<32x64xf32>
    %c0_25 = arith.constant 0 : index
    %c3 = arith.constant 3 : index
    %c0_26 = arith.constant 0 : index
    %24 = vector.load %arg6[%c0_25, %c3, %c0_26] : memref<2x24x192xf32, #tpu.memory_space<vmem>>, vector<2x16x192xf32>
    %25 = vector.shape_cast %24 : vector<2x16x192xf32> to vector<32x192xf32>
    %c3_27 = arith.constant 3 : index
    %c0_28 = arith.constant 0 : index
    %c0_29 = arith.constant 0 : index
    %26 = vector.load %arg2[%c3_27, %c0_28, %c0_29] : memref<9x192x64xf32, #tpu.memory_space<vmem>>, vector<1x192x64xf32>
    %27 = vector.shape_cast %26 : vector<1x192x64xf32> to vector<192x64xf32>
    %cst_30 = arith.constant dense<0.000000e+00> : vector<32x64xf32>
    %28 = tpu.matmul %25, %27, %cst_30 {dimension_numbers = #tpu.dot_dimension_numbers<[1], [0], [0], [1], [0, 0, 1, 1], [], []>} : vector<32x192xf32>, vector<192x64xf32>, vector<32x64xf32> -> vector<32x64xf32>
    %29 = arith.addf %23, %28 : vector<32x64xf32>
    %c0_31 = arith.constant 0 : index
    %c4_32 = arith.constant 4 : index
    %c0_33 = arith.constant 0 : index
    %30 = vector.load %arg6[%c0_31, %c4_32, %c0_33] : memref<2x24x192xf32, #tpu.memory_space<vmem>>, vector<2x16x192xf32>
    %31 = vector.shape_cast %30 : vector<2x16x192xf32> to vector<32x192xf32>
    %c4_34 = arith.constant 4 : index
    %c0_35 = arith.constant 0 : index
    %c0_36 = arith.constant 0 : index
    %32 = vector.load %arg2[%c4_34, %c0_35, %c0_36] : memref<9x192x64xf32, #tpu.memory_space<vmem>>, vector<1x192x64xf32>
    %33 = vector.shape_cast %32 : vector<1x192x64xf32> to vector<192x64xf32>
    %cst_37 = arith.constant dense<0.000000e+00> : vector<32x64xf32>
    %34 = tpu.matmul %31, %33, %cst_37 {dimension_numbers = #tpu.dot_dimension_numbers<[1], [0], [0], [1], [0, 0, 1, 1], [], []>} : vector<32x192xf32>, vector<192x64xf32>, vector<32x64xf32> -> vector<32x64xf32>
    %35 = arith.addf %29, %34 : vector<32x64xf32>
    %c0_38 = arith.constant 0 : index
    %c5 = arith.constant 5 : index
    %c0_39 = arith.constant 0 : index
    %36 = vector.load %arg6[%c0_38, %c5, %c0_39] : memref<2x24x192xf32, #tpu.memory_space<vmem>>, vector<2x16x192xf32>
    %37 = vector.shape_cast %36 : vector<2x16x192xf32> to vector<32x192xf32>
    %c5_40 = arith.constant 5 : index
    %c0_41 = arith.constant 0 : index
    %c0_42 = arith.constant 0 : index
    %38 = vector.load %arg2[%c5_40, %c0_41, %c0_42] : memref<9x192x64xf32, #tpu.memory_space<vmem>>, vector<1x192x64xf32>
    %39 = vector.shape_cast %38 : vector<1x192x64xf32> to vector<192x64xf32>
    %cst_43 = arith.constant dense<0.000000e+00> : vector<32x64xf32>
    %40 = tpu.matmul %37, %39, %cst_43 {dimension_numbers = #tpu.dot_dimension_numbers<[1], [0], [0], [1], [0, 0, 1, 1], [], []>} : vector<32x192xf32>, vector<192x64xf32>, vector<32x64xf32> -> vector<32x64xf32>
    %41 = arith.addf %35, %40 : vector<32x64xf32>
    %c0_44 = arith.constant 0 : index
    %c6 = arith.constant 6 : index
    %c0_45 = arith.constant 0 : index
    %42 = vector.load %arg6[%c0_44, %c6, %c0_45] : memref<2x24x192xf32, #tpu.memory_space<vmem>>, vector<2x16x192xf32>
    %43 = vector.shape_cast %42 : vector<2x16x192xf32> to vector<32x192xf32>
    %c6_46 = arith.constant 6 : index
    %c0_47 = arith.constant 0 : index
    %c0_48 = arith.constant 0 : index
    %44 = vector.load %arg2[%c6_46, %c0_47, %c0_48] : memref<9x192x64xf32, #tpu.memory_space<vmem>>, vector<1x192x64xf32>
    %45 = vector.shape_cast %44 : vector<1x192x64xf32> to vector<192x64xf32>
    %cst_49 = arith.constant dense<0.000000e+00> : vector<32x64xf32>
    %46 = tpu.matmul %43, %45, %cst_49 {dimension_numbers = #tpu.dot_dimension_numbers<[1], [0], [0], [1], [0, 0, 1, 1], [], []>} : vector<32x192xf32>, vector<192x64xf32>, vector<32x64xf32> -> vector<32x64xf32>
    %47 = arith.addf %41, %46 : vector<32x64xf32>
    %c0_50 = arith.constant 0 : index
    %c7 = arith.constant 7 : index
    %c0_51 = arith.constant 0 : index
    %48 = vector.load %arg6[%c0_50, %c7, %c0_51] : memref<2x24x192xf32, #tpu.memory_space<vmem>>, vector<2x16x192xf32>
    %49 = vector.shape_cast %48 : vector<2x16x192xf32> to vector<32x192xf32>
    %c7_52 = arith.constant 7 : index
    %c0_53 = arith.constant 0 : index
    %c0_54 = arith.constant 0 : index
    %50 = vector.load %arg2[%c7_52, %c0_53, %c0_54] : memref<9x192x64xf32, #tpu.memory_space<vmem>>, vector<1x192x64xf32>
    %51 = vector.shape_cast %50 : vector<1x192x64xf32> to vector<192x64xf32>
    %cst_55 = arith.constant dense<0.000000e+00> : vector<32x64xf32>
    %52 = tpu.matmul %49, %51, %cst_55 {dimension_numbers = #tpu.dot_dimension_numbers<[1], [0], [0], [1], [0, 0, 1, 1], [], []>} : vector<32x192xf32>, vector<192x64xf32>, vector<32x64xf32> -> vector<32x64xf32>
    %53 = arith.addf %47, %52 : vector<32x64xf32>
    %c0_56 = arith.constant 0 : index
    %c8 = arith.constant 8 : index
    %c0_57 = arith.constant 0 : index
    %54 = vector.load %arg6[%c0_56, %c8, %c0_57] : memref<2x24x192xf32, #tpu.memory_space<vmem>>, vector<2x16x192xf32>
    %55 = vector.shape_cast %54 : vector<2x16x192xf32> to vector<32x192xf32>
    %c8_58 = arith.constant 8 : index
    %c0_59 = arith.constant 0 : index
    %c0_60 = arith.constant 0 : index
    %56 = vector.load %arg2[%c8_58, %c0_59, %c0_60] : memref<9x192x64xf32, #tpu.memory_space<vmem>>, vector<1x192x64xf32>
    %57 = vector.shape_cast %56 : vector<1x192x64xf32> to vector<192x64xf32>
    %cst_61 = arith.constant dense<0.000000e+00> : vector<32x64xf32>
    %58 = tpu.matmul %55, %57, %cst_61 {dimension_numbers = #tpu.dot_dimension_numbers<[1], [0], [0], [1], [0, 0, 1, 1], [], []>} : vector<32x192xf32>, vector<192x64xf32>, vector<32x64xf32> -> vector<32x64xf32>
    %59 = arith.addf %53, %58 : vector<32x64xf32>
    %cst_62 = arith.constant dense<0.000000e+00> : vector<64xf32>
    %60 = vector.multi_reduction <add>, %59, %cst_62 [0] : vector<32x64xf32> to vector<64xf32>
    %61 = vector.shape_cast %60 : vector<64xf32> to vector<1x64xf32>
    %62 = vector.extract_strided_slice %61 {offsets = [0, 0], sizes = [1, 4], strides = [1, 1]} : vector<1x64xf32> to vector<1x4xf32>
    %63 = vector.extract_strided_slice %61 {offsets = [0, 4], sizes = [1, 4], strides = [1, 1]} : vector<1x64xf32> to vector<1x4xf32>
    %64 = arith.addf %62, %63 : vector<1x4xf32>
    %65 = vector.extract_strided_slice %61 {offsets = [0, 8], sizes = [1, 4], strides = [1, 1]} : vector<1x64xf32> to vector<1x4xf32>
    %66 = arith.addf %64, %65 : vector<1x4xf32>
    %67 = vector.extract_strided_slice %61 {offsets = [0, 12], sizes = [1, 4], strides = [1, 1]} : vector<1x64xf32> to vector<1x4xf32>
    %68 = arith.addf %66, %67 : vector<1x4xf32>
    %69 = vector.extract_strided_slice %61 {offsets = [0, 16], sizes = [1, 4], strides = [1, 1]} : vector<1x64xf32> to vector<1x4xf32>
    %70 = arith.addf %68, %69 : vector<1x4xf32>
    %71 = vector.extract_strided_slice %61 {offsets = [0, 20], sizes = [1, 4], strides = [1, 1]} : vector<1x64xf32> to vector<1x4xf32>
    %72 = arith.addf %70, %71 : vector<1x4xf32>
    %73 = vector.extract_strided_slice %61 {offsets = [0, 24], sizes = [1, 4], strides = [1, 1]} : vector<1x64xf32> to vector<1x4xf32>
    %74 = arith.addf %72, %73 : vector<1x4xf32>
    %75 = vector.extract_strided_slice %61 {offsets = [0, 28], sizes = [1, 4], strides = [1, 1]} : vector<1x64xf32> to vector<1x4xf32>
    %76 = arith.addf %74, %75 : vector<1x4xf32>
    %77 = vector.extract_strided_slice %61 {offsets = [0, 32], sizes = [1, 4], strides = [1, 1]} : vector<1x64xf32> to vector<1x4xf32>
    %78 = arith.addf %76, %77 : vector<1x4xf32>
    %79 = vector.extract_strided_slice %61 {offsets = [0, 36], sizes = [1, 4], strides = [1, 1]} : vector<1x64xf32> to vector<1x4xf32>
    %80 = arith.addf %78, %79 : vector<1x4xf32>
    %81 = vector.extract_strided_slice %61 {offsets = [0, 40], sizes = [1, 4], strides = [1, 1]} : vector<1x64xf32> to vector<1x4xf32>
    %82 = arith.addf %80, %81 : vector<1x4xf32>
    %83 = vector.extract_strided_slice %61 {offsets = [0, 44], sizes = [1, 4], strides = [1, 1]} : vector<1x64xf32> to vector<1x4xf32>
    %84 = arith.addf %82, %83 : vector<1x4xf32>
    %85 = vector.extract_strided_slice %61 {offsets = [0, 48], sizes = [1, 4], strides = [1, 1]} : vector<1x64xf32> to vector<1x4xf32>
    %86 = arith.addf %84, %85 : vector<1x4xf32>
    %87 = vector.extract_strided_slice %61 {offsets = [0, 52], sizes = [1, 4], strides = [1, 1]} : vector<1x64xf32> to vector<1x4xf32>
    %88 = arith.addf %86, %87 : vector<1x4xf32>
    %89 = vector.extract_strided_slice %61 {offsets = [0, 56], sizes = [1, 4], strides = [1, 1]} : vector<1x64xf32> to vector<1x4xf32>
    %90 = arith.addf %88, %89 : vector<1x4xf32>
    %91 = vector.extract_strided_slice %61 {offsets = [0, 60], sizes = [1, 4], strides = [1, 1]} : vector<1x64xf32> to vector<1x4xf32>
    %92 = arith.addf %90, %91 : vector<1x4xf32>
    %cst_63 = arith.constant 5.120000e+02 : f32
    %93 = vector.broadcast %cst_63 : f32 to vector<1x4xf32>
    %94 = arith.divf %92, %93 : vector<1x4xf32>
    %95 = tpu.concatenate %94, %94, %94, %94, %94, %94, %94, %94, %94, %94, %94, %94, %94, %94, %94, %94 in 1 : vector<1x4xf32>, vector<1x4xf32>, vector<1x4xf32>, vector<1x4xf32>, vector<1x4xf32>, vector<1x4xf32>, vector<1x4xf32>, vector<1x4xf32>, vector<1x4xf32>, vector<1x4xf32>, vector<1x4xf32>, vector<1x4xf32>, vector<1x4xf32>, vector<1x4xf32>, vector<1x4xf32>, vector<1x4xf32> -> vector<1x64xf32>
    %96 = vector.broadcast %95 : vector<1x64xf32> to vector<32x64xf32>
    %97 = arith.subf %59, %96 : vector<32x64xf32>
    %98 = arith.mulf %97, %97 : vector<32x64xf32>
    %cst_64 = arith.constant dense<0.000000e+00> : vector<64xf32>
    %99 = vector.multi_reduction <add>, %98, %cst_64 [0] : vector<32x64xf32> to vector<64xf32>
    %100 = vector.shape_cast %99 : vector<64xf32> to vector<1x64xf32>
    %101 = vector.extract_strided_slice %100 {offsets = [0, 0], sizes = [1, 4], strides = [1, 1]} : vector<1x64xf32> to vector<1x4xf32>
    %102 = vector.extract_strided_slice %100 {offsets = [0, 4], sizes = [1, 4], strides = [1, 1]} : vector<1x64xf32> to vector<1x4xf32>
    %103 = arith.addf %101, %102 : vector<1x4xf32>
    %104 = vector.extract_strided_slice %100 {offsets = [0, 8], sizes = [1, 4], strides = [1, 1]} : vector<1x64xf32> to vector<1x4xf32>
    %105 = arith.addf %103, %104 : vector<1x4xf32>
    %106 = vector.extract_strided_slice %100 {offsets = [0, 12], sizes = [1, 4], strides = [1, 1]} : vector<1x64xf32> to vector<1x4xf32>
    %107 = arith.addf %105, %106 : vector<1x4xf32>
    %108 = vector.extract_strided_slice %100 {offsets = [0, 16], sizes = [1, 4], strides = [1, 1]} : vector<1x64xf32> to vector<1x4xf32>
    %109 = arith.addf %107, %108 : vector<1x4xf32>
    %110 = vector.extract_strided_slice %100 {offsets = [0, 20], sizes = [1, 4], strides = [1, 1]} : vector<1x64xf32> to vector<1x4xf32>
    %111 = arith.addf %109, %110 : vector<1x4xf32>
    %112 = vector.extract_strided_slice %100 {offsets = [0, 24], sizes = [1, 4], strides = [1, 1]} : vector<1x64xf32> to vector<1x4xf32>
    %113 = arith.addf %111, %112 : vector<1x4xf32>
    %114 = vector.extract_strided_slice %100 {offsets = [0, 28], sizes = [1, 4], strides = [1, 1]} : vector<1x64xf32> to vector<1x4xf32>
    %115 = arith.addf %113, %114 : vector<1x4xf32>
    %116 = vector.extract_strided_slice %100 {offsets = [0, 32], sizes = [1, 4], strides = [1, 1]} : vector<1x64xf32> to vector<1x4xf32>
    %117 = arith.addf %115, %116 : vector<1x4xf32>
    %118 = vector.extract_strided_slice %100 {offsets = [0, 36], sizes = [1, 4], strides = [1, 1]} : vector<1x64xf32> to vector<1x4xf32>
    %119 = arith.addf %117, %118 : vector<1x4xf32>
    %120 = vector.extract_strided_slice %100 {offsets = [0, 40], sizes = [1, 4], strides = [1, 1]} : vector<1x64xf32> to vector<1x4xf32>
    %121 = arith.addf %119, %120 : vector<1x4xf32>
    %122 = vector.extract_strided_slice %100 {offsets = [0, 44], sizes = [1, 4], strides = [1, 1]} : vector<1x64xf32> to vector<1x4xf32>
    %123 = arith.addf %121, %122 : vector<1x4xf32>
    %124 = vector.extract_strided_slice %100 {offsets = [0, 48], sizes = [1, 4], strides = [1, 1]} : vector<1x64xf32> to vector<1x4xf32>
    %125 = arith.addf %123, %124 : vector<1x4xf32>
    %126 = vector.extract_strided_slice %100 {offsets = [0, 52], sizes = [1, 4], strides = [1, 1]} : vector<1x64xf32> to vector<1x4xf32>
    %127 = arith.addf %125, %126 : vector<1x4xf32>
    %128 = vector.extract_strided_slice %100 {offsets = [0, 56], sizes = [1, 4], strides = [1, 1]} : vector<1x64xf32> to vector<1x4xf32>
    %129 = arith.addf %127, %128 : vector<1x4xf32>
    %130 = vector.extract_strided_slice %100 {offsets = [0, 60], sizes = [1, 4], strides = [1, 1]} : vector<1x64xf32> to vector<1x4xf32>
    %131 = arith.addf %129, %130 : vector<1x4xf32>
    %cst_65 = arith.constant 5.120000e+02 : f32
    %132 = vector.broadcast %cst_65 : f32 to vector<1x4xf32>
    %133 = arith.divf %131, %132 : vector<1x4xf32>
    %c0_66 = arith.constant 0 : index
    %c0_67 = arith.constant 0 : index
    %134 = vector.load %arg3[%c0_66, %c0_67] : memref<1x4xf32, #tpu.memory_space<vmem>>, vector<1x4xf32>
    %cst_68 = arith.constant 9.99999974E-6 : f32
    %135 = vector.broadcast %cst_68 : f32 to vector<1x4xf32>
    %136 = arith.addf %133, %135 : vector<1x4xf32>
    %137 = math.rsqrt %136 : vector<1x4xf32>
    %138 = arith.mulf %134, %137 : vector<1x4xf32>
    %c0_69 = arith.constant 0 : index
    %c0_70 = arith.constant 0 : index
    %139 = vector.load %arg4[%c0_69, %c0_70] : memref<1x4xf32, #tpu.memory_space<vmem>>, vector<1x4xf32>
    %140 = arith.mulf %94, %138 : vector<1x4xf32>
    %141 = arith.subf %139, %140 : vector<1x4xf32>
    %142 = tpu.concatenate %138, %138, %138, %138, %138, %138, %138, %138, %138, %138, %138, %138, %138, %138, %138, %138 in 1 : vector<1x4xf32>, vector<1x4xf32>, vector<1x4xf32>, vector<1x4xf32>, vector<1x4xf32>, vector<1x4xf32>, vector<1x4xf32>, vector<1x4xf32>, vector<1x4xf32>, vector<1x4xf32>, vector<1x4xf32>, vector<1x4xf32>, vector<1x4xf32>, vector<1x4xf32>, vector<1x4xf32>, vector<1x4xf32> -> vector<1x64xf32>
    %143 = tpu.concatenate %141, %141, %141, %141, %141, %141, %141, %141, %141, %141, %141, %141, %141, %141, %141, %141 in 1 : vector<1x4xf32>, vector<1x4xf32>, vector<1x4xf32>, vector<1x4xf32>, vector<1x4xf32>, vector<1x4xf32>, vector<1x4xf32>, vector<1x4xf32>, vector<1x4xf32>, vector<1x4xf32>, vector<1x4xf32>, vector<1x4xf32>, vector<1x4xf32>, vector<1x4xf32>, vector<1x4xf32>, vector<1x4xf32> -> vector<1x64xf32>
    %144 = vector.broadcast %142 : vector<1x64xf32> to vector<32x64xf32>
    %145 = arith.mulf %59, %144 : vector<32x64xf32>
    %146 = vector.broadcast %143 : vector<1x64xf32> to vector<32x64xf32>
    %147 = arith.addf %145, %146 : vector<32x64xf32>
    %c0_71 = arith.constant 0 : index
    %c0_72 = arith.constant 0 : index
    %148 = vector.load %arg5[%c0_71, %c0_72] : memref<32x64xf32, #tpu.memory_space<vmem>>, vector<32x64xf32>
    tpu.vector_store %arg5[%c0_71, %c0_72], %147 {strides = array<i32>} : memref<32x64xf32, #tpu.memory_space<vmem>>, vector<32x64xf32>,
    return
  }
  func.func @transform_0(%arg0: i32) -> (i32, i32) {
    %c0_i32 = arith.constant 0 : i32
    %c0_i32_0 = arith.constant 0 : i32
    %c0_i32_1 = arith.constant 0 : i32
    return %c0_i32, %c0_i32_0 : i32, i32
  }
  func.func @transform_1(%arg0: i32) -> (i32, i32, i32) {
    %c0_i32 = arith.constant 0 : i32
    %c0_i32_0 = arith.constant 0 : i32
    %c0_i32_1 = arith.constant 0 : i32
    %c0_i32_2 = arith.constant 0 : i32
    return %c0_i32, %c0_i32_0, %c0_i32_1 : i32, i32, i32
  }
  func.func @transform_2(%arg0: i32) -> (i32, i32) {
    %c0_i32 = arith.constant 0 : i32
    %c0_i32_0 = arith.constant 0 : i32
    %c0_i32_1 = arith.constant 0 : i32
    return %c0_i32, %c0_i32_0 : i32, i32
  }
  func.func @transform_3(%arg0: i32) -> (i32, i32) {
    %c0_i32 = arith.constant 0 : i32
    %c0_i32_0 = arith.constant 0 : i32
    %c0_i32_1 = arith.constant 0 : i32
    return %c0_i32, %c0_i32_0 : i32, i32
  }
  func.func @transform_4(%arg0: i32) -> (i32, i32) {
    %c0_i32 = arith.constant 0 : i32
    %c0_i32_0 = arith.constant 0 : i32
    %c0_i32_1 = arith.constant 0 : i32
    return %c0_i32, %c0_i32_0 : i32, i32
  }
}

</mosaic_0001>

<bundles_post_ra>
// kernel: a_call__.2
= control target key start
LH: loop header
LB: loop body
LE: loop exit
PB: predicated region body
PF: predicated region fallthrough
CT: control target
= control target key end

     0   :  { %vm17_vm0 = vcmask 785408   ;;  %v2329_v3 = vmov 0.0   ;;  %s2330_s21 = smov 16   ;;  %vm44_vm1 = vcmask 654464   ;;  %s2332_s6 = smov 120   ;;  %vm1220_vm2 = vcmask 64512   ;;  %s2944_s0 = inlined_call_operand.vmem [shape: f32[32,64], index: 0, kind: input, shape index: {}]   ;;  %s2945_s1 = inlined_call_operand.vmem [shape: f32[9,96,128], index: 1, kind: input, shape index: {}]   ;;  %s2946_s2 = inlined_call_operand.vmem [shape: f32[1,8], index: 2, kind: input, shape index: {}]   ;;  %s2947_s3 = inlined_call_operand.vmem [shape: f32[1,8], index: 3, kind: input, shape index: {}]   ;;  %s2948_s4 = inlined_call_operand.vmem [shape: f32[32,128], index: 4, kind: output, shape index: {}]  }
   0x1   :  { %v24_v0 = vld [vmem:[%s2944_s0] sm:$0xff]  ;;  %v26_v1 = vld [vmem:[%s2944_s0 + $0x10] sm:$0xff]  ;;  %v25_v2 = vld [vmem:[%s2944_s0 + $0x8] sm:$0xff]  ;;  %18 = vst.msk [vmem:[#allocation2] sm:$0xff] %vm17_vm0, %v2329_v3  ;;  %s2334_s7 = smov 104   ;;  %s2335_s8 = smov 80  }
   0x2   :  { %19 = vst.msk [vmem:[#allocation2 + $0x8] sm:$0xff] %vm17_vm0, %v2329_v3  ;;  %20 = vst.msk [vmem:[#allocation2 + $0x10] sm:$0xff] %vm17_vm0, %v2329_v3  ;;  %32 = vrot.lane.b32.xlu0 %v24_v0, %s2330_s21  ;;  %36 = vrot.lane.b32.xlu1 %v26_v1, %s2330_s21  ;;  %v27_v4 = vld [vmem:[%s2944_s0 + $0x18] sm:$0xff]  ;;  %v1505_v5 = vld [vmem:[%s2945_s1 + $0x60] sm:$0xff]  ;;  %s2333_s0 = smov 96   ;;  %s2336_s9 = smov 88  }
   0x3   :  { %21 = vst.msk [vmem:[#allocation2 + $0x18] sm:$0xff] %vm17_vm0, %v2329_v3  ;;  %22 = vst.msk [vmem:[#allocation2 + $0x20] sm:$0xff] %vm17_vm0, %v2329_v3  ;;  %v1506_v6 = vld [vmem:[%s2945_s1 + $0x68] sm:$0xff]  ;;  %v1557_v7 = vld [vmem:[%s2945_s1 + $0x180] sm:$0xff]  ;;  %s2337_s10 = smov 64   ;;  %s2338_s11 = smov 72  }
   0x4   :  { %23 = vst.msk [vmem:[#allocation2 + $0x28] sm:$0xff] %vm17_vm0, %v2329_v3  ;;  %v1558_v8 = vld [vmem:[%s2945_s1 + $0x188] sm:$0xff]  ;;  %v2051_v9 = vpack.c.bf16 %v1506_v6, %v1505_v5  ;;  %v1507_v11 = vld [vmem:[%s2945_s1 + $0x70] sm:$0xff]  ;;  %v1508_v12 = vld [vmem:[%s2945_s1 + $0x78] sm:$0xff]  ;;  %s2339_s12 = smov 48   ;;  %s2340_s13 = smov 56  }
   0x5   :  { %v2147_v10 = vpack.c.bf16 %v1558_v8, %v1557_v7  ;;  %v1559_v13 = vld [vmem:[%s2945_s1 + $0x190] sm:$0xff]  ;;  %v2055_v14 = vpack.c.bf16 %v1508_v12, %v1507_v11  ;;  %v1560_v15 = vld [vmem:[%s2945_s1 + $0x198] sm:$0xff]  ;;  %v1509_v16 = vld [vmem:[%s2945_s1 + $0x80] sm:$0xff]  ;;  %s2341_s14 = smov 32   ;;  %s2342_s15 = smov 40   ;;  %vm1222_vm3 = vcmask 130048  }
   0x6   :  { %v1510_v17 = vld [vmem:[%s2945_s1 + $0x88] sm:$0xff]  ;;  %34 = vrot.lane.b32.xlu0 %v25_v2, %s2330_s21  ;;  %38 = vrot.lane.b32.xlu1 %v27_v4, %s2330_s21  ;;  %v2151_v18 = vpack.c.bf16 %v1560_v15, %v1559_v13  ;;  %v1561_v19 = vld [vmem:[%s2945_s1 + $0x1a0] sm:$0xff]  ;;  %s2343_s16 = smov 24   ;;  %s2344_s17 = smov 8   ;;  %vm1224_vm4 = vcmask 195584   ;;  %vm1226_vm5 = vcmask 261120  }
   0x7   :  { %v1562_v20 = vld [vmem:[%s2945_s1 + $0x1a8] sm:$0xff]  ;;  %2052 = vmatprep.subr.bf16.mxu1 %v2051_v9  ;;  %2148 = vmatprep.subr.bf16.mxu0 %v2147_v10  ;;  %v2059_v21 = vpack.c.bf16 %v1510_v17, %v1509_v16  ;;  %v1511_v23 = vld [vmem:[%s2945_s1 + $0x90] sm:$0xff]  ;;  %v1512_v24 = vld [vmem:[%s2945_s1 + $0x98] sm:$0xff]  ;;  %vm1228_vm6 = vcmask 326656   ;;  %vm1230_vm7 = vcmask 392192   ;;  %vm1232_vm8 = vcmask 457728  }
   0x8   :  { %2054 = vmatpush3.bf16.msra.mxu1 %v2051_v9  ;;  %2150 = vmatpush3.bf16.msra.mxu0 %v2147_v10  ;;  %v2155_v22 = vpack.c.bf16 %v1562_v20, %v1561_v19  ;;  %v1563_v25 = vld [vmem:[%s2945_s1 + $0x1b0] sm:$0xff]  ;;  %v1564_v26 = vld [vmem:[%s2945_s1 + $0x1b8] sm:$0xff]  ;;  %v2063_v27 = vpack.c.bf16 %v1512_v24, %v1511_v23  ;;  %v1513_v29 = vld [vmem:[%s2945_s1 + $0xa0] sm:$0xff]  ;;  %vm1234_vm9 = vcmask 523264   ;;  %vm1236_vm10 = vcmask 588800  }
   0x9   :  { %2056 = vmatprep.subr.bf16.mxu1 %v2055_v14  ;;  %2152 = vmatprep.subr.bf16.mxu0 %v2151_v18  ;;  %v2159_v28 = vpack.c.bf16 %v1564_v26, %v1563_v25  ;;  %v1514_v30 = vld [vmem:[%s2945_s1 + $0xa8] sm:$0xff]  ;;  %v1565_v31 = vld [vmem:[%s2945_s1 + $0x1c0] sm:$0xff]  ;;  %v1515_v35 = vld [vmem:[%s2945_s1 + $0xb0] sm:$0xff]  ;;  %vm1238_vm11 = vcmask 654336   ;;  %vm1240_vm12 = vcmask 719872   ;;  %vm1243_vm13 = vcmask 850944  }
   0xa   :  { %v1566_v32 = vld [vmem:[%s2945_s1 + $0x1c8] sm:$0xff]  ;;  %v2067_v33 = vpack.c.bf16 %v1514_v30, %v1513_v29  ;;  %v1516_v36 = vld [vmem:[%s2945_s1 + $0xb8] sm:$0xff]  ;;  %v1567_v37 = vld [vmem:[%s2945_s1 + $0x1d0] sm:$0xff]  ;;  %vm1245_vm14 = vcmask 916480   ;;  %vm1247_vm15 = vcmask 982016  }
   0xb   :  { %v2163_v34 = vpack.c.bf16 %v1566_v32, %v1565_v31  ;;  %v1568_v38 = vld [vmem:[%s2945_s1 + $0x1d8] sm:$0xff]  ;;  %v2071_v39 = vpack.c.bf16 %v1516_v36, %v1515_v35  ;;  %v53_v41 = vld [vmem:[%s2945_s1] sm:$0xff]  ;;  %v54_v42 = vld [vmem:[%s2945_s1 + $0x8] sm:$0xff] }
   0xc   :  { %2058 = vmatpush3.bf16.msra.mxu1 %v2055_v14  ;;  %2154 = vmatpush3.bf16.msra.mxu0 %v2151_v18  ;;  %v2167_v40 = vpack.c.bf16 %v1568_v38, %v1567_v37  ;;  %v1573_v43 = vld [vmem:[%s2945_s1 + $0x1e0] sm:$0xff]  ;;  %v1574_v44 = vld [vmem:[%s2945_s1 + $0x1e8] sm:$0xff]  ;;  %v2075_v45 = vpack.c.bf16 %v54_v42, %v53_v41  ;;  %v55_v51 = vld [vmem:[%s2945_s1 + $0x10] sm:$0xff] }
   0xd   :  { %2060 = vmatprep.subr.bf16.mxu1 %v2059_v21  ;;  %2156 = vmatprep.subr.bf16.mxu0 %v2155_v22  ;;  %v2171_v46 = vpack.c.bf16 %v1574_v44, %v1573_v43  ;;  %v56_v54 = vld [vmem:[%s2945_s1 + $0x18] sm:$0xff]  ;;  %v1575_v55 = vld [vmem:[%s2945_s1 + $0x1f0] sm:$0xff]  ;;  %v57_v58 = vld [vmem:[%s2945_s1 + $0x20] sm:$0xff] }
   0xe   :  { %v1576_v56 = vld [vmem:[%s2945_s1 + $0x1f8] sm:$0xff]  ;;  %v2079_v57 = vpack.c.bf16 %v56_v54, %v55_v51  ;;  %v58_v59 = vld [vmem:[%s2945_s1 + $0x28] sm:$0xff]  ;;  %v1577_v1 = vld [vmem:[%s2945_s1 + $0x200] sm:$0xff] }
   0xf   :  { %v2175_v63 = vpack.c.bf16 %v1576_v56, %v1575_v55  ;;  %v1578_v2 = vld [vmem:[%s2945_s1 + $0x208] sm:$0xff]  ;;  %v59_v5 = vld [vmem:[%s2945_s1 + $0x30] sm:$0xff]  ;;  %v2083_v6 = vpack.c.bf16 %v58_v59, %v57_v58  ;;  %v60_v8 = vld [vmem:[%s2945_s1 + $0x38] sm:$0xff] }
  0x10   :  { %2062 = vmatpush3.bf16.msra.mxu1 %v2059_v21  ;;  %2158 = vmatpush3.bf16.msra.mxu0 %v2155_v22  ;;  %v2179_v7 = vpack.c.bf16 %v1578_v2, %v1577_v1  ;;  %v1579_v9 = vld [vmem:[%s2945_s1 + $0x210] sm:$0xff]  ;;  %v1580_v10 = vld [vmem:[%s2945_s1 + $0x218] sm:$0xff]  ;;  %v2087_v13 = vpack.c.bf16 %v60_v8, %v59_v5  ;;  %v61_v15 = vld [vmem:[%s2945_s1 + $0x40] sm:$0xff] }
  0x11   :  { %2064 = vmatprep.subr.bf16.mxu1 %v2063_v27  ;;  %2160 = vmatprep.subr.bf16.mxu0 %v2159_v28  ;;  %v2183_v14 = vpack.c.bf16 %v1580_v10, %v1579_v9  ;;  %v62_v16 = vld [vmem:[%s2945_s1 + $0x48] sm:$0xff]  ;;  %v1581_v17 = vld [vmem:[%s2945_s1 + $0x220] sm:$0xff]  ;;  %v63_v21 = vld [vmem:[%s2945_s1 + $0x50] sm:$0xff] }
  0x12   :  { %v1582_v18 = vld [vmem:[%s2945_s1 + $0x228] sm:$0xff]  ;;  %v2091_v19 = vpack.c.bf16 %v62_v16, %v61_v15  ;;  %v64_v22 = vld [vmem:[%s2945_s1 + $0x58] sm:$0xff]  ;;  %v1583_v23 = vld [vmem:[%s2945_s1 + $0x230] sm:$0xff] }
  0x13   :  { %v2187_v20 = vpack.c.bf16 %v1582_v18, %v1581_v17  ;;  %v1584_v24 = vld [vmem:[%s2945_s1 + $0x238] sm:$0xff]  ;;  %v2095_v25 = vpack.c.bf16 %v64_v22, %v63_v21  ;;  %v1589_v29 = vld [vmem:[%s2945_s1 + $0x240] sm:$0xff]  ;;  %v1590_v30 = vld [vmem:[%s2945_s1 + $0x248] sm:$0xff] }
  0x14   :  { %2066 = vmatpush3.bf16.msra.mxu1 %v2063_v27  ;;  %2162 = vmatpush3.bf16.msra.mxu0 %v2159_v28  ;;  %v2191_v26 = vpack.c.bf16 %v1584_v24, %v1583_v23  ;;  %v1525_v27 = vld [vmem:[%s2945_s1 + $0xc0] sm:$0xff]  ;;  %v1526_v28 = vld [vmem:[%s2945_s1 + $0xc8] sm:$0xff]  ;;  %v2195_v32 = vpack.c.bf16 %v1590_v30, %v1589_v29  ;;  %v1591_v35 = vld [vmem:[%s2945_s1 + $0x250] sm:$0xff] }
  0x15   :  { %2068 = vmatprep.subr.bf16.mxu1 %v2067_v33  ;;  %2164 = vmatprep.subr.bf16.mxu0 %v2163_v34  ;;  %v2099_v31 = vpack.c.bf16 %v1526_v28, %v1525_v27  ;;  %v1592_v36 = vld [vmem:[%s2945_s1 + $0x258] sm:$0xff]  ;;  %v1529_v37 = vld [vmem:[%s2945_s1 + $0xe0] sm:$0xff]  ;;  %v1530_v42 = vld [vmem:[%s2945_s1 + $0xe8] sm:$0xff] }
  0x16   :  { %v2199_v41 = vpack.c.bf16 %v1592_v36, %v1591_v35  ;;  %v1593_v44 = vld [vmem:[%s2945_s1 + $0x260] sm:$0xff]  ;;  %v1595_v54 = vld [vmem:[%s2945_s1 + $0x270] sm:$0xff]  ;;  %v1596_v55 = vld [vmem:[%s2945_s1 + $0x278] sm:$0xff] }
  0x17   :  { %v2207_v58 = vpack.c.bf16 %v1596_v55, %v1595_v54  ;;  %v1533_v59 = vld [vmem:[%s2945_s1 + $0x100] sm:$0xff]  ;;  %v1535_v1 = vld [vmem:[%s2945_s1 + $0x110] sm:$0xff]  ;;  %v1536_v2 = vld [vmem:[%s2945_s1 + $0x118] sm:$0xff] }
  0x18   :  { %2070 = vmatpush3.bf16.msra.mxu1 %v2067_v33  ;;  %2166 = vmatpush3.bf16.msra.mxu0 %v2163_v34  ;;  %v1527_v33 = vld [vmem:[%s2945_s1 + $0xd0] sm:$0xff]  ;;  %v1528_v34 = vld [vmem:[%s2945_s1 + $0xd8] sm:$0xff]  ;;  %v2119_v5 = vpack.c.bf16 %v1536_v2, %v1535_v1  ;;  %v1542_v8 = vld [vmem:[%s2945_s1 + $0x128] sm:$0xff] }
  0x19   :  { %2072 = vmatprep.subr.bf16.mxu1 %v2071_v39  ;;  %2168 = vmatprep.subr.bf16.mxu0 %v2167_v40  ;;  %v1605_v9 = vld [vmem:[%s2945_s1 + $0x2a0] sm:$0xff]  ;;  %v1606_v10 = vld [vmem:[%s2945_s1 + $0x2a8] sm:$0xff]  ;;  %v1607_v15 = vld [vmem:[%s2945_s1 + $0x2b0] sm:$0xff] }
  0x1a   :  { %v1608_v16 = vld [vmem:[%s2945_s1 + $0x2b8] sm:$0xff]  ;;  %v1546_v23 = vld [vmem:[%s2945_s1 + $0x148] sm:$0xff]  ;;  %v1547_v29 = vld [vmem:[%s2945_s1 + $0x150] sm:$0xff] }
  0x1b   :  { %v2223_v22 = vpack.c.bf16 %v1608_v16, %v1607_v15  ;;  %v1611_v35 = vld [vmem:[%s2945_s1 + $0x2d0] sm:$0xff]  ;;  %v1612_v36 = vld [vmem:[%s2945_s1 + $0x2d8] sm:$0xff]  ;;  %v1622_v54 = vld [vmem:[%s2945_s1 + $0x308] sm:$0xff] }
  0x1c   :  { %2074 = vmatpush3.bf16.msra.mxu1 %v2071_v39  ;;  %2170 = vmatpush3.bf16.msra.mxu0 %v2167_v40  ;;  %v2103_v40 = vpack.c.bf16 %v1528_v34, %v1527_v33  ;;  %v1548_v33 = vld [vmem:[%s2945_s1 + $0x158] sm:$0xff] }
  0x1d   :  { %2076 = vmatprep.subr.bf16.mxu1 %v2075_v45  ;;  %2172 = vmatprep.subr.bf16.mxu0 %v2171_v46 }
  0x74   :  { %v33_v47 = vpop.permute.xlu0 %32  ;;  %v37_v48 = vpop.permute.xlu1 %36 }
  0x75   :  { %45 = vst.msk [vmem:[#allocation2 + $0x4] sm:$0xff] %vm44_vm1, %v33_v47  ;;  %47 = vst.msk [vmem:[#allocation2 + $0x1c] sm:$0xff] %vm44_vm1, %v37_v48  ;;  %v1531_v47 = vld [vmem:[%s2945_s1 + $0xf0] sm:$0xff] }
  0x78   :  { %v35_v49 = vpop.permute.xlu0 %34  ;;  %v39_v50 = vpop.permute.xlu1 %38 }
  0x79   :  { %46 = vst.msk [vmem:[#allocation2 + $0xc] sm:$0xff] %vm44_vm1, %v35_v49  ;;  %48 = vst.msk [vmem:[#allocation2 + $0x24] sm:$0xff] %vm44_vm1, %v39_v50  ;;  %v2107_v50 = vpack.c.bf16 %v1530_v42, %v1529_v37  ;;  %v2135_v37 = vpack.c.bf16 %v1548_v33, %v1547_v29  ;;  %v1613_v42 = vld [vmem:[%s2945_s1 + $0x2e0] sm:$0xff] }
  0x7c   :  { %v65_v52 = vld [vmem:[#allocation2 + $0x1] sm:$0xff]  ;;  %v67_v62 = vld [vmem:[#allocation2 + $0x19] sm:$0xff] }
  0x7d   :  { %v512_v53 = vld [vmem:[#allocation2 + $0x4] sm:$0xff]  ;;  %1805 = vmatprep.mubr.msk.f32.mxu1 %vm17_vm0, %v65_v52  ;;  %v514_v0 = vld [vmem:[#allocation2 + $0x1c] sm:$0xff] }
  0x7e   :  { %1925 = vmatprep.mubr.msk.f32.mxu0 %vm17_vm0, %v512_v53  ;;  %v49_v11 = vld [vmem:[#allocation2] sm:$0xff]  ;;  %v51_v43 = vld [vmem:[#allocation2 + $0x18] sm:$0xff] }
  0x7f   :  { %v1532_v52 = vld [vmem:[%s2945_s1 + $0xf8] sm:$0xff]  ;;  %v276_v53 = vld [vmem:[#allocation2 + $0x2] sm:$0xff] }
  0x80   :  { %v66_v60 = vld [vmem:[#allocation2 + $0x9] sm:$0xff]  ;;  %v68_v3 = vld [vmem:[#allocation2 + $0x21] sm:$0xff] }
  0x81   :  { %v513_v61 = vld [vmem:[#allocation2 + $0xc] sm:$0xff]  ;;  %1806 = vmatmul.mubr.msk.f32.vlgmr.msra.gmra.mrb[0].mxu1 %vm17_vm0, %v66_v60  ;;  %v515_v4 = vld [vmem:[#allocation2 + $0x24] sm:$0xff]  ;;  %v278_v21 = vld [vmem:[#allocation2 + $0x1a] sm:$0xff] }
  0x82   :  { %1926 = vmatmul.mubr.msk.f32.vlgmr.msra.gmra.mrb[0].mxu0 %vm17_vm0, %v513_v61  ;;  %2078 = vmatpush3.bf16.msra.mxu1 %v2075_v45  ;;  %v630_v12 = vld [vmem:[#allocation2 + $0x5] sm:$0xff]  ;;  %v631_v39 = vld [vmem:[#allocation2 + $0xd] sm:$0xff] }
  0x83   :  { %2174 = vmatpush3.bf16.msra.mxu0 %v2171_v46  ;;  %1808 = vmatprep.mubr.msk.f32.mxu1 %vm17_vm0, %v67_v62  ;;  %v2573_v38 = vld [vmem:[#allocation2 + $0x8] sm:$0xff]  ;;  %v632_v46 = vld [vmem:[#allocation2 + $0x1d] sm:$0xff] }
  0x84   :  { %2080 = vmatprep.subr.bf16.mxu1 %v2079_v57  ;;  %1928 = vmatprep.mubr.msk.f32.mxu0 %vm17_vm0, %v514_v0  ;;  %v1594_v45 = vld [vmem:[%s2945_s1 + $0x268] sm:$0xff]  ;;  %v2592_v48 = vld [vmem:[#allocation2 + $0x20] sm:$0xff] }
  0x85   :  { %2176 = vmatprep.subr.bf16.mxu0 %v2175_v63  ;;  %1809 = vmatmul.mubr.msk.f32.gmra.mrb[2].mxu1 %vm17_vm0, %v68_v3  ;;  %v633_v49 = vld [vmem:[#allocation2 + $0x25] sm:$0xff]  ;;  %v2203_v51 = vpack.c.bf16 %v1594_v45, %v1593_v44  ;;  %v1599_v3 = vld [vmem:[%s2945_s1 + $0x290] sm:$0xff] }
  0x86   :  { %1929 = vmatmul.mubr.msk.f32.gmra.mrb[2].mxu0 %vm17_vm0, %v515_v4  ;;  %2082 = vmatpush3.bf16.msra.mxu1 %v2079_v57  ;;  %v748_v56 = vld [vmem:[#allocation2 + $0x6] sm:$0xff]  ;;  %v2111_v57 = vpack.c.bf16 %v1532_v52, %v1531_v47  ;;  %v1600_v4 = vld [vmem:[%s2945_s1 + $0x298] sm:$0xff] }
  0x87   :  { %2178 = vmatpush3.bf16.msra.mxu0 %v2175_v63  ;;  %1835 = vmatprep.mubr.msk.f32.mxu1 %vm17_vm0, %v49_v11  ;;  %v1534_v60 = vld [vmem:[%s2945_s1 + $0x108] sm:$0xff]  ;;  %v1597_v61 = vld [vmem:[%s2945_s1 + $0x280] sm:$0xff]  ;;  %v1552_v47 = vld [vmem:[%s2945_s1 + $0x178] sm:$0xff] }
  0x88   :  { %1955 = vmatprep.mubr.msk.f32.mxu0 %vm17_vm0, %v630_v12  ;;  %2084 = vmatprep.subr.bf16.mxu1 %v2083_v6  ;;  %v1598_v62 = vld [vmem:[%s2945_s1 + $0x288] sm:$0xff]  ;;  %v2115_v63 = vpack.c.bf16 %v1534_v60, %v1533_v59  ;;  %v2219_v12 = vpack.c.bf16 %v1606_v10, %v1605_v9  ;;  %v750_v24 = vld [vmem:[#allocation2 + $0x1e] sm:$0xff] }
  0x89   :  { %2180 = vmatprep.subr.bf16.mxu0 %v2179_v7  ;;  %v2211_v0 = vpack.c.bf16 %v1598_v62, %v1597_v61  ;;  %v277_v17 = vld [vmem:[#allocation2 + $0xa] sm:$0xff]  ;;  %v279_v27 = vld [vmem:[#allocation2 + $0x22] sm:$0xff]  ;;  %v1632_v9 = vld [vmem:[%s2945_s1 + $0x358] sm:$0xff] }
  0x8a   :  { %2086 = vmatpush3.bf16.msra.mxu1 %v2083_v6  ;;  %v2215_v6 = vpack.c.bf16 %v1600_v4, %v1599_v3  ;;  %v751_v30 = vld [vmem:[#allocation2 + $0x26] sm:$0xff]  ;;  %v867_v61 = vld [vmem:[#allocation2 + $0xf] sm:$0xff]  ;;  %v396_v62 = vld [vmem:[#allocation2 + $0x1b] sm:$0xff] }
  0x8b   :  { %2182 = vmatpush3.bf16.msra.mxu0 %v2179_v7  ;;  %2088 = vmatprep.subr.bf16.mxu1 %v2087_v13  ;;  %v1541_v7 = vld [vmem:[%s2945_s1 + $0x120] sm:$0xff]  ;;  %v1627_v4 = vld [vmem:[%s2945_s1 + $0x330] sm:$0xff] }
  0x8c   :  { %2184 = vmatprep.subr.bf16.mxu0 %v2183_v14  ;;  %v2123_v11 = vpack.c.bf16 %v1542_v8, %v1541_v7  ;;  %v866_v34 = vld [vmem:[#allocation2 + $0x7] sm:$0xff] }
  0x8d   :  { %v1625_v60 = vld [vmem:[%s2945_s1 + $0x320] sm:$0xff]  ;;  %v1630_v8 = vld [vmem:[%s2945_s1 + $0x348] sm:$0xff] }
  0x8e   :  { %2090 = vmatpush3.bf16.msra.mxu1 %v2087_v13  ;;  %v1543_v13 = vld [vmem:[%s2945_s1 + $0x130] sm:$0xff]  ;;  %v397_v1 = vld [vmem:[#allocation2 + $0x23] sm:$0xff] }
  0x8f   :  { %2186 = vmatpush3.bf16.msra.mxu0 %v2183_v14  ;;  %2092 = vmatprep.subr.bf16.mxu1 %v2091_v19  ;;  %v1544_v14 = vld [vmem:[%s2945_s1 + $0x138] sm:$0xff]  ;;  %v869_v3 = vld [vmem:[#allocation2 + $0x27] sm:$0xff] }
  0x90   :  { %2188 = vmatprep.subr.bf16.mxu0 %v2187_v20  ;;  %v2127_v18 = vpack.c.bf16 %v1544_v14, %v1543_v13  ;;  %v1629_v7 = vld [vmem:[%s2945_s1 + $0x340] sm:$0xff] }
  0x92   :  { %2094 = vmatpush3.bf16.msra.mxu1 %v2091_v19  ;;  %v1545_v19 = vld [vmem:[%s2945_s1 + $0x140] sm:$0xff] }
  0x93   :  { %2190 = vmatpush3.bf16.msra.mxu0 %v2187_v20  ;;  %2096 = vmatprep.subr.bf16.mxu1 %v2095_v25  ;;  %v749_v20 = vld [vmem:[#allocation2 + $0xe] sm:$0xff]  ;;  %v2131_v28 = vpack.c.bf16 %v1546_v23, %v1545_v19 }
  0x94   :  { %2192 = vmatprep.subr.bf16.mxu0 %v2191_v26 }
  0x96   :  { %2098 = vmatpush3.bf16.msra.mxu1 %v2095_v25  ;;  %v1609_v25 = vld [vmem:[%s2945_s1 + $0x2c0] sm:$0xff] }
  0x97   :  { %2194 = vmatpush3.bf16.msra.mxu0 %v2191_v26  ;;  %2100 = vmatprep.subr.bf16.mxu1 %v2099_v31  ;;  %v1610_v26 = vld [vmem:[%s2945_s1 + $0x2c8] sm:$0xff] }
  0x98   :  { %2196 = vmatprep.subr.bf16.mxu0 %v2195_v32 }
  0x99   :  { %1836 = vmatmul.mubr.msk.f32.vlgmr.msra.gmra.mrb[0].mxu1 %vm17_vm0, %v2573_v38 }
  0x9a   :  { %1956 = vmatmul.mubr.msk.f32.vlgmr.msra.gmra.mrb[0].mxu0 %vm17_vm0, %v631_v39  ;;  %1838 = vmatprep.mubr.msk.f32.mxu1 %vm17_vm0, %v51_v43  ;;  %v2231_v39 = vpack.c.bf16 %v1612_v36, %v1611_v35  ;;  %v1614_v43 = vld [vmem:[%s2945_s1 + $0x2e8] sm:$0xff] }
  0x9b   :  { %2102 = vmatpush3.bf16.msra.mxu1 %v2099_v31  ;;  %1958 = vmatprep.mubr.msk.f32.mxu0 %vm17_vm0, %v632_v46  ;;  %v394_v31 = vld [vmem:[#allocation2 + $0x3] sm:$0xff]  ;;  %v2235_v45 = vpack.c.bf16 %v1614_v43, %v1613_v42  ;;  %v1551_v46 = vld [vmem:[%s2945_s1 + $0x170] sm:$0xff] }
  0x9c   :  { %2198 = vmatpush3.bf16.msra.mxu0 %v2195_v32  ;;  %2104 = vmatprep.subr.bf16.mxu1 %v2103_v40  ;;  %v2227_v32 = vpack.c.bf16 %v1610_v26, %v1609_v25 }
  0x9d   :  { %2200 = vmatprep.subr.bf16.mxu0 %v2199_v41  ;;  %1839 = vmatmul.mubr.msk.f32.gmra.mrb[2].mxu1 %vm17_vm0, %v2592_v48 }
  0x9e   :  { %1959 = vmatmul.mubr.msk.f32.gmra.mrb[2].mxu0 %vm17_vm0, %v633_v49  ;;  %1865 = vmatprep.mubr.msk.f32.mxu1 %vm17_vm0, %v276_v53  ;;  %v1615_v49 = vld [vmem:[%s2945_s1 + $0x2f0] sm:$0xff]  ;;  %v1621_v53 = vld [vmem:[%s2945_s1 + $0x300] sm:$0xff] }
  0x9f   :  { %2106 = vmatpush3.bf16.msra.mxu1 %v2103_v40  ;;  %1985 = vmatprep.mubr.msk.f32.mxu0 %vm17_vm0, %v748_v56  ;;  %v1549_v40 = vld [vmem:[%s2945_s1 + $0x160] sm:$0xff]  ;;  %v2243_v55 = vpack.c.bf16 %v1622_v54, %v1621_v53  ;;  %v1623_v56 = vld [vmem:[%s2945_s1 + $0x310] sm:$0xff] }
  0xa0   :  { %2202 = vmatpush3.bf16.msra.mxu0 %v2199_v41  ;;  %2108 = vmatprep.subr.bf16.mxu1 %v2107_v50  ;;  %v1550_v41 = vld [vmem:[%s2945_s1 + $0x168] sm:$0xff] }
  0xa1   :  { %2204 = vmatprep.subr.bf16.mxu0 %v2203_v51  ;;  %v2139_v44 = vpack.c.bf16 %v1550_v41, %v1549_v40 }
  0xa3   :  { %2110 = vmatpush3.bf16.msra.mxu1 %v2107_v50  ;;  %v1616_v50 = vld [vmem:[%s2945_s1 + $0x2f8] sm:$0xff] }
  0xa4   :  { %2206 = vmatpush3.bf16.msra.mxu0 %v2203_v51  ;;  %2112 = vmatprep.subr.bf16.mxu1 %v2111_v57  ;;  %v2143_v51 = vpack.c.bf16 %v1552_v47, %v1551_v46  ;;  %v2239_v52 = vpack.c.bf16 %v1616_v50, %v1615_v49 }
  0xa5   :  { %2208 = vmatprep.subr.bf16.mxu0 %v2207_v58 }
  0xa7   :  { %2114 = vmatpush3.bf16.msra.mxu1 %v2111_v57  ;;  %v1624_v57 = vld [vmem:[%s2945_s1 + $0x318] sm:$0xff] }
  0xa8   :  { %2210 = vmatpush3.bf16.msra.mxu0 %v2207_v58  ;;  %2116 = vmatprep.subr.bf16.mxu1 %v2115_v63  ;;  %v395_v58 = vld [vmem:[#allocation2 + $0xb] sm:$0xff]  ;;  %v2247_v59 = vpack.c.bf16 %v1624_v57, %v1623_v56 }
  0xa9   :  { %2212 = vmatprep.subr.bf16.mxu0 %v2211_v0 }
  0xab   :  { %2118 = vmatpush3.bf16.msra.mxu1 %v2115_v63  ;;  %v1626_v63 = vld [vmem:[%s2945_s1 + $0x328] sm:$0xff] }
  0xac   :  { %2214 = vmatpush3.bf16.msra.mxu0 %v2211_v0  ;;  %2120 = vmatprep.subr.bf16.mxu1 %v2119_v5  ;;  %v868_v0 = vld [vmem:[#allocation2 + $0x1f] sm:$0xff]  ;;  %v2251_v2 = vpack.c.bf16 %v1626_v63, %v1625_v60 }
  0xad   :  { %2216 = vmatprep.subr.bf16.mxu0 %v2215_v6 }
  0xaf   :  { %2122 = vmatpush3.bf16.msra.mxu1 %v2119_v5  ;;  %v1628_v5 = vld [vmem:[%s2945_s1 + $0x338] sm:$0xff] }
  0xb0   :  { %2218 = vmatpush3.bf16.msra.mxu0 %v2215_v6  ;;  %2124 = vmatprep.subr.bf16.mxu1 %v2123_v11  ;;  %v2255_v6 = vpack.c.bf16 %v1628_v5, %v1627_v4 }
  0xb1   :  { %2220 = vmatprep.subr.bf16.mxu0 %v2219_v12 }
  0xb2   :  { %1866 = vmatmul.mubr.msk.f32.vlgmr.msra.gmra.mrb[0].mxu1 %vm17_vm0, %v277_v17 }
  0xb3   :  { %1986 = vmatmul.mubr.msk.f32.vlgmr.msra.gmra.mrb[0].mxu0 %vm17_vm0, %v749_v20  ;;  %1868 = vmatprep.mubr.msk.f32.mxu1 %vm17_vm0, %v278_v21 }
  0xb4   :  { %2126 = vmatpush3.bf16.msra.mxu1 %v2123_v11  ;;  %1988 = vmatprep.mubr.msk.f32.mxu0 %vm17_vm0, %v750_v24  ;;  %v985_v11 = vld [vmem:[#allocation2 + $0x10] sm:$0xff] }
  0xb5   :  { %2222 = vmatpush3.bf16.msra.mxu0 %v2219_v12  ;;  %2128 = vmatprep.subr.bf16.mxu1 %v2127_v18  ;;  %v987_v12 = vld [vmem:[#allocation2 + $0x28] sm:$0xff] }
  0xb6   :  { %1869 = vmatmul.mubr.msk.f32.gmra.mrb[2].mxu1 %vm17_vm0, %v279_v27  ;;  %2224 = vmatprep.subr.bf16.mxu0 %v2223_v22 }
  0xb7   :  { %1989 = vmatmul.mubr.msk.f32.gmra.mrb[2].mxu0 %vm17_vm0, %v751_v30  ;;  %1895 = vmatprep.mubr.msk.f32.mxu1 %vm17_vm0, %v394_v31 }
  0xb8   :  { %2130 = vmatpush3.bf16.msra.mxu1 %v2127_v18  ;;  %2015 = vmatprep.mubr.msk.f32.mxu0 %vm17_vm0, %v866_v34 }
  0xb9   :  { %2226 = vmatpush3.bf16.msra.mxu0 %v2223_v22  ;;  %2132 = vmatprep.subr.bf16.mxu1 %v2131_v28 }
  0xba   :  { %2228 = vmatprep.subr.bf16.mxu0 %v2227_v32 }
  0xbc   :  { %2134 = vmatpush3.bf16.msra.mxu1 %v2131_v28 }
  0xbd   :  { %2230 = vmatpush3.bf16.msra.mxu0 %v2227_v32  ;;  %2136 = vmatprep.subr.bf16.mxu1 %v2135_v37 }
  0xbe   :  { %2232 = vmatprep.subr.bf16.mxu0 %v2231_v39 }
  0xc0   :  { %2138 = vmatpush3.bf16.msra.mxu1 %v2135_v37 }
  0xc1   :  { %2234 = vmatpush3.bf16.msra.mxu0 %v2231_v39  ;;  %2140 = vmatprep.subr.bf16.mxu1 %v2139_v44 }
  0xc2   :  { %2236 = vmatprep.subr.bf16.mxu0 %v2235_v45 }
  0xc4   :  { %2142 = vmatpush3.bf16.msra.mxu1 %v2139_v44 }
  0xc5   :  { %2238 = vmatpush3.bf16.msra.mxu0 %v2235_v45  ;;  %2144 = vmatprep.subr.bf16.mxu1 %v2143_v51 }
  0xc6   :  { %2240 = vmatprep.subr.bf16.mxu0 %v2239_v52 }
  0xc8   :  { %2146 = vmatpush3.bf16.msra.mxu1 %v2143_v51 }
  0xc9   :  { %2242 = vmatpush3.bf16.msra.mxu0 %v2239_v52  ;;  %2267 = vmatprep.subr.bf16.mxu1 %v2243_v55 }
  0xca   :  { %2244 = vmatprep.subr.bf16.mxu0 %v2243_v55 }
  0xcb   :  { %1896 = vmatmul.mubr.msk.f32.vlgmr.msra.gmra.mrb[0].mxu1 %vm17_vm0, %v395_v58 }
  0xcc   :  { %2016 = vmatmul.mubr.msk.f32.vlgmr.msra.gmra.mrb[0].mxu0 %vm17_vm0, %v867_v61  ;;  %1898 = vmatprep.mubr.msk.f32.mxu1 %vm17_vm0, %v396_v62 }
  0xcd   :  { %2018 = vmatprep.mubr.msk.f32.mxu0 %vm17_vm0, %v868_v0  ;;  %2246 = vmatpush3.bf16.msra.mxu0 %v2243_v55 }
  0xce   :  { %2273 = vmatpush3.bf16.msra.mxu1 %v2243_v55  ;;  %2248 = vmatprep.subr.bf16.mxu0 %v2247_v59 }
  0xcf   :  { %1899 = vmatmul.mubr.msk.f32.gmra.mrb[2].mxu1 %vm17_vm0, %v397_v1  ;;  %2268 = vmatprep.subr.bf16.mxu1 %v2247_v59 }
  0xd0   :  { %2019 = vmatmul.mubr.msk.f32.gmra.mrb[2].mxu0 %vm17_vm0, %v869_v3  ;;  %2048 = vmatprep.mubr.msk.f32.mxu1 %vm17_vm0, %v2592_v48  ;;  %v2259_v48 = vpack.c.bf16 %v1630_v8, %v1629_v7 }
  0xd1   :  { %2250 = vmatpush3.bf16.msra.mxu0 %v2247_v59  ;;  %2045 = vmatprep.mubr.msk.f32.mxu0 %vm17_vm0, %v2573_v38  ;;  %v1631_v38 = vld [vmem:[%s2945_s1 + $0x350] sm:$0xff]  ;;  %s2331_s1 = smov 112  }
  0xd2   :  { %2274 = vmatpush3.bf16.msra.mxu1 %v2247_v59  ;;  %2252 = vmatprep.subr.bf16.mxu0 %v2251_v2  ;;  %v2263_v10 = vpack.c.bf16 %v1632_v9, %v1631_v38 }
  0xd3   :  { %2269 = vmatprep.subr.bf16.mxu1 %v2251_v2 }
  0xd5   :  { %2254 = vmatpush3.bf16.msra.mxu0 %v2251_v2 }
  0xd6   :  { %2275 = vmatpush3.bf16.msra.mxu1 %v2251_v2  ;;  %2256 = vmatprep.subr.bf16.mxu0 %v2255_v6 }
  0xd7   :  { %2270 = vmatprep.subr.bf16.mxu1 %v2255_v6 }
  0xd9   :  { %2258 = vmatpush3.bf16.msra.mxu0 %v2255_v6 }
  0xda   :  { %2276 = vmatpush3.bf16.msra.mxu1 %v2255_v6  ;;  %2260 = vmatprep.subr.bf16.mxu0 %v2259_v48 }
  0xdb   :  { %2271 = vmatprep.subr.bf16.mxu1 %v2259_v48 }
  0xdd   :  { %2262 = vmatpush3.bf16.msra.mxu0 %v2259_v48 }
  0xde   :  { %2277 = vmatpush3.bf16.msra.mxu1 %v2259_v48  ;;  %2264 = vmatprep.subr.bf16.mxu0 %v2263_v10 }
  0xdf   :  { %2272 = vmatprep.subr.bf16.mxu1 %v2263_v10 }
  0xe1   :  { %2266 = vmatpush3.bf16.msra.mxu0 %v2263_v10 }
  0xe2   :  { %2278 = vmatpush3.bf16.msra.mxu1 %v2263_v10 }
  0xe4   :  { %2046 = vmatmul.mubr.msk.f32.vlgmr.msra.gmra.mrb[0].mxu0 %vm17_vm0, %v985_v11 }
  0xe5   :  { %2049 = vmatmul.mubr.msk.f32.vlgmr.msra.gmra.mrb[4].mxu1 %vm17_vm0, %v987_v12 }
 0x19e   :  { %v1897_v13 = vpop.f32.mrb[0].mxu1 }
 0x19f   :  { %v489_v14 = vpop.f32.mrb[1].mxu1 }
 0x1a2   :  { %v1900_v15 = vpop.f32.mrb[2].mxu1 }
 0x1a3   :  { %v2020_v16 = vpop.f32.mrb[2].mxu0  ;;  %v499_v17 = vpop.f32.mrb[3].mxu1 }
 0x1a4   :  { %v2281_v18 = vadd.f32 %v2020_v16, %v1900_v15  ;;  %v971_v19 = vpop.f32.mrb[3].mxu0 }
 0x1a5   :  { %v2283_v20 = vadd.f32 %v971_v19, %v499_v17 }
 0x1b7   :  { %v2047_v21 = vpop.f32.mrb[0].mxu0 }
 0x1b8   :  { %v2760_v22 = vadd.f32 %v2047_v21, %v1897_v13  ;;  %v2050_v23 = vpop.f32.mrb[4].mxu1  ;;  %v1079_v24 = vpop.f32.mrb[1].mxu0 }
 0x1b9   :  { %v2762_v25 = vadd.f32 %v2281_v18, %v2050_v23  ;;  %v2764_v26 = vadd.f32 %v1079_v24, %v489_v14  ;;  %v1089_v27 = vpop.f32.mrb[5].mxu1 }
 0x1ba   :  { %v2766_v28 = vadd.f32 %v2283_v20, %v1089_v27  ;;  %v1249_v27 = vlaneseq }
 0x1bb   :  { %v1102_v29 = vadd.f32 %v2764_v26, %v2760_v22 }
 0x1bd   :  { %v1103_v30 = vadd.f32 %v2766_v28, %v1102_v29 }
 0x1bf   :  { %v1104_v31 = vadd.f32 %v2762_v25, %v1103_v30 }
 0x1c1   :  { %v1105_v32 = vrot.slane %v1104_v31, 4 }
 0x1c3   :  { %v1106_v33 = vadd.f32 %v1105_v32, %v1104_v31 }
 0x1c5   :  { %v1107_v34 = vrot.slane %v1106_v33, 2 }
 0x1c7   :  { %v1108_v35 = vadd.f32 %v1107_v34, %v1106_v33  ;;  %v1250_v33 = vshrl.u32 %v1249_v27, 7 }
 0x1c9   :  { %v1109_v36 = vrot.slane %v1108_v35, 1 }
 0x1cb   :  { %v1110_v37 = vadd.f32 %v1109_v36, %v1108_v35 }
 0x1cd   :  { %1116 = vrot.lane.b32.xlu1 %v1110_v37, %s2331_s1  ;;  %1112 = vrot.lane.b32.xlu0 %v1110_v37, %s2332_s6 }
 0x1d1   :  { %1124 = vrot.lane.b32.xlu1 %v1110_v37, %s2333_s0  ;;  %1120 = vrot.lane.b32.xlu0 %v1110_v37, %s2334_s7 }
 0x1d5   :  { %1132 = vrot.lane.b32.xlu1 %v1110_v37, %s2335_s8  ;;  %1128 = vrot.lane.b32.xlu0 %v1110_v37, %s2336_s9 }
 0x1d9   :  { %1140 = vrot.lane.b32.xlu1 %v1110_v37, %s2337_s10  ;;  %1136 = vrot.lane.b32.xlu0 %v1110_v37, %s2338_s11 }
 0x1dd   :  { %1148 = vrot.lane.b32.xlu1 %v1110_v37, %s2339_s12  ;;  %1144 = vrot.lane.b32.xlu0 %v1110_v37, %s2340_s13 }
 0x1e1   :  { %1156 = vrot.lane.b32.xlu1 %v1110_v37, %s2341_s14  ;;  %1152 = vrot.lane.b32.xlu0 %v1110_v37, %s2342_s15 }
 0x1e5   :  { %1164 = vrot.lane.b32.xlu1 %v1110_v37, %s2330_s21  ;;  %1160 = vrot.lane.b32.xlu0 %v1110_v37, %s2343_s16 }
 0x1e9   :  { %1168 = vrot.lane.b32.xlu0 %v1110_v37, %s2344_s17 }
 0x23f   :  { %v1117_v39 = vpop.permute.xlu1 %1116  ;;  %v1113_v40 = vpop.permute.xlu0 %1112 }
 0x240   :  { %v1115_v41 = vadd.f32 %v1113_v40, %v1110_v37 }
 0x242   :  { %v1119_v42 = vadd.f32 %v1117_v39, %v1115_v41  ;;  %v2833_v39 = vsub.s32 0, %v1250_v33  ;;  %v1332_v33 = vld [vmem:[%s2946_s2] sm:$0x1] }
 0x243   :  { %v1125_v43 = vpop.permute.xlu1 %1124  ;;  %v1121_v44 = vpop.permute.xlu0 %1120 }
 0x244   :  { %v1123_v45 = vadd.f32 %v1121_v44, %v1119_v42 }
 0x246   :  { %v1127_v46 = vadd.f32 %v1125_v43, %v1123_v45 }
 0x247   :  { %v1133_v47 = vpop.permute.xlu1 %1132  ;;  %v1129_v49 = vpop.permute.xlu0 %1128 }
 0x248   :  { %v1131_v50 = vadd.f32 %v1129_v49, %v1127_v46 }
 0x24a   :  { %v1135_v51 = vadd.f32 %v1133_v47, %v1131_v50 }
 0x24b   :  { %v1141_v52 = vpop.permute.xlu1 %1140  ;;  %v1137_v53 = vpop.permute.xlu0 %1136 }
 0x24c   :  { %v1139_v54 = vadd.f32 %v1137_v53, %v1135_v51 }
 0x24e   :  { %v1143_v55 = vadd.f32 %v1141_v52, %v1139_v54 }
 0x24f   :  { %v1149_v56 = vpop.permute.xlu1 %1148  ;;  %v1145_v57 = vpop.permute.xlu0 %1144 }
 0x250   :  { %v1147_v58 = vadd.f32 %v1145_v57, %v1143_v55 }
 0x252   :  { %v1151_v59 = vadd.f32 %v1149_v56, %v1147_v58 }
 0x253   :  { %v1157_v60 = vpop.permute.xlu1 %1156  ;;  %v1153_v61 = vpop.permute.xlu0 %1152 }
 0x254   :  { %v1155_v62 = vadd.f32 %v1153_v61, %v1151_v59 }
 0x256   :  { %v1159_v63 = vadd.f32 %v1157_v60, %v1155_v62 }
 0x257   :  { %v1161_v0 = vpop.permute.xlu0 %1160  ;;  %v1165_v2 = vpop.permute.xlu1 %1164 }
 0x258   :  { %v1163_v1 = vadd.f32 %v1161_v0, %v1159_v63 }
 0x25a   :  { %v1167_v3 = vadd.f32 %v1165_v2, %v1163_v1 }
 0x25b   :  { %v1169_v4 = vpop.permute.xlu0 %1168 }
 0x25c   :  { %v1171_v5 = vadd.f32 %v1169_v4, %v1167_v3 }
 0x25e   :  { %v2787_v6 = vmul.f32 0.001953125, %v1171_v5 }
 0x260   :  { %1178 = vrot.lane.b32.xlu0 %v2787_v6, %s2330_s21  ;;  %1175 = vrot.lane.b32.xlu1 %v2787_v6, %s2344_s17 }
 0x264   :  { %1184 = vrot.lane.b32.xlu0 %v2787_v6, %s2341_s14  ;;  %1181 = vrot.lane.b32.xlu1 %v2787_v6, %s2343_s16 }
 0x268   :  { %1190 = vrot.lane.b32.xlu0 %v2787_v6, %s2339_s12  ;;  %1187 = vrot.lane.b32.xlu1 %v2787_v6, %s2342_s15 }
 0x26c   :  { %1196 = vrot.lane.b32.xlu0 %v2787_v6, %s2337_s10  ;;  %1193 = vrot.lane.b32.xlu1 %v2787_v6, %s2340_s13 }
 0x270   :  { %1202 = vrot.lane.b32.xlu0 %v2787_v6, %s2335_s8  ;;  %1199 = vrot.lane.b32.xlu1 %v2787_v6, %s2338_s11 }
 0x274   :  { %1208 = vrot.lane.b32.xlu0 %v2787_v6, %s2333_s0  ;;  %1205 = vrot.lane.b32.xlu1 %v2787_v6, %s2336_s9 }
 0x278   :  { %1214 = vrot.lane.b32.xlu0 %v2787_v6, %s2331_s1  ;;  %1211 = vrot.lane.b32.xlu1 %v2787_v6, %s2334_s7 }
 0x27c   :  { %1217 = vrot.lane.b32.xlu1 %v2787_v6, %s2332_s6 }
 0x2d2   :  { %v1179_v7 = vpop.permute.xlu0 %1178  ;;  %v1176_v8 = vpop.permute.xlu1 %1175 }
 0x2d3   :  { %v1221_v48 = vsel %vm1220_vm2, %v2787_v6, %v1176_v8 }
 0x2d4   :  { %v1223_v9 = vsel %vm1222_vm3, %v1221_v48, %v1179_v7 }
 0x2d6   :  { %v1185_v38 = vpop.permute.xlu0 %1184  ;;  %v1182_v10 = vpop.permute.xlu1 %1181 }
 0x2d7   :  { %v1225_v11 = vsel %vm1224_vm4, %v1223_v9, %v1182_v10 }
 0x2d8   :  { %v1227_v13 = vsel %vm1226_vm5, %v1225_v11, %v1185_v38 }
 0x2da   :  { %v1191_v12 = vpop.permute.xlu0 %1190  ;;  %v1188_v14 = vpop.permute.xlu1 %1187 }
 0x2db   :  { %v1229_v15 = vsel %vm1228_vm6, %v1227_v13, %v1188_v14 }
 0x2dc   :  { %v1231_v17 = vsel %vm1230_vm7, %v1229_v15, %v1191_v12 }
 0x2de   :  { %v1197_v16 = vpop.permute.xlu0 %1196  ;;  %v1194_v18 = vpop.permute.xlu1 %1193 }
 0x2df   :  { %v1233_v19 = vsel %vm1232_vm8, %v1231_v17, %v1194_v18 }
 0x2e0   :  { %v1235_v21 = vsel %vm1234_vm9, %v1233_v19, %v1197_v16 }
 0x2e2   :  { %v1203_v20 = vpop.permute.xlu0 %1202  ;;  %v1200_v23 = vpop.permute.xlu1 %1199 }
 0x2e3   :  { %v1237_v24 = vsel %vm1236_vm10, %v1235_v21, %v1200_v23 }
 0x2e4   :  { %v1239_v30 = vsel %vm1238_vm11, %v1237_v24, %v1203_v20 }
 0x2e6   :  { %v1209_v29 = vpop.permute.xlu0 %1208  ;;  %v1206_v31 = vpop.permute.xlu1 %1205 }
 0x2e7   :  { %v1241_v32 = vsel %vm1240_vm12, %v1239_v30, %v1206_v31 }
 0x2e8   :  { %v1242_v34 = vsel %vm17_vm0, %v1241_v32, %v1209_v29 }
 0x2ea   :  { %v1212_v35 = vpop.permute.xlu1 %1211  ;;  %v1215_v36 = vpop.permute.xlu0 %1214 }
 0x2eb   :  { %v1244_v37 = vsel %vm1243_vm13, %v1242_v34, %v1212_v35 }
 0x2ec   :  { %v1246_v40 = vsel %vm1245_vm14, %v1244_v37, %v1215_v36  ;;  %v1336_v36 = vld [vmem:[%s2947_s3] sm:$0x1] }
 0x2ee   :  { %v1218_v41 = vpop.permute.xlu1 %1217 }
 0x2ef   :  { %v1248_v42 = vsel %vm1247_vm15, %v1246_v40, %v1218_v41 }
 0x2f0   :  { %v1252_v43 = vrot.slane %v1248_v42, %v2833_v39 }
 0x2f2   :  { %v1253_v44 = vsub.f32 %v2764_v26, %v1252_v43  ;;  %v1254_v45 = vsub.f32 %v2760_v22, %v1252_v43  ;;  %v1255_v46 = vsub.f32 %v2766_v28, %v1252_v43  ;;  %v1256_v47 = vsub.f32 %v2762_v25, %v1252_v43 }
 0x2f4   :  { %v1257_v49 = vmul.f32 %v1253_v44, %v1253_v44  ;;  %v1258_v50 = vmul.f32 %v1254_v45, %v1254_v45  ;;  %v1259_v51 = vmul.f32 %v1255_v46, %v1255_v46  ;;  %v1260_v53 = vmul.f32 %v1256_v47, %v1256_v47 }
 0x2f6   :  { %v1261_v52 = vadd.f32 %v1258_v50, %v1257_v49 }
 0x2f8   :  { %v1262_v54 = vadd.f32 %v1261_v52, %v1259_v51 }
 0x2fa   :  { %v1263_v55 = vadd.f32 %v1262_v54, %v1260_v53 }
 0x2fc   :  { %v1264_v56 = vrot.slane %v1263_v55, 4 }
 0x2fe   :  { %v1265_v57 = vadd.f32 %v1264_v56, %v1263_v55 }
 0x300   :  { %v1266_v58 = vrot.slane %v1265_v57, 2 }
 0x302   :  { %v1267_v59 = vadd.f32 %v1266_v58, %v1265_v57 }
 0x304   :  { %v1268_v60 = vrot.slane %v1267_v59, 1 }
 0x306   :  { %v1269_v61 = vadd.f32 %v1268_v60, %v1267_v59 }
 0x308   :  { %1275 = vrot.lane.b32.xlu1 %v1269_v61, %s2331_s1  ;;  %1271 = vrot.lane.b32.xlu0 %v1269_v61, %s2332_s6 }
 0x30c   :  { %1283 = vrot.lane.b32.xlu1 %v1269_v61, %s2333_s0  ;;  %1279 = vrot.lane.b32.xlu0 %v1269_v61, %s2334_s7 }
 0x310   :  { %1291 = vrot.lane.b32.xlu1 %v1269_v61, %s2335_s8  ;;  %1287 = vrot.lane.b32.xlu0 %v1269_v61, %s2336_s9 }
 0x314   :  { %1299 = vrot.lane.b32.xlu1 %v1269_v61, %s2337_s10  ;;  %1295 = vrot.lane.b32.xlu0 %v1269_v61, %s2338_s11 }
 0x318   :  { %1307 = vrot.lane.b32.xlu1 %v1269_v61, %s2339_s12  ;;  %1303 = vrot.lane.b32.xlu0 %v1269_v61, %s2340_s13 }
 0x31c   :  { %1315 = vrot.lane.b32.xlu1 %v1269_v61, %s2341_s14  ;;  %1311 = vrot.lane.b32.xlu0 %v1269_v61, %s2342_s15 }
 0x320   :  { %1323 = vrot.lane.b32.xlu1 %v1269_v61, %s2330_s21  ;;  %1319 = vrot.lane.b32.xlu0 %v1269_v61, %s2343_s16 }
 0x324   :  { %1327 = vrot.lane.b32.xlu0 %v1269_v61, %s2344_s17 }
 0x37a   :  { %v1276_v62 = vpop.permute.xlu1 %1275  ;;  %v1272_v63 = vpop.permute.xlu0 %1271 }
 0x37b   :  { %v1274_v0 = vadd.f32 %v1272_v63, %v1269_v61 }
 0x37d   :  { %v1278_v1 = vadd.f32 %v1276_v62, %v1274_v0 }
 0x37e   :  { %v1284_v2 = vpop.permute.xlu1 %1283  ;;  %v1280_v3 = vpop.permute.xlu0 %1279 }
 0x37f   :  { %v1282_v4 = vadd.f32 %v1280_v3, %v1278_v1 }
 0x381   :  { %v1286_v5 = vadd.f32 %v1284_v2, %v1282_v4 }
 0x382   :  { %v1292_v7 = vpop.permute.xlu1 %1291  ;;  %v1288_v8 = vpop.permute.xlu0 %1287 }
 0x383   :  { %v1290_v48 = vadd.f32 %v1288_v8, %v1286_v5 }
 0x385   :  { %v1294_v38 = vadd.f32 %v1292_v7, %v1290_v48 }
 0x386   :  { %v1300_v9 = vpop.permute.xlu1 %1299  ;;  %v1296_v10 = vpop.permute.xlu0 %1295 }
 0x387   :  { %v1298_v11 = vadd.f32 %v1296_v10, %v1294_v38 }
 0x389   :  { %v1302_v12 = vadd.f32 %v1300_v9, %v1298_v11 }
 0x38a   :  { %v1308_v13 = vpop.permute.xlu1 %1307  ;;  %v1304_v14 = vpop.permute.xlu0 %1303 }
 0x38b   :  { %v1306_v15 = vadd.f32 %v1304_v14, %v1302_v12 }
 0x38d   :  { %v1310_v16 = vadd.f32 %v1308_v13, %v1306_v15 }
 0x38e   :  { %v1316_v17 = vpop.permute.xlu1 %1315  ;;  %v1312_v18 = vpop.permute.xlu0 %1311 }
 0x38f   :  { %v1314_v19 = vadd.f32 %v1312_v18, %v1310_v16 }
 0x391   :  { %v1318_v20 = vadd.f32 %v1316_v17, %v1314_v19 }
 0x392   :  { %v1320_v21 = vpop.permute.xlu0 %1319  ;;  %v1324_v24 = vpop.permute.xlu1 %1323 }
 0x393   :  { %v1322_v23 = vadd.f32 %v1320_v21, %v1318_v20 }
 0x395   :  { %v1326_v27 = vadd.f32 %v1324_v24, %v1322_v23 }
 0x396   :  { %v1328_v29 = vpop.permute.xlu0 %1327 }
 0x397   :  { %v1330_v30 = vadd.f32 %v1328_v29, %v1326_v27 }
 0x399   :  { %v1331_v31 = vmul.f32 0.001953125, %v1330_v30 }
 0x39b   :  { %v1333_v32 = vadd.f32 1e-05, %v1331_v31 }
 0x39d   :  { %2327 = vrsqrt.f32 %v1333_v32 }
 0x3a7   :  { %v2328_v34 = vpop.eup %2327 }
 0x3a8   :  { %v1335_v35 = vmul.f32 %v2328_v34, %v1332_v33 }
 0x3aa   :  { %v1337_v37 = vmul.f32 %v1335_v35, %v2787_v6  ;;  %v1343_v40 = vrot.slane %v1335_v35, %v2833_v39 }
 0x3ac   :  { %v1338_v41 = vsub.f32 %v1336_v36, %v1337_v37  ;;  %1347 = vrot.lane.b32.xlu0 %v1343_v40, %s2330_s21  ;;  %1344 = vrot.lane.b32.xlu1 %v1343_v40, %s2344_s17 }
 0x3ae   :  { %v1408_v42 = vrot.slane %v1338_v41, %v2833_v39 }
 0x3b0   :  { %1350 = vrot.lane.b32.xlu1 %v1343_v40, %s2343_s16  ;;  %1409 = vrot.lane.b32.xlu0 %v1408_v42, %s2344_s17 }
 0x3b4   :  { %1353 = vrot.lane.b32.xlu1 %v1343_v40, %s2341_s14  ;;  %1412 = vrot.lane.b32.xlu0 %v1408_v42, %s2330_s21 }
 0x3b8   :  { %1356 = vrot.lane.b32.xlu1 %v1343_v40, %s2342_s15  ;;  %1415 = vrot.lane.b32.xlu0 %v1408_v42, %s2343_s16 }
 0x3bc   :  { %1359 = vrot.lane.b32.xlu1 %v1343_v40, %s2339_s12  ;;  %1418 = vrot.lane.b32.xlu0 %v1408_v42, %s2341_s14 }
 0x3c0   :  { %1362 = vrot.lane.b32.xlu1 %v1343_v40, %s2340_s13  ;;  %1421 = vrot.lane.b32.xlu0 %v1408_v42, %s2342_s15 }
 0x3c4   :  { %1365 = vrot.lane.b32.xlu1 %v1343_v40, %s2337_s10  ;;  %1424 = vrot.lane.b32.xlu0 %v1408_v42, %s2339_s12 }
 0x3c8   :  { %1368 = vrot.lane.b32.xlu1 %v1343_v40, %s2338_s11  ;;  %1427 = vrot.lane.b32.xlu0 %v1408_v42, %s2340_s13 }
 0x3cc   :  { %1371 = vrot.lane.b32.xlu1 %v1343_v40, %s2335_s8  ;;  %1430 = vrot.lane.b32.xlu0 %v1408_v42, %s2337_s10 }
 0x3d0   :  { %1374 = vrot.lane.b32.xlu1 %v1343_v40, %s2336_s9  ;;  %1433 = vrot.lane.b32.xlu0 %v1408_v42, %s2338_s11 }
 0x3d4   :  { %1377 = vrot.lane.b32.xlu1 %v1343_v40, %s2333_s0  ;;  %1436 = vrot.lane.b32.xlu0 %v1408_v42, %s2335_s8 }
 0x3d8   :  { %1380 = vrot.lane.b32.xlu1 %v1343_v40, %s2334_s7  ;;  %1439 = vrot.lane.b32.xlu0 %v1408_v42, %s2336_s9 }
 0x3dc   :  { %1383 = vrot.lane.b32.xlu1 %v1343_v40, %s2331_s1  ;;  %1442 = vrot.lane.b32.xlu0 %v1408_v42, %s2333_s0 }
 0x3e0   :  { %1386 = vrot.lane.b32.xlu1 %v1343_v40, %s2332_s6  ;;  %1445 = vrot.lane.b32.xlu0 %v1408_v42, %s2334_s7 }
 0x3e4   :  { %1448 = vrot.lane.b32.xlu1 %v1408_v42, %s2331_s1  ;;  %1451 = vrot.lane.b32.xlu0 %v1408_v42, %s2332_s6 }
 0x41e   :  { %v1348_v6 = vpop.permute.xlu0 %1347  ;;  %v1345_v43 = vpop.permute.xlu1 %1344 }
 0x41f   :  { %v1389_v63 = vsel %vm1220_vm2, %v1335_v35, %v1345_v43 }
 0x420   :  { %v1390_v0 = vsel %vm1222_vm3, %v1389_v63, %v1348_v6 }
 0x422   :  { %v1351_v44 = vpop.permute.xlu1 %1350  ;;  %v1410_v45 = vpop.permute.xlu0 %1409 }
 0x423   :  { %v1391_v3 = vsel %vm1224_vm4, %v1390_v0, %v1351_v44  ;;  %v1454_v7 = vsel %vm1220_vm2, %v1338_v41, %v1410_v45 }
 0x426   :  { %v1354_v46 = vpop.permute.xlu1 %1353  ;;  %v1413_v47 = vpop.permute.xlu0 %1412 }
 0x427   :  { %v1392_v4 = vsel %vm1226_vm5, %v1391_v3, %v1354_v46  ;;  %v1455_v9 = vsel %vm1222_vm3, %v1454_v7, %v1413_v47 }
 0x42a   :  { %v1357_v49 = vpop.permute.xlu1 %1356  ;;  %v1416_v50 = vpop.permute.xlu0 %1415 }
 0x42b   :  { %v1393_v5 = vsel %vm1228_vm6, %v1392_v4, %v1357_v49  ;;  %v1456_v11 = vsel %vm1224_vm4, %v1455_v9, %v1416_v50 }
 0x42e   :  { %v1360_v51 = vpop.permute.xlu1 %1359  ;;  %v1419_v52 = vpop.permute.xlu0 %1418 }
 0x42f   :  { %v1394_v8 = vsel %vm1230_vm7, %v1393_v5, %v1360_v51  ;;  %v1457_v13 = vsel %vm1226_vm5, %v1456_v11, %v1419_v52 }
 0x432   :  { %v1363_v53 = vpop.permute.xlu1 %1362  ;;  %v1422_v54 = vpop.permute.xlu0 %1421 }
 0x433   :  { %v1395_v10 = vsel %vm1232_vm8, %v1394_v8, %v1363_v53  ;;  %v1458_v15 = vsel %vm1228_vm6, %v1457_v13, %v1422_v54 }
 0x436   :  { %v1366_v55 = vpop.permute.xlu1 %1365  ;;  %v1425_v56 = vpop.permute.xlu0 %1424 }
 0x437   :  { %v1396_v12 = vsel %vm1234_vm9, %v1395_v10, %v1366_v55  ;;  %v1459_v19 = vsel %vm1230_vm7, %v1458_v15, %v1425_v56 }
 0x43a   :  { %v1369_v57 = vpop.permute.xlu1 %1368  ;;  %v1428_v58 = vpop.permute.xlu0 %1427 }
 0x43b   :  { %v1397_v14 = vsel %vm1236_vm10, %v1396_v12, %v1369_v57  ;;  %v1460_v21 = vsel %vm1232_vm8, %v1459_v19, %v1428_v58 }
 0x43e   :  { %v1372_v59 = vpop.permute.xlu1 %1371  ;;  %v1431_v60 = vpop.permute.xlu0 %1430 }
 0x43f   :  { %v1398_v16 = vsel %vm1238_vm11, %v1397_v14, %v1372_v59  ;;  %v1461_v24 = vsel %vm1234_vm9, %v1460_v21, %v1431_v60 }
 0x442   :  { %v1375_v61 = vpop.permute.xlu1 %1374  ;;  %v1434_v62 = vpop.permute.xlu0 %1433 }
 0x443   :  { %v1399_v20 = vsel %vm1240_vm12, %v1398_v16, %v1375_v61  ;;  %v1462_v29 = vsel %vm1236_vm10, %v1461_v24, %v1434_v62 }
 0x446   :  { %v1378_v1 = vpop.permute.xlu1 %1377  ;;  %v1437_v2 = vpop.permute.xlu0 %1436 }
 0x447   :  { %v1400_v23 = vsel %vm17_vm0, %v1399_v20, %v1378_v1  ;;  %v1463_v33 = vsel %vm1238_vm11, %v1462_v29, %v1437_v2 }
 0x44a   :  { %v1381_v48 = vpop.permute.xlu1 %1380  ;;  %v1440_v38 = vpop.permute.xlu0 %1439 }
 0x44b   :  { %v1401_v27 = vsel %vm1243_vm13, %v1400_v23, %v1381_v48  ;;  %v1464_v35 = vsel %vm1240_vm12, %v1463_v33, %v1440_v38 }
 0x44e   :  { %v1384_v17 = vpop.permute.xlu1 %1383  ;;  %v1443_v18 = vpop.permute.xlu0 %1442 }
 0x44f   :  { %v1402_v30 = vsel %vm1245_vm14, %v1401_v27, %v1384_v17  ;;  %v1465_v37 = vsel %vm17_vm0, %v1464_v35, %v1443_v18 }
 0x452   :  { %v1387_v31 = vpop.permute.xlu1 %1386  ;;  %v1446_v32 = vpop.permute.xlu0 %1445 }
 0x453   :  { %v1403_v34 = vsel %vm1247_vm15, %v1402_v30, %v1387_v31  ;;  %v1466_v40 = vsel %vm1243_vm13, %v1465_v37, %v1446_v32 }
 0x454   :  { %v1472_v36 = vrot.slane %v1403_v34, %v2833_v39 }
 0x456   :  { %v1449_v41 = vpop.permute.xlu1 %1448  ;;  %v1452_v42 = vpop.permute.xlu0 %1451  ;;  %v1473_v43 = vmul.f32 %v2764_v26, %v1472_v36  ;;  %v1474_v45 = vmul.f32 %v2760_v22, %v1472_v36  ;;  %v1475_v46 = vmul.f32 %v2766_v28, %v1472_v36  ;;  %v1476_v47 = vmul.f32 %v2762_v25, %v1472_v36 }
 0x457   :  { %v1467_v6 = vsel %vm1245_vm14, %v1466_v40, %v1449_v41 }
 0x458   :  { %v1468_v44 = vsel %vm1247_vm15, %v1467_v6, %v1452_v42 }
 0x459   :  { %v1480_v49 = vrot.slane %v1468_v44, %v2833_v39 }
 0x45b   :  { %v1481_v50 = vadd.f32 %v1480_v49, %v1473_v43  ;;  %v1482_v51 = vadd.f32 %v1480_v49, %v1474_v45  ;;  %v1483_v52 = vadd.f32 %v1480_v49, %v1475_v46  ;;  %v1484_v53 = vadd.f32 %v1480_v49, %v1476_v47 }
 0x45d   :  { %vm1485_vm0 = vcmp.ge.f32.partialorder %v1481_v50, 0.0  ;;  %vm1486_vm1 = vcmp.ge.f32.partialorder %v1482_v51, 0.0  ;;  %vm1487_vm2 = vcmp.ge.f32.partialorder %v1483_v52, 0.0  ;;  %vm1488_vm3 = vcmp.ge.f32.partialorder %v1484_v53, 0.0 }
 0x45e   :  { %v1489_v54 = vmul.f32 0.01, %v1481_v50  ;;  %v1490_v26 = vmul.f32 0.01, %v1482_v51  ;;  %v1491_v55 = vmul.f32 0.01, %v1483_v52 }
 0x45f   :  { %v1492_v56 = vmul.f32 0.01, %v1484_v53 }
 0x460   :  { %v1493_v57 = vsel %vm1485_vm0, %v1481_v50, %v1489_v54  ;;  %v1494_v22 = vsel %vm1486_vm1, %v1482_v51, %v1490_v26  ;;  %v1495_v58 = vsel %vm1487_vm2, %v1483_v52, %v1491_v55 }
 0x461   :  { %v1496_v28 = vsel %vm1488_vm3, %v1484_v53, %v1492_v56  ;;  %1497 = vst [vmem:[%s2948_s4] sm:$0xff] %v1493_v57  ;;  %1498 = vst [vmem:[%s2948_s4 + $0x8] sm:$0xff] %v1494_v22 }
 0x462   :  { %1499 = vst [vmem:[%s2948_s4 + $0x10] sm:$0xff] %v1495_v58  ;;  %1500 = vst [vmem:[%s2948_s4 + $0x18] sm:$0xff] %v1496_v28 }

// kernel: a_call__.3
= control target key start
LH: loop header
LB: loop body
LE: loop exit
PB: predicated region body
PF: predicated region fallthrough
CT: control target
= control target key end

     0   :  { %vm18_vm0 = vcmask 523264   ;;  %v2543_v3 = vmov 0.0|0.0   ;;  %v2544_v4 = vmov 0.0   ;;  %vm38_vm1 = vcmask 1043456   ;;  %s2547_s13 = smov 124   ;;  %s2548_s14 = smov 112   ;;  %s3773_s0 = inlined_call_operand.vmem [shape: f32[32,128], index: 0, kind: input, shape index: {}]   ;;  %s3774_s1 = inlined_call_operand.vmem [shape: f32[9,192,64], index: 1, kind: input, shape index: {}]   ;;  %s3775_s2 = inlined_call_operand.vmem [shape: f32[1,4], index: 2, kind: input, shape index: {}]   ;;  %s3776_s3 = inlined_call_operand.vmem [shape: f32[1,4], index: 3, kind: input, shape index: {}]   ;;  %s3777_s4 = inlined_call_operand.vmem [shape: f32[32,64], index: 4, kind: output, shape index: {}]  }
   0x1   :  { %v30_v0 = vld [vmem:[%s3773_s0] sm:$0xff]  ;;  %v31_v1 = vld [vmem:[%s3773_s0 + $0x8] sm:$0xff]  ;;  %v32_v2 = vld [vmem:[%s3773_s0 + $0x10] sm:$0xff]  ;;  %2099 = vmatprep.subr.bf16.mxu1 %v2543_v3  ;;  %2243 = vmatprep.subr.bf16.mxu0 %v2543_v3  ;;  %17 = vst [vmem:[#allocation2] sm:$0xff] %v2544_v4  ;;  %vm63_vm2 = vcmask 1047812   ;;  %vm65_vm3 = vcmask 261124  }
   0x2   :  { %19 = vst.msk [vmem:[#allocation2 + $0x8] sm:$0xff] %vm18_vm0, %v2544_v4  ;;  %20 = vst [vmem:[#allocation2 + $0x10] sm:$0xff] %v2544_v4  ;;  %v39_v5 = vrot.slane %v30_v0, 4  ;;  %v40_v6 = vrot.slane %v31_v1, 4  ;;  %v33_v7 = vld [vmem:[%s3773_s0 + $0x18] sm:$0xff]  ;;  %v1871_v8 = vld [vmem:[%s3774_s1 + $0xc0] sm:$0xff] }
   0x3   :  { %21 = vst.msk [vmem:[#allocation2 + $0x18] sm:$0xff] %vm18_vm0, %v2544_v4  ;;  %22 = vst [vmem:[#allocation2 + $0x20] sm:$0xff] %v2544_v4  ;;  %v1872_v9 = vld [vmem:[%s3774_s1 + $0xc8] sm:$0xff]  ;;  %v1959_v11 = vld [vmem:[%s3774_s1 + $0x300] sm:$0xff]  ;;  %s3778_s0 = smov 32   ;;  %v42_v14 = vrot.slane %v32_v2, 4 }
   0x4   :  { %23 = vst.msk [vmem:[#allocation2 + $0x28] sm:$0xff] %vm18_vm0, %v2544_v4  ;;  %24 = vst [vmem:[#allocation2 + $0x30] sm:$0xff] %v2544_v4  ;;  %v2100_v10 = vpack.c.bf16 %v1872_v9, %v1871_v8  ;;  %v1960_v12 = vld [vmem:[%s3774_s1 + $0x308] sm:$0xff]  ;;  %v1873_v13 = vld [vmem:[%s3774_s1 + $0xd0] sm:$0xff]  ;;  %45 = vrot.lane.b32.xlu0 %v39_v5, %s3778_s0  ;;  %49 = vrot.lane.b32.xlu1 %v40_v6, %s3778_s0  ;;  %v41_v18 = vsel %vm38_vm1, %v39_v5, %v40_v6  ;;  %v43_v19 = vrot.slane %v33_v7, 4  ;;  %vm71_vm4 = vcmask 1043712  }
   0x5   :  { %25 = vst.msk [vmem:[#allocation2 + $0x38] sm:$0xff] %vm18_vm0, %v2544_v4  ;;  %26 = vst [vmem:[#allocation2 + $0x40] sm:$0xff] %v2544_v4  ;;  %v2244_v15 = vpack.c.bf16 %v1960_v12, %v1959_v11  ;;  %v1874_v16 = vld [vmem:[%s3774_s1 + $0xd8] sm:$0xff]  ;;  %v1961_v17 = vld [vmem:[%s3774_s1 + $0x310] sm:$0xff]  ;;  %vm73_vm5 = vcmask 257024   ;;  %vm67_vm6 = vcmask 1047808  }
   0x6   :  { %27 = vst.msk [vmem:[#allocation2 + $0x48] sm:$0xff] %vm18_vm0, %v2544_v4  ;;  %28 = vst [vmem:[#allocation2 + $0x50] sm:$0xff] %v2544_v4  ;;  %2101 = vmatpush1.bf16.msra.mxu1 %v2100_v10  ;;  %v2103_v20 = vpack.c.bf16 %v1874_v16, %v1873_v13  ;;  %v1962_v21 = vld [vmem:[%s3774_s1 + $0x318] sm:$0xff]  ;;  %v1875_v23 = vld [vmem:[%s3774_s1 + $0xe0] sm:$0xff]  ;;  %v44_v27 = vsel %vm38_vm1, %v42_v14, %v43_v19  ;;  %vm69_vm7 = vcmask 261120   ;;  %vm133_vm8 = vcmask 1046528  }
   0x7   :  { %29 = vst.msk [vmem:[#allocation2 + $0x58] sm:$0xff] %vm18_vm0, %v2544_v4  ;;  %2245 = vmatpush1.bf16.msra.mxu0 %v2244_v15  ;;  %2102 = vmatprep.subr.bf16.mxu1 %v2543_v3  ;;  %v2247_v22 = vpack.c.bf16 %v1962_v21, %v1961_v17  ;;  %v1876_v24 = vld [vmem:[%s3774_s1 + $0xe8] sm:$0xff]  ;;  %v1963_v25 = vld [vmem:[%s3774_s1 + $0x320] sm:$0xff]  ;;  %v1877_v30 = vld [vmem:[%s3774_s1 + $0xf0] sm:$0xff]  ;;  %vm875_vm9 = vcmask 1042432   ;;  %vm387_vm10 = vcmask 1045504  }
   0x8   :  { %2246 = vmatprep.subr.bf16.mxu0 %v2543_v3  ;;  %v1964_v26 = vld [vmem:[%s3774_s1 + $0x328] sm:$0xff]  ;;  %47 = vrot.lane.b32.xlu0 %v41_v18, %s3778_s0  ;;  %v2106_v28 = vpack.c.bf16 %v1876_v24, %v1875_v23  ;;  %v1878_v31 = vld [vmem:[%s3774_s1 + $0xf8] sm:$0xff]  ;;  %v1965_v32 = vld [vmem:[%s3774_s1 + $0x330] sm:$0xff]  ;;  %vm1038_vm11 = vcmask 1041408   ;;  %vm550_vm12 = vcmask 1044480   ;;  %vm1201_vm13 = vcmask 1040384  }
   0x9   :  { %51 = vrot.lane.b32.xlu1 %v42_v14, %s3778_s0  ;;  %v2250_v29 = vpack.c.bf16 %v1964_v26, %v1963_v25  ;;  %v1966_v33 = vld [vmem:[%s3774_s1 + $0x338] sm:$0xff]  ;;  %v2109_v34 = vpack.c.bf16 %v1878_v31, %v1877_v30  ;;  %v1879_v36 = vld [vmem:[%s3774_s1 + $0x100] sm:$0xff]  ;;  %v1880_v37 = vld [vmem:[%s3774_s1 + $0x108] sm:$0xff]  ;;  %s2549_s15 = smov 116   ;;  %s2550_s16 = smov 104   ;;  %vm1594_vm14 = vcmask 31744  }
   0xa   :  { %2104 = vmatpush1.bf16.msra.mxu1 %v2103_v20  ;;  %v2253_v35 = vpack.c.bf16 %v1966_v33, %v1965_v32  ;;  %v1967_v38 = vld [vmem:[%s3774_s1 + $0x340] sm:$0xff]  ;;  %v1968_v39 = vld [vmem:[%s3774_s1 + $0x348] sm:$0xff]  ;;  %v2112_v40 = vpack.c.bf16 %v1880_v37, %v1879_v36  ;;  %v1881_v42 = vld [vmem:[%s3774_s1 + $0x110] sm:$0xff]  ;;  %s2551_s17 = smov 108   ;;  %s2552_s18 = smov 96   ;;  %vm1596_vm15 = vcmask 64512  }
   0xb   :  { %2248 = vmatpush1.bf16.msra.mxu0 %v2247_v22  ;;  %2105 = vmatprep.subr.bf16.mxu1 %v2543_v3  ;;  %v2256_v41 = vpack.c.bf16 %v1968_v39, %v1967_v38  ;;  %v1882_v43 = vld [vmem:[%s3774_s1 + $0x118] sm:$0xff]  ;;  %v1969_v44 = vld [vmem:[%s3774_s1 + $0x350] sm:$0xff]  ;;  %v1883_v48 = vld [vmem:[%s3774_s1 + $0x120] sm:$0xff]  ;;  %s2553_s19 = smov 100   ;;  %s2554_s20 = smov 88  }
   0xc   :  { %2249 = vmatprep.subr.bf16.mxu0 %v2543_v3  ;;  %53 = vrot.lane.b32.xlu0 %v44_v27, %s3778_s0  ;;  %v1970_v45 = vld [vmem:[%s3774_s1 + $0x358] sm:$0xff]  ;;  %v2115_v46 = vpack.c.bf16 %v1882_v43, %v1881_v42  ;;  %v1884_v49 = vld [vmem:[%s3774_s1 + $0x128] sm:$0xff]  ;;  %v1971_v50 = vld [vmem:[%s3774_s1 + $0x360] sm:$0xff]  ;;  %s2555_s21 = smov 92   ;;  %s2556_s22 = smov 80  }
   0xd   :  { %55 = vrot.lane.b32.xlu1 %v43_v19, %s3778_s0  ;;  %v2259_v47 = vpack.c.bf16 %v1970_v45, %v1969_v44  ;;  %v1972_v51 = vld [vmem:[%s3774_s1 + $0x368] sm:$0xff]  ;;  %v2118_v52 = vpack.c.bf16 %v1884_v49, %v1883_v48  ;;  %v1885_v54 = vld [vmem:[%s3774_s1 + $0x130] sm:$0xff]  ;;  %v1886_v55 = vld [vmem:[%s3774_s1 + $0x138] sm:$0xff]  ;;  %s2557_s23 = smov 84   ;;  %s2558_s24 = smov 72  }
   0xe   :  { %2107 = vmatpush1.bf16.msra.mxu1 %v2106_v28  ;;  %v2262_v53 = vpack.c.bf16 %v1972_v51, %v1971_v50  ;;  %v1973_v56 = vld [vmem:[%s3774_s1 + $0x370] sm:$0xff]  ;;  %v1974_v57 = vld [vmem:[%s3774_s1 + $0x378] sm:$0xff]  ;;  %v2121_v58 = vpack.c.bf16 %v1886_v55, %v1885_v54  ;;  %v1887_v60 = vld [vmem:[%s3774_s1 + $0x140] sm:$0xff]  ;;  %s2559_s25 = smov 76   ;;  %s2560_s26 = smov 68  }
   0xf   :  { %2251 = vmatpush1.bf16.msra.mxu0 %v2250_v29  ;;  %2108 = vmatprep.subr.bf16.mxu1 %v2543_v3  ;;  %v2265_v59 = vpack.c.bf16 %v1974_v57, %v1973_v56  ;;  %v1888_v61 = vld [vmem:[%s3774_s1 + $0x148] sm:$0xff]  ;;  %v1975_v62 = vld [vmem:[%s3774_s1 + $0x380] sm:$0xff]  ;;  %v1889_v2 = vld [vmem:[%s3774_s1 + $0x150] sm:$0xff]  ;;  %s2561_s27 = smov 8   ;;  %s2562_s28 = smov 4  }
  0x10   :  { %2252 = vmatprep.subr.bf16.mxu0 %v2543_v3  ;;  %v1976_v63 = vld [vmem:[%s3774_s1 + $0x388] sm:$0xff]  ;;  %v2124_v0 = vpack.c.bf16 %v1888_v61, %v1887_v60  ;;  %v1890_v4 = vld [vmem:[%s3774_s1 + $0x158] sm:$0xff]  ;;  %v1977_v5 = vld [vmem:[%s3774_s1 + $0x390] sm:$0xff]  ;;  %s2563_s29 = smov 16   ;;  %s2564_s30 = smov 12  }
  0x11   :  { %v2268_v1 = vpack.c.bf16 %v1976_v63, %v1975_v62  ;;  %v1978_v6 = vld [vmem:[%s3774_s1 + $0x398] sm:$0xff]  ;;  %v2127_v7 = vpack.c.bf16 %v1890_v4, %v1889_v2  ;;  %v1891_v9 = vld [vmem:[%s3774_s1 + $0x160] sm:$0xff]  ;;  %v1892_v10 = vld [vmem:[%s3774_s1 + $0x168] sm:$0xff]  ;;  %s2565_s5 = smov 24   ;;  %s2566_s6 = smov 20  }
  0x12   :  { %2110 = vmatpush1.bf16.msra.mxu1 %v2109_v34  ;;  %v2271_v8 = vpack.c.bf16 %v1978_v6, %v1977_v5  ;;  %v1979_v11 = vld [vmem:[%s3774_s1 + $0x3a0] sm:$0xff]  ;;  %v1980_v12 = vld [vmem:[%s3774_s1 + $0x3a8] sm:$0xff]  ;;  %v2130_v13 = vpack.c.bf16 %v1892_v10, %v1891_v9  ;;  %v1893_v15 = vld [vmem:[%s3774_s1 + $0x170] sm:$0xff]  ;;  %s2567_s7 = smov 28   ;;  %s3780_s8 = smov 40  }
  0x13   :  { %2254 = vmatpush1.bf16.msra.mxu0 %v2253_v35  ;;  %2111 = vmatprep.subr.bf16.mxu1 %v2543_v3  ;;  %v2274_v14 = vpack.c.bf16 %v1980_v12, %v1979_v11  ;;  %v1894_v16 = vld [vmem:[%s3774_s1 + $0x178] sm:$0xff]  ;;  %v1981_v17 = vld [vmem:[%s3774_s1 + $0x3b0] sm:$0xff]  ;;  %v89_v30 = vld [vmem:[%s3774_s1] sm:$0xff]  ;;  %s2569_s9 = smov 36   ;;  %s2570_s10 = smov 48  }
  0x14   :  { %2255 = vmatprep.subr.bf16.mxu0 %v2543_v3  ;;  %v1982_v18 = vld [vmem:[%s3774_s1 + $0x3b8] sm:$0xff]  ;;  %v2133_v19 = vpack.c.bf16 %v1894_v16, %v1893_v15  ;;  %v90_v31 = vld [vmem:[%s3774_s1 + $0x8] sm:$0xff]  ;;  %v1987_v33 = vld [vmem:[%s3774_s1 + $0x3c0] sm:$0xff]  ;;  %s2571_s11 = smov 44   ;;  %s2572_s12 = smov 56  }
  0x15   :  { %v2277_v20 = vpack.c.bf16 %v1982_v18, %v1981_v17  ;;  %v1988_v34 = vld [vmem:[%s3774_s1 + $0x3c8] sm:$0xff]  ;;  %v2821_v35 = vld [vmem:[%s3774_s1 + $0x10] sm:$0xff]  ;;  %v2826_v36 = vld [vmem:[%s3774_s1 + $0x18] sm:$0xff]  ;;  %v2136_v57 = vpack.c.bf16 %v90_v31, %v89_v30 }
  0x16   :  { %2113 = vmatpush1.bf16.msra.mxu1 %v2112_v40  ;;  %v2831_v37 = vld [vmem:[%s3774_s1 + $0x3d0] sm:$0xff]  ;;  %v2836_v38 = vld [vmem:[%s3774_s1 + $0x3d8] sm:$0xff]  ;;  %v93_v10 = vld [vmem:[%s3774_s1 + $0x20] sm:$0xff] }
  0x17   :  { %2257 = vmatpush1.bf16.msra.mxu0 %v2256_v41  ;;  %2114 = vmatprep.subr.bf16.mxu1 %v2543_v3  ;;  %v2283_v60 = vpack.c.bf16 %v2836_v38, %v2831_v37  ;;  %v94_v11 = vld [vmem:[%s3774_s1 + $0x28] sm:$0xff]  ;;  %v1991_v16 = vld [vmem:[%s3774_s1 + $0x3e0] sm:$0xff]  ;;  %v95_v37 = vld [vmem:[%s3774_s1 + $0x30] sm:$0xff] }
  0x18   :  { %2258 = vmatprep.subr.bf16.mxu0 %v2543_v3  ;;  %v1992_v17 = vld [vmem:[%s3774_s1 + $0x3e8] sm:$0xff]  ;;  %v2142_v31 = vpack.c.bf16 %v94_v11, %v93_v10  ;;  %v96_v38 = vld [vmem:[%s3774_s1 + $0x38] sm:$0xff] }
  0x1a   :  { %2116 = vmatpush1.bf16.msra.mxu1 %v2115_v46 }
  0x1b   :  { %2260 = vmatpush1.bf16.msra.mxu0 %v2259_v47  ;;  %2117 = vmatprep.subr.bf16.mxu1 %v2543_v3 }
  0x1c   :  { %2261 = vmatprep.subr.bf16.mxu0 %v2543_v3 }
  0x1e   :  { %2119 = vmatpush1.bf16.msra.mxu1 %v2118_v52 }
  0x1f   :  { %2263 = vmatpush1.bf16.msra.mxu0 %v2262_v53  ;;  %2120 = vmatprep.subr.bf16.mxu1 %v2543_v3 }
  0x20   :  { %2264 = vmatprep.subr.bf16.mxu0 %v2543_v3 }
  0x22   :  { %2122 = vmatpush1.bf16.msra.mxu1 %v2121_v58  ;;  %v2280_v58 = vpack.c.bf16 %v1988_v34, %v1987_v33 }
  0x23   :  { %2266 = vmatpush1.bf16.msra.mxu0 %v2265_v59  ;;  %2123 = vmatprep.subr.bf16.mxu1 %v2543_v3  ;;  %v2139_v59 = vpack.c.bf16 %v2826_v36, %v2821_v35 }
  0x24   :  { %2267 = vmatprep.subr.bf16.mxu0 %v2543_v3 }
  0x26   :  { %2125 = vmatpush1.bf16.msra.mxu1 %v2124_v0 }
  0x27   :  { %2269 = vmatpush1.bf16.msra.mxu0 %v2268_v1  ;;  %2126 = vmatprep.subr.bf16.mxu1 %v2543_v3 }
  0x28   :  { %2270 = vmatprep.subr.bf16.mxu0 %v2543_v3 }
  0x2a   :  { %2128 = vmatpush1.bf16.msra.mxu1 %v2127_v7 }
  0x2b   :  { %2272 = vmatpush1.bf16.msra.mxu0 %v2271_v8  ;;  %2129 = vmatprep.subr.bf16.mxu1 %v2543_v3 }
  0x2c   :  { %2273 = vmatprep.subr.bf16.mxu0 %v2543_v3 }
  0x2e   :  { %2131 = vmatpush1.bf16.msra.mxu1 %v2130_v13 }
  0x2f   :  { %2275 = vmatpush1.bf16.msra.mxu0 %v2274_v14  ;;  %2132 = vmatprep.subr.bf16.mxu1 %v2543_v3 }
  0x30   :  { %2276 = vmatprep.subr.bf16.mxu0 %v2543_v3 }
  0x32   :  { %2134 = vmatpush1.bf16.msra.mxu1 %v2133_v19 }
  0x33   :  { %2278 = vmatpush1.bf16.msra.mxu0 %v2277_v20  ;;  %2135 = vmatprep.subr.bf16.mxu1 %v2543_v3 }
  0x34   :  { %2279 = vmatprep.subr.bf16.mxu0 %v2543_v3 }
  0x76   :  { %v46_v21 = vpop.permute.xlu0 %45  ;;  %v50_v22 = vpop.permute.xlu1 %49 }
  0x77   :  { %64 = vst.msk [vmem:[#allocation2] sm:$0xf0] %vm63_vm2, %v46_v21 }
  0x78   :  { %66 = vst.msk [vmem:[#allocation2 + $0x8] sm:$0xf0] %vm65_vm3, %v46_v21 }
  0x79   :  { %72 = vst.msk [vmem:[#allocation2 + $0x20] sm:$0xf] %vm71_vm4, %v50_v22 }
  0x7a   :  { %74 = vst.msk [vmem:[#allocation2 + $0x28] sm:$0xf] %vm73_vm5, %v50_v22  ;;  %v48_v23 = vpop.permute.xlu0 %47 }
  0x7b   :  { %v52_v24 = vpop.permute.xlu1 %51  ;;  %68 = vst.msk [vmem:[#allocation2 + $0x10] sm:$0xff] %vm67_vm6, %v48_v23 }
  0x7c   :  { %70 = vst.msk [vmem:[#allocation2 + $0x18] sm:$0xff] %vm69_vm7, %v48_v23 }
  0x7d   :  { %75 = vst.msk [vmem:[#allocation2 + $0x30] sm:$0xf0] %vm63_vm2, %v52_v24  ;;  %vm1600_vm2 = vcmask 130048  }
  0x7e   :  { %76 = vst.msk [vmem:[#allocation2 + $0x38] sm:$0xf0] %vm65_vm3, %v52_v24  ;;  %v54_v25 = vpop.permute.xlu0 %53  ;;  %v113_v29 = vld [vmem:[#allocation2] sm:$0xfe]  ;;  %vm1602_vm3 = vcmask 162816  }
  0x7f   :  { %v56_v26 = vpop.permute.xlu1 %55  ;;  %v114_v27 = vld [vmem:[#allocation2 + $0x8] sm:$0xfe]  ;;  %77 = vst.msk [vmem:[#allocation2 + $0x40] sm:$0xff] %vm67_vm6, %v54_v25  ;;  %v697_v32 = vld [vmem:[#allocation2] sm:$0xf0]  ;;  %v134_v43 = vrot.slane %v113_v29, 1 }
  0x80   :  { %v698_v28 = vld [vmem:[#allocation2 + $0x8] sm:$0xf0]  ;;  %78 = vst.msk [vmem:[#allocation2 + $0x48] sm:$0xff] %vm69_vm7, %v54_v25  ;;  %v137_v39 = vrot.slane %v114_v27, 1  ;;  %v713_v44 = vrot.slane %v697_v32, 4  ;;  %v2286_v32 = vpack.c.bf16 %v1992_v17, %v1991_v16  ;;  %vm1609_vm6 = vcmask 293888  }
  0x81   :  { %79 = vst.msk [vmem:[#allocation2 + $0x50] sm:$0xf] %vm71_vm4, %v56_v26  ;;  %v716_v40 = vrot.slane %v698_v28, 4  ;;  %v116_v41 = vld [vmem:[#allocation2 + $0x28] sm:$0x1]  ;;  %vm1604_vm4 = vcmask 195584  }
  0x82   :  { %80 = vst.msk [vmem:[#allocation2 + $0x58] sm:$0xf] %vm73_vm5, %v56_v26  ;;  %v700_v42 = vld [vmem:[#allocation2 + $0x28] sm:$0xf]  ;;  %v115_v45 = vld [vmem:[#allocation2 + $0x20] sm:$0x1] }
  0x83   :  { %v699_v46 = vld [vmem:[#allocation2 + $0x20] sm:$0xf]  ;;  %v2838_v47 = vld [vmem:[#allocation2 + $0x18] sm:$0xff]  ;;  %v2840_v48 = vld [vmem:[#allocation2 + $0x10] sm:$0xff]  ;;  %v142_v49 = vrot.slane %v116_v41, 1  ;;  %v721_v50 = vrot.slane %v700_v42, 4 }
  0x84   :  { %v138_v52 = vrot.slane %v2838_v47, 1  ;;  %v717_v53 = vrot.slane %v2838_v47, 4  ;;  %v135_v54 = vrot.slane %v2840_v48, 1  ;;  %v714_v55 = vrot.slane %v2840_v48, 4  ;;  %v117_v1 = vld [vmem:[#allocation2 + $0x30] sm:$0xfe] }
  0x85   :  { %v118_v51 = vld [vmem:[#allocation2 + $0x38] sm:$0xfe]  ;;  %v701_v2 = vld [vmem:[#allocation2 + $0x30] sm:$0xf0]  ;;  %v140_v4 = vrot.slane %v115_v45, 1  ;;  %v719_v5 = vrot.slane %v699_v46, 4 }
  0x86   :  { %v702_v56 = vld [vmem:[#allocation2 + $0x38] sm:$0xf0]  ;;  %v139_v61 = vsel %vm133_vm8, %v137_v39, %v138_v52  ;;  %v718_v62 = vsel %vm38_vm1, %v716_v40, %v717_v53  ;;  %v136_v63 = vsel %vm133_vm8, %v134_v43, %v135_v54  ;;  %v715_v0 = vsel %vm38_vm1, %v713_v44, %v714_v55  ;;  %v2858_v9 = vld [vmem:[#allocation2 + $0x40] sm:$0xff]  ;;  %v1993_v40 = vld [vmem:[%s3774_s1 + $0x3f0] sm:$0xff] }
  0x87   :  { %1895 = vmatprep.mubr.msk.f32.mxu1 %vm18_vm0, %v139_v61  ;;  %1983 = vmatprep.mubr.msk.f32.mxu0 %vm18_vm0, %v718_v62  ;;  %v2856_v6 = vld [vmem:[#allocation2 + $0x48] sm:$0xff]  ;;  %v147_v7 = vrot.slane %v118_v51, 1  ;;  %v726_v8 = vrot.slane %v702_v56, 4  ;;  %v143_v12 = vsel %vm133_vm8, %v138_v52, %v142_v49  ;;  %v722_v13 = vsel %vm38_vm1, %v717_v53, %v721_v50  ;;  %v1994_v41 = vld [vmem:[%s3774_s1 + $0x3f8] sm:$0xff]  ;;  %v97_v52 = vld [vmem:[%s3774_s1 + $0x40] sm:$0xff] }
  0x88   :  { %256 = vmatmul.mubr.f32.vlgmr.msra.gmra.mrb[0].mxu1 %v136_v63  ;;  %835 = vmatmul.mubr.f32.vlgmr.msra.gmra.mrb[0].mxu0 %v715_v0  ;;  %v148_v14 = vrot.slane %v2856_v6, 1  ;;  %v727_v15 = vrot.slane %v2856_v6, 4  ;;  %v144_v19 = vrot.slane %v117_v1, 1  ;;  %v145_v20 = vrot.slane %v2858_v9, 1  ;;  %v119_v24 = vld [vmem:[#allocation2 + $0x50] sm:$0x1] }
  0x89   :  { %v120_v18 = vld [vmem:[#allocation2 + $0x58] sm:$0x1]  ;;  %2137 = vmatpush1.bf16.msra.mxu1 %v2136_v57  ;;  %2281 = vmatpush1.bf16.msra.mxu0 %v2280_v58  ;;  %v723_v21 = vrot.slane %v701_v2, 4  ;;  %v724_v22 = vrot.slane %v2858_v9, 4  ;;  %v703_v25 = vld [vmem:[#allocation2 + $0x50] sm:$0xf]  ;;  %v141_v26 = vsel %vm133_vm8, %v135_v54, %v140_v4  ;;  %v720_v27 = vsel %vm38_vm1, %v714_v55, %v719_v5 }
  0x8a   :  { %v704_v23 = vld [vmem:[#allocation2 + $0x58] sm:$0xf]  ;;  %1896 = vmatprep.mubr.msk.f32.mxu1 %vm18_vm0, %v143_v12  ;;  %1984 = vmatprep.mubr.msk.f32.mxu0 %vm18_vm0, %v722_v13  ;;  %v149_v28 = vsel %vm133_vm8, %v147_v7, %v148_v14  ;;  %v152_v29 = vrot.slane %v120_v18, 1  ;;  %v728_v30 = vsel %vm38_vm1, %v726_v8, %v727_v15  ;;  %v146_v34 = vsel %vm133_vm8, %v144_v19, %v145_v20  ;;  %v860_v45 = vld [vmem:[#allocation2 + $0x8] sm:$0xe0]  ;;  %v1995_v54 = vld [vmem:[%s3774_s1 + $0x400] sm:$0xff] }
  0x8b   :  { %2138 = vmatprep.subr.bf16.mxu1 %v2543_v3  ;;  %2282 = vmatprep.subr.bf16.mxu0 %v2543_v3  ;;  %v731_v33 = vrot.slane %v704_v23, 4  ;;  %v725_v35 = vsel %vm38_vm1, %v723_v21, %v724_v22  ;;  %v150_v36 = vrot.slane %v119_v24, 1  ;;  %v729_v39 = vrot.slane %v703_v25, 4  ;;  %v98_v53 = vld [vmem:[%s3774_s1 + $0x48] sm:$0xff]  ;;  %v99_v61 = vld [vmem:[%s3774_s1 + $0x50] sm:$0xff]  ;;  %v100_v62 = vld [vmem:[%s3774_s1 + $0x58] sm:$0xff] }
  0x8c   :  { %261 = vmatmul.mubr.f32.gmra.mrb[2].mxu1 %v141_v26  ;;  %840 = vmatmul.mubr.f32.gmra.mrb[2].mxu0 %v720_v27  ;;  %v153_v42 = vsel %vm133_vm8, %v148_v14, %v152_v29  ;;  %v2145_v44 = vpack.c.bf16 %v96_v38, %v95_v37  ;;  %v2289_v50 = vpack.c.bf16 %v1994_v41, %v1993_v40  ;;  %v880_v51 = vrot.slane %v2838_v47, 5  ;;  %v1996_v55 = vld [vmem:[%s3774_s1 + $0x408] sm:$0xff]  ;;  %v1997_v63 = vld [vmem:[%s3774_s1 + $0x410] sm:$0xff]  ;;  %v1998_v0 = vld [vmem:[%s3774_s1 + $0x418] sm:$0xff] }
  0x8d   :  { %2140 = vmatpush1.bf16.msra.mxu1 %v2139_v59  ;;  %2284 = vmatpush1.bf16.msra.mxu0 %v2283_v60  ;;  %v732_v43 = vsel %vm38_vm1, %v727_v15, %v731_v33  ;;  %v151_v46 = vsel %vm133_vm8, %v145_v20, %v150_v36  ;;  %v730_v49 = vsel %vm38_vm1, %v724_v22, %v729_v39  ;;  %v879_v56 = vrot.slane %v860_v45, 5  ;;  %v82_v57 = vld [vmem:[#allocation2 + $0x8] sm:$0xff]  ;;  %v101_v4 = vld [vmem:[%s3774_s1 + $0x60] sm:$0xff]  ;;  %v103_v12 = vld [vmem:[%s3774_s1 + $0x70] sm:$0xff] }
  0x8e   :  { %1897 = vmatprep.mubr.msk.f32.mxu1 %vm18_vm0, %v149_v28  ;;  %2141 = vmatprep.subr.bf16.mxu1 %v2543_v3  ;;  %v2148_v59 = vpack.c.bf16 %v98_v53, %v97_v52  ;;  %v2292_v60 = vpack.c.bf16 %v1996_v55, %v1995_v54  ;;  %v2151_v1 = vpack.c.bf16 %v100_v62, %v99_v61  ;;  %v102_v5 = vld [vmem:[%s3774_s1 + $0x68] sm:$0xff]  ;;  %v1999_v7 = vld [vmem:[%s3774_s1 + $0x420] sm:$0xff]  ;;  %v104_v13 = vld [vmem:[%s3774_s1 + $0x78] sm:$0xff]  ;;  %vm1598_vm1 = vcmask 97280  }
  0x8f   :  { %1985 = vmatprep.mubr.msk.f32.mxu0 %vm18_vm0, %v728_v30  ;;  %2285 = vmatprep.subr.bf16.mxu0 %v2543_v3  ;;  %v881_v58 = vsel %vm875_vm9, %v879_v56, %v880_v51  ;;  %v2295_v2 = vpack.c.bf16 %v1998_v0, %v1997_v63  ;;  %v2000_v8 = vld [vmem:[%s3774_s1 + $0x428] sm:$0xff]  ;;  %v2154_v10 = vpack.c.bf16 %v102_v5, %v101_v4  ;;  %v2001_v14 = vld [vmem:[%s3774_s1 + $0x430] sm:$0xff]  ;;  %v2002_v15 = vld [vmem:[%s3774_s1 + $0x438] sm:$0xff]  ;;  %vm1606_vm5 = vcmask 228352  }
  0x90   :  { %266 = vmatmul.mubr.f32.gmra.mrb[4].mxu1 %v146_v34  ;;  %845 = vmatmul.mubr.f32.gmra.mrb[4].mxu0 %v725_v35  ;;  %v2298_v11 = vpack.c.bf16 %v2000_v8, %v1999_v7  ;;  %v2157_v16 = vpack.c.bf16 %v104_v13, %v103_v12  ;;  %v2301_v17 = vpack.c.bf16 %v2002_v15, %v2001_v14  ;;  %v105_v18 = vld [vmem:[%s3774_s1 + $0x80] sm:$0xff]  ;;  %v106_v19 = vld [vmem:[%s3774_s1 + $0x88] sm:$0xff]  ;;  %v107_v24 = vld [vmem:[%s3774_s1 + $0x90] sm:$0xff]  ;;  %v890_v7 = vrot.slane %v2856_v6, 5 }
  0x91   :  { %2143 = vmatpush1.bf16.msra.mxu1 %v2142_v31  ;;  %2287 = vmatpush1.bf16.msra.mxu0 %v2286_v32  ;;  %v2003_v20 = vld [vmem:[%s3774_s1 + $0x440] sm:$0xff]  ;;  %v2004_v21 = vld [vmem:[%s3774_s1 + $0x448] sm:$0xff]  ;;  %v2160_v22 = vpack.c.bf16 %v106_v19, %v105_v18  ;;  %v108_v25 = vld [vmem:[%s3774_s1 + $0x98] sm:$0xff]  ;;  %v887_v14 = vrot.slane %v2858_v9, 5  ;;  %vm1611_vm8 = vcmask 326656  }
  0x92   :  { %1898 = vmatprep.mubr.msk.f32.mxu1 %vm18_vm0, %v153_v42  ;;  %2144 = vmatprep.subr.bf16.mxu1 %v2543_v3  ;;  %v2304_v23 = vpack.c.bf16 %v2004_v21, %v2003_v20  ;;  %v2005_v26 = vld [vmem:[%s3774_s1 + $0x450] sm:$0xff]  ;;  %v2006_v27 = vld [vmem:[%s3774_s1 + $0x458] sm:$0xff]  ;;  %v2163_v28 = vpack.c.bf16 %v108_v25, %v107_v24  ;;  %v109_v30 = vld [vmem:[%s3774_s1 + $0xa0] sm:$0xff] }
  0x93   :  { %1986 = vmatprep.mubr.msk.f32.mxu0 %vm18_vm0, %v732_v43  ;;  %2288 = vmatprep.subr.bf16.mxu0 %v2543_v3  ;;  %v2307_v29 = vpack.c.bf16 %v2006_v27, %v2005_v26  ;;  %v110_v31 = vld [vmem:[%s3774_s1 + $0xa8] sm:$0xff]  ;;  %v2007_v32 = vld [vmem:[%s3774_s1 + $0x460] sm:$0xff]  ;;  %v111_v36 = vld [vmem:[%s3774_s1 + $0xb0] sm:$0xff] }
  0x94   :  { %271 = vmatmul.mubr.f32.gmra.mrb[6].mxu1 %v151_v46  ;;  %850 = vmatmul.mubr.f32.gmra.mrb[6].mxu0 %v730_v49  ;;  %v2008_v33 = vld [vmem:[%s3774_s1 + $0x468] sm:$0xff]  ;;  %v2166_v34 = vpack.c.bf16 %v110_v31, %v109_v30  ;;  %v112_v37 = vld [vmem:[%s3774_s1 + $0xb8] sm:$0xff]  ;;  %v2009_v38 = vld [vmem:[%s3774_s1 + $0x470] sm:$0xff]  ;;  %v877_v46 = vrot.slane %v2840_v48, 5  ;;  %v392_v31 = vrot.slane %v2838_v47, 2 }
  0x95   :  { %2146 = vmatpush1.bf16.msra.mxu1 %v2145_v44  ;;  %2290 = vmatpush1.bf16.msra.mxu0 %v2289_v50  ;;  %v2310_v35 = vpack.c.bf16 %v2008_v33, %v2007_v32  ;;  %v2010_v39 = vld [vmem:[%s3774_s1 + $0x478] sm:$0xff]  ;;  %v2169_v40 = vpack.c.bf16 %v112_v37, %v111_v36  ;;  %v1903_v42 = vld [vmem:[%s3774_s1 + $0x180] sm:$0xff]  ;;  %v1904_v44 = vld [vmem:[%s3774_s1 + $0x188] sm:$0xff] }
  0x96   :  { %1899 = vmatprep.mubr.msk.f32.mxu1 %vm18_vm0, %v82_v57  ;;  %2011 = vmatprep.mubr.msk.f32.mxu0 %vm18_vm0, %v881_v58  ;;  %v2313_v41 = vpack.c.bf16 %v2010_v39, %v2009_v38  ;;  %v859_v43 = vld [vmem:[#allocation2] sm:$0xe0]  ;;  %v862_v45 = vld [vmem:[#allocation2 + $0x28] sm:$0x1f]  ;;  %v861_v52 = vld [vmem:[#allocation2 + $0x20] sm:$0x1f]  ;;  %v2172_v54 = vpack.c.bf16 %v1904_v44, %v1903_v42 }
  0x97   :  { %2147 = vmatprep.subr.bf16.mxu1 %v2543_v3  ;;  %2291 = vmatprep.subr.bf16.mxu0 %v2543_v3  ;;  %v2015_v49 = vld [vmem:[%s3774_s1 + $0x480] sm:$0xff]  ;;  %v2016_v50 = vld [vmem:[%s3774_s1 + $0x488] sm:$0xff]  ;;  %v876_v53 = vrot.slane %v859_v43, 5  ;;  %v884_v55 = vrot.slane %v862_v45, 5  ;;  %v1905_v57 = vld [vmem:[%s3774_s1 + $0x190] sm:$0xff]  ;;  %v882_v62 = vrot.slane %v861_v52, 5 }
  0x98   :  { %v2316_v56 = vpack.c.bf16 %v2016_v50, %v2015_v49  ;;  %v1906_v58 = vld [vmem:[%s3774_s1 + $0x198] sm:$0xff]  ;;  %v2017_v63 = vld [vmem:[%s3774_s1 + $0x490] sm:$0xff]  ;;  %v2019_v15 = vld [vmem:[%s3774_s1 + $0x4a0] sm:$0xff] }
  0x99   :  { %2149 = vmatpush1.bf16.msra.mxu1 %v2148_v59  ;;  %2293 = vmatpush1.bf16.msra.mxu0 %v2292_v60  ;;  %v864_v59 = vld [vmem:[#allocation2 + $0x38] sm:$0xe0]  ;;  %v81_v60 = vld [vmem:[#allocation2] sm:$0xff]  ;;  %v878_v61 = vsel %vm875_vm9, %v876_v53, %v877_v46  ;;  %v2175_v4 = vpack.c.bf16 %v1906_v58, %v1905_v57  ;;  %v866_v12 = vld [vmem:[#allocation2 + $0x58] sm:$0x1f] }
  0x9a   :  { %2150 = vmatprep.subr.bf16.mxu1 %v2543_v3  ;;  %2294 = vmatprep.subr.bf16.mxu0 %v2543_v3  ;;  %v2018_v0 = vld [vmem:[%s3774_s1 + $0x498] sm:$0xff]  ;;  %v889_v5 = vrot.slane %v864_v59, 5  ;;  %v865_v18 = vld [vmem:[#allocation2 + $0x50] sm:$0x1f]  ;;  %v894_v21 = vrot.slane %v866_v12, 5  ;;  %v1911_v38 = vld [vmem:[%s3774_s1 + $0x1c0] sm:$0xff] }
  0x9b   :  { %v2319_v8 = vpack.c.bf16 %v2018_v0, %v2017_v63  ;;  %v1910_v24 = vld [vmem:[%s3774_s1 + $0x1b8] sm:$0xff]  ;;  %v2021_v25 = vld [vmem:[%s3774_s1 + $0x4b0] sm:$0xff]  ;;  %v1023_v32 = vld [vmem:[#allocation2 + $0x8] sm:$0xc0] }
  0x9c   :  { %v891_v19 = vsel %vm875_vm9, %v889_v5, %v890_v7  ;;  %v85_v26 = vld [vmem:[#allocation2 + $0x30] sm:$0xff]  ;;  %v2022_v30 = vld [vmem:[%s3774_s1 + $0x4b8] sm:$0xff]  ;;  %v895_v33 = vsel %vm875_vm9, %v890_v7, %v894_v21  ;;  %v1912_v39 = vld [vmem:[%s3774_s1 + $0x1c8] sm:$0xff] }
  0x9d   :  { %2152 = vmatpush1.bf16.msra.mxu1 %v2151_v1  ;;  %2296 = vmatpush1.bf16.msra.mxu0 %v2295_v2  ;;  %v863_v1 = vld [vmem:[#allocation2 + $0x30] sm:$0xe0]  ;;  %v885_v2 = vsel %vm875_vm9, %v880_v51, %v884_v55  ;;  %v883_v51 = vsel %vm875_vm9, %v877_v46, %v882_v62  ;;  %v2325_v37 = vpack.c.bf16 %v2022_v30, %v2021_v25  ;;  %v2023_v42 = vld [vmem:[%s3774_s1 + $0x4c0] sm:$0xff]  ;;  %v2024_v43 = vld [vmem:[%s3774_s1 + $0x4c8] sm:$0xff] }
  0x9e   :  { %2153 = vmatprep.subr.bf16.mxu1 %v2543_v3  ;;  %2297 = vmatprep.subr.bf16.mxu0 %v2543_v3  ;;  %v886_v13 = vrot.slane %v863_v1, 5  ;;  %v2184_v46 = vpack.c.bf16 %v1912_v39, %v1911_v38  ;;  %v2328_v49 = vpack.c.bf16 %v2024_v43, %v2023_v42  ;;  %v1913_v50 = vld [vmem:[%s3774_s1 + $0x1d0] sm:$0xff]  ;;  %v1914_v52 = vld [vmem:[%s3774_s1 + $0x1d8] sm:$0xff]  ;;  %v1915_v57 = vld [vmem:[%s3774_s1 + $0x1e0] sm:$0xff]  ;;  %v389_v38 = vrot.slane %v2840_v48, 2 }
  0x9f   :  { %v2025_v53 = vld [vmem:[%s3774_s1 + $0x4d0] sm:$0xff]  ;;  %v2187_v55 = vpack.c.bf16 %v1914_v52, %v1913_v50  ;;  %v1916_v58 = vld [vmem:[%s3774_s1 + $0x1e8] sm:$0xff]  ;;  %v2027_v59 = vld [vmem:[%s3774_s1 + $0x4e0] sm:$0xff]  ;;  %v1040_v42 = vrot.slane %v2840_v48, 6 }
  0xa0   :  { %v888_v27 = vsel %vm875_vm9, %v886_v13, %v887_v14  ;;  %v1917_v63 = vld [vmem:[%s3774_s1 + $0x1f0] sm:$0xff]  ;;  %v1918_v0 = vld [vmem:[%s3774_s1 + $0x1f8] sm:$0xff]  ;;  %v1919_v7 = vld [vmem:[%s3774_s1 + $0x200] sm:$0xff] }
  0xa1   :  { %2155 = vmatpush1.bf16.msra.mxu1 %v2154_v10  ;;  %2299 = vmatpush1.bf16.msra.mxu0 %v2298_v11  ;;  %v1907_v10 = vld [vmem:[%s3774_s1 + $0x1a0] sm:$0xff]  ;;  %v1908_v11 = vld [vmem:[%s3774_s1 + $0x1a8] sm:$0xff]  ;;  %v2029_v1 = vld [vmem:[%s3774_s1 + $0x4f0] sm:$0xff] }
  0xa2   :  { %2156 = vmatprep.subr.bf16.mxu1 %v2543_v3  ;;  %2300 = vmatprep.subr.bf16.mxu0 %v2543_v3  ;;  %v2178_v20 = vpack.c.bf16 %v1908_v11, %v1907_v10  ;;  %v2031_v10 = vld [vmem:[%s3774_s1 + $0x500] sm:$0xff]  ;;  %v2032_v11 = vld [vmem:[%s3774_s1 + $0x508] sm:$0xff]  ;;  %v1921_v13 = vld [vmem:[%s3774_s1 + $0x210] sm:$0xff] }
  0xa3   :  { %v2035_v21 = vld [vmem:[%s3774_s1 + $0x520] sm:$0xff]  ;;  %v1925_v25 = vld [vmem:[%s3774_s1 + $0x230] sm:$0xff]  ;;  %v374_v30 = vld [vmem:[#allocation2 + $0x28] sm:$0x3] }
  0xa4   :  { %v1022_v39 = vld [vmem:[#allocation2] sm:$0xc0]  ;;  %v396_v43 = vrot.slane %v374_v30, 2  ;;  %v376_v50 = vld [vmem:[#allocation2 + $0x38] sm:$0xfc] }
  0xa5   :  { %2158 = vmatpush1.bf16.msra.mxu1 %v2157_v16  ;;  %2302 = vmatpush1.bf16.msra.mxu0 %v2301_v17  ;;  %v2020_v16 = vld [vmem:[%s3774_s1 + $0x4a8] sm:$0xff]  ;;  %v86_v17 = vld [vmem:[#allocation2 + $0x38] sm:$0xff]  ;;  %v1039_v52 = vrot.slane %v1022_v39, 6 }
  0xa6   :  { %2159 = vmatprep.subr.bf16.mxu1 %v2543_v3  ;;  %2303 = vmatprep.subr.bf16.mxu0 %v2543_v3  ;;  %v1938_v30 = vld [vmem:[%s3774_s1 + $0x278] sm:$0xff] }
  0xa7   :  { %v2050_v39 = vld [vmem:[%s3774_s1 + $0x578] sm:$0xff] }
  0xa9   :  { %2161 = vmatpush1.bf16.msra.mxu1 %v2160_v22  ;;  %2305 = vmatpush1.bf16.msra.mxu0 %v2304_v23  ;;  %v2322_v22 = vpack.c.bf16 %v2020_v16, %v2019_v15  ;;  %v1909_v23 = vld [vmem:[%s3774_s1 + $0x1b0] sm:$0xff]  ;;  %v2034_v16 = vld [vmem:[%s3774_s1 + $0x518] sm:$0xff] }
  0xaa   :  { %2162 = vmatprep.subr.bf16.mxu1 %v2543_v3  ;;  %2306 = vmatprep.subr.bf16.mxu0 %v2543_v3  ;;  %v2033_v15 = vld [vmem:[%s3774_s1 + $0x510] sm:$0xff] }
  0xad   :  { %2164 = vmatpush1.bf16.msra.mxu1 %v2163_v28  ;;  %2308 = vmatpush1.bf16.msra.mxu0 %v2307_v29  ;;  %v892_v28 = vrot.slane %v865_v18, 5  ;;  %v372_v29 = vld [vmem:[#allocation2 + $0x8] sm:$0xfc]  ;;  %v2343_v18 = vpack.c.bf16 %v2034_v16, %v2033_v15  ;;  %v2047_v16 = vld [vmem:[%s3774_s1 + $0x560] sm:$0xff] }
  0xae   :  { %2165 = vmatprep.subr.bf16.mxu1 %v2543_v3  ;;  %2309 = vmatprep.subr.bf16.mxu0 %v2543_v3  ;;  %v391_v36 = vrot.slane %v372_v29, 2  ;;  %v1936_v15 = vld [vmem:[%s3774_s1 + $0x268] sm:$0xff] }
  0xb0   :  { %v393_v44 = vsel %vm387_vm10, %v391_v36, %v392_v31  ;;  %v1932_v36 = vld [vmem:[%s3774_s1 + $0x248] sm:$0xff] }
  0xb1   :  { %2167 = vmatpush1.bf16.msra.mxu1 %v2166_v34  ;;  %2311 = vmatpush1.bf16.msra.mxu0 %v2310_v35  ;;  %v2181_v34 = vpack.c.bf16 %v1910_v24, %v1909_v23  ;;  %v1043_v35 = vrot.slane %v2838_v47, 6 }
  0xb2   :  { %2168 = vmatprep.subr.bf16.mxu1 %v2543_v3  ;;  %2312 = vmatprep.subr.bf16.mxu0 %v2543_v3 }
  0xb5   :  { %2170 = vmatpush1.bf16.msra.mxu1 %v2169_v40  ;;  %2314 = vmatpush1.bf16.msra.mxu0 %v2313_v41  ;;  %v893_v40 = vsel %vm875_vm9, %v887_v14, %v892_v28  ;;  %v1042_v41 = vrot.slane %v1023_v32, 6  ;;  %v1922_v14 = vld [vmem:[%s3774_s1 + $0x218] sm:$0xff]  ;;  %v1931_v32 = vld [vmem:[%s3774_s1 + $0x240] sm:$0xff]  ;;  %vm1613_vm9 = vcmask 359424  }
  0xb6   :  { %2171 = vmatprep.subr.bf16.mxu1 %v2543_v3  ;;  %2315 = vmatprep.subr.bf16.mxu0 %v2543_v3  ;;  %v2038_v28 = vld [vmem:[%s3774_s1 + $0x538] sm:$0xff] }
  0xb7   :  { %v1044_v45 = vsel %vm1038_vm11, %v1042_v41, %v1043_v35  ;;  %v2044_v41 = vld [vmem:[%s3774_s1 + $0x548] sm:$0xff] }
  0xb8   :  { %351 = vmatmul.mubr.f32.vlgmr.msra.gmra.mrb[0].mxu1 %v81_v60  ;;  %998 = vmatmul.mubr.f32.vlgmr.msra.gmra.mrb[0].mxu0 %v878_v61  ;;  %v2028_v60 = vld [vmem:[%s3774_s1 + $0x4e8] sm:$0xff]  ;;  %v2190_v61 = vpack.c.bf16 %v1916_v58, %v1915_v57 }
  0xb9   :  { %1900 = vmatprep.mubr.msk.f32.mxu1 %vm18_vm0, %v2838_v47  ;;  %2173 = vmatpush1.bf16.msra.mxu1 %v2172_v54  ;;  %v2026_v54 = vld [vmem:[%s3774_s1 + $0x4d8] sm:$0xff]  ;;  %v2334_v62 = vpack.c.bf16 %v2028_v60, %v2027_v59  ;;  %v2045_v60 = vld [vmem:[%s3774_s1 + $0x550] sm:$0xff] }
  0xba   :  { %2012 = vmatprep.mubr.msk.f32.mxu0 %vm18_vm0, %v885_v2  ;;  %2317 = vmatpush1.bf16.msra.mxu0 %v2316_v56  ;;  %v2331_v56 = vpack.c.bf16 %v2026_v54, %v2025_v53  ;;  %v2030_v2 = vld [vmem:[%s3774_s1 + $0x4f8] sm:$0xff]  ;;  %v2208_v53 = vpack.c.bf16 %v1932_v36, %v1931_v32  ;;  %v1933_v54 = vld [vmem:[%s3774_s1 + $0x250] sm:$0xff]  ;;  %v535_v32 = vld [vmem:[#allocation2 + $0x8] sm:$0xf8] }
  0xbb   :  { %2174 = vmatprep.subr.bf16.mxu1 %v2543_v3  ;;  %2318 = vmatprep.subr.bf16.mxu0 %v2543_v3  ;;  %v2337_v5 = vpack.c.bf16 %v2030_v2, %v2029_v1  ;;  %v1934_v59 = vld [vmem:[%s3774_s1 + $0x258] sm:$0xff]  ;;  %v402_v1 = vrot.slane %v2856_v6, 2  ;;  %v375_v2 = vld [vmem:[#allocation2 + $0x30] sm:$0xfc] }
  0xbc   :  { %356 = vmatmul.mubr.f32.gmra.mrb[2].mxu1 %v2840_v48  ;;  %1003 = vmatmul.mubr.f32.gmra.mrb[2].mxu0 %v883_v51  ;;  %v2340_v51 = vpack.c.bf16 %v2032_v11, %v2031_v10  ;;  %v378_v10 = vld [vmem:[#allocation2 + $0x58] sm:$0x3] }
  0xbd   :  { %1901 = vmatprep.mubr.msk.f32.mxu1 %vm18_vm0, %v86_v17  ;;  %2176 = vmatpush1.bf16.msra.mxu1 %v2175_v4  ;;  %v2193_v4 = vpack.c.bf16 %v1918_v0, %v1917_v63  ;;  %v2199_v17 = vpack.c.bf16 %v1922_v14, %v1921_v13  ;;  %v397_v63 = vsel %vm387_vm10, %v392_v31, %v396_v43  ;;  %v401_v0 = vrot.slane %v376_v50, 2  ;;  %v1939_v50 = vld [vmem:[%s3774_s1 + $0x280] sm:$0xff] }
  0xbe   :  { %2013 = vmatprep.mubr.msk.f32.mxu0 %vm18_vm0, %v891_v19  ;;  %2320 = vmatpush1.bf16.msra.mxu0 %v2319_v8  ;;  %v1920_v8 = vld [vmem:[%s3774_s1 + $0x208] sm:$0xff]  ;;  %v1923_v19 = vld [vmem:[%s3774_s1 + $0x220] sm:$0xff]  ;;  %v2211_v31 = vpack.c.bf16 %v1934_v59, %v1933_v54  ;;  %v398_v14 = vrot.slane %v375_v2, 2  ;;  %v1941_v59 = vld [vmem:[%s3774_s1 + $0x290] sm:$0xff] }
  0xbf   :  { %2177 = vmatprep.subr.bf16.mxu1 %v2543_v3  ;;  %2321 = vmatprep.subr.bf16.mxu0 %v2543_v3  ;;  %v2196_v12 = vpack.c.bf16 %v1920_v8, %v1919_v7  ;;  %v1053_v7 = vrot.slane %v2856_v6, 6  ;;  %v1026_v8 = vld [vmem:[#allocation2 + $0x30] sm:$0xc0]  ;;  %v1944_v2 = vld [vmem:[%s3774_s1 + $0x2a8] sm:$0xff] }
  0xc0   :  { %361 = vmatmul.mubr.f32.gmra.mrb[4].mxu1 %v85_v26  ;;  %1008 = vmatmul.mubr.f32.gmra.mrb[4].mxu0 %v888_v27  ;;  %v1926_v26 = vld [vmem:[%s3774_s1 + $0x238] sm:$0xff]  ;;  %v2037_v27 = vld [vmem:[%s3774_s1 + $0x530] sm:$0xff] }
  0xc1   :  { %1902 = vmatprep.mubr.msk.f32.mxu1 %vm18_vm0, %v2856_v6  ;;  %2179 = vmatpush1.bf16.msra.mxu1 %v2178_v20  ;;  %v1924_v20 = vld [vmem:[%s3774_s1 + $0x228] sm:$0xff]  ;;  %v2205_v29 = vpack.c.bf16 %v1926_v26, %v1925_v25  ;;  %v1935_v6 = vld [vmem:[%s3774_s1 + $0x260] sm:$0xff]  ;;  %v1028_v25 = vld [vmem:[#allocation2 + $0x50] sm:$0x3f] }
  0xc2   :  { %2014 = vmatprep.mubr.msk.f32.mxu0 %vm18_vm0, %v895_v33  ;;  %2323 = vmatpush1.bf16.msra.mxu0 %v2322_v22  ;;  %v2036_v22 = vld [vmem:[%s3774_s1 + $0x528] sm:$0xff]  ;;  %v2202_v23 = vpack.c.bf16 %v1924_v20, %v1923_v19  ;;  %v2349_v33 = vpack.c.bf16 %v2038_v28, %v2037_v27  ;;  %v1050_v19 = vrot.slane %v2858_v9, 6  ;;  %v406_v20 = vrot.slane %v378_v10, 2  ;;  %v1945_v10 = vld [vmem:[%s3774_s1 + $0x2b0] sm:$0xff] }
  0xc3   :  { %2180 = vmatprep.subr.bf16.mxu1 %v2543_v3  ;;  %2324 = vmatprep.subr.bf16.mxu0 %v2543_v3  ;;  %v2346_v24 = vpack.c.bf16 %v2036_v22, %v2035_v21  ;;  %v2048_v21 = vld [vmem:[%s3774_s1 + $0x568] sm:$0xff]  ;;  %v377_v22 = vld [vmem:[#allocation2 + $0x50] sm:$0x3]  ;;  %v2214_v26 = vpack.c.bf16 %v1936_v15, %v1935_v6  ;;  %v1055_v36 = vrot.slane %v1028_v25, 6  ;;  %v2059_v6 = vld [vmem:[%s3774_s1 + $0x5c0] sm:$0xff] }
  0xc4   :  { %366 = vmatmul.mubr.f32.gmra.mrb[6].mxu1 %v2858_v9  ;;  %1013 = vmatmul.mubr.f32.gmra.mrb[6].mxu0 %v893_v40  ;;  %v2043_v40 = vld [vmem:[%s3774_s1 + $0x540] sm:$0xff]  ;;  %v2358_v27 = vpack.c.bf16 %v2048_v21, %v2047_v16  ;;  %v404_v28 = vrot.slane %v377_v22, 2  ;;  %v2060_v15 = vld [vmem:[%s3774_s1 + $0x5c8] sm:$0xff]  ;;  %v2062_v21 = vld [vmem:[%s3774_s1 + $0x5d8] sm:$0xff] }
  0xc5   :  { %2182 = vmatpush1.bf16.msra.mxu1 %v2181_v34  ;;  %1927 = vmatprep.mubr.msk.f32.mxu1 %vm18_vm0, %v393_v44  ;;  %v371_v34 = vld [vmem:[#allocation2] sm:$0xfc]  ;;  %v373_v44 = vld [vmem:[#allocation2 + $0x20] sm:$0x3]  ;;  %v2352_v48 = vpack.c.bf16 %v2044_v41, %v2043_v40  ;;  %v1186_v40 = vld [vmem:[#allocation2 + $0x8] sm:$0x80] }
  0xc6   :  { %2326 = vmatpush1.bf16.msra.mxu0 %v2325_v37  ;;  %2039 = vmatprep.mubr.msk.f32.mxu0 %vm18_vm0, %v1044_v45  ;;  %v1025_v37 = vld [vmem:[#allocation2 + $0x28] sm:$0x3f]  ;;  %v1024_v45 = vld [vmem:[#allocation2 + $0x20] sm:$0x3f]  ;;  %v394_v57 = vrot.slane %v373_v44, 2  ;;  %v554_v44 = vrot.slane %v535_v32, 3 }
  0xc7   :  { %2183 = vmatprep.subr.bf16.mxu1 %v2543_v3  ;;  %2327 = vmatprep.subr.bf16.mxu0 %v2543_v3  ;;  %v1045_v58 = vrot.slane %v1024_v45, 6  ;;  %v1952_v25 = vld [vmem:[%s3774_s1 + $0x2e8] sm:$0xff]  ;;  %v2065_v32 = vld [vmem:[%s3774_s1 + $0x5f0] sm:$0xff] }
  0xc9   :  { %2185 = vmatpush1.bf16.msra.mxu1 %v2184_v46  ;;  %v388_v46 = vrot.slane %v371_v34, 2  ;;  %v1046_v13 = vsel %vm1038_vm11, %v1040_v42, %v1045_v58  ;;  %v407_v34 = vsel %vm387_vm10, %v402_v1, %v406_v20  ;;  %v2061_v20 = vld [vmem:[%s3774_s1 + $0x5d0] sm:$0xff] }
  0xca   :  { %2329 = vmatpush1.bf16.msra.mxu0 %v2328_v49  ;;  %2186 = vmatprep.subr.bf16.mxu1 %v2543_v3  ;;  %v1047_v49 = vrot.slane %v1025_v37, 6  ;;  %v555_v37 = vrot.slane %v2838_v47, 3 }
  0xcb   :  { %2330 = vmatprep.subr.bf16.mxu0 %v2543_v3 }
  0xcc   :  { %v556_v54 = vsel %vm550_vm12, %v554_v44, %v555_v37  ;;  %v1185_v44 = vld [vmem:[#allocation2] sm:$0x80] }
  0xcd   :  { %2188 = vmatpush1.bf16.msra.mxu1 %v2187_v55  ;;  %v1027_v55 = vld [vmem:[#allocation2 + $0x38] sm:$0xc0] }
  0xce   :  { %2332 = vmatpush1.bf16.msra.mxu0 %v2331_v56  ;;  %2189 = vmatprep.subr.bf16.mxu1 %v2543_v3  ;;  %v390_v56 = vsel %vm387_vm10, %v388_v46, %v389_v38 }
  0xcf   :  { %2333 = vmatprep.subr.bf16.mxu0 %v2543_v3 }
  0xd1   :  { %2191 = vmatpush1.bf16.msra.mxu1 %v2190_v61  ;;  %v2046_v61 = vld [vmem:[%s3774_s1 + $0x558] sm:$0xff] }
  0xd2   :  { %2335 = vmatpush1.bf16.msra.mxu0 %v2334_v62  ;;  %2192 = vmatprep.subr.bf16.mxu1 %v2543_v3  ;;  %v1041_v62 = vsel %vm1038_vm11, %v1039_v52, %v1040_v42  ;;  %v2355_v11 = vpack.c.bf16 %v2046_v61, %v2045_v60  ;;  %v1206_v42 = vrot.slane %v2838_v47, 7  ;;  %v1940_v52 = vld [vmem:[%s3774_s1 + $0x288] sm:$0xff]  ;;  %v1942_v60 = vld [vmem:[%s3774_s1 + $0x298] sm:$0xff]  ;;  %v2053_v61 = vld [vmem:[%s3774_s1 + $0x590] sm:$0xff] }
  0xd3   :  { %2336 = vmatprep.subr.bf16.mxu0 %v2543_v3 }
  0xd5   :  { %2194 = vmatpush1.bf16.msra.mxu1 %v2193_v4  ;;  %v1048_v4 = vsel %vm1038_vm11, %v1043_v35, %v1047_v49  ;;  %v399_v35 = vrot.slane %v2858_v9, 2  ;;  %v1205_v49 = vrot.slane %v1186_v40, 7  ;;  %v1188_v40 = vld [vmem:[#allocation2 + $0x28] sm:$0x7f] }
  0xd6   :  { %2338 = vmatpush1.bf16.msra.mxu0 %v2337_v5  ;;  %2195 = vmatprep.subr.bf16.mxu1 %v2543_v3  ;;  %v1052_v5 = vrot.slane %v1027_v55, 6  ;;  %v2051_v55 = vld [vmem:[%s3774_s1 + $0x580] sm:$0xff] }
  0xd7   :  { %2339 = vmatprep.subr.bf16.mxu0 %v2543_v3  ;;  %v400_v9 = vsel %vm387_vm10, %v398_v14, %v399_v35  ;;  %v405_v45 = vsel %vm387_vm10, %v399_v35, %v404_v28  ;;  %v1947_v14 = vld [vmem:[%s3774_s1 + $0x2c0] sm:$0xff]  ;;  %v1948_v35 = vld [vmem:[%s3774_s1 + $0x2c8] sm:$0xff] }
  0xd8   :  { %v2232_v16 = vpack.c.bf16 %v1948_v35, %v1947_v14  ;;  %v3473_v35 = vld [vmem:[#allocation2 + $0x40] sm:$0xff] }
  0xd9   :  { %2197 = vmatpush1.bf16.msra.mxu1 %v2196_v12  ;;  %v1029_v12 = vld [vmem:[#allocation2 + $0x58] sm:$0x3f] }
  0xda   :  { %2341 = vmatpush1.bf16.msra.mxu0 %v2340_v51  ;;  %2198 = vmatprep.subr.bf16.mxu1 %v2543_v3  ;;  %v395_v51 = vsel %vm387_vm10, %v389_v38, %v394_v57  ;;  %v2049_v38 = vld [vmem:[%s3774_s1 + $0x570] sm:$0xff]  ;;  %v2220_v57 = vpack.c.bf16 %v1940_v52, %v1939_v50  ;;  %v536_v52 = vld [vmem:[#allocation2 + $0x20] sm:$0x7] }
  0xdb   :  { %2342 = vmatprep.subr.bf16.mxu0 %v2543_v3  ;;  %v2361_v46 = vpack.c.bf16 %v2050_v39, %v2049_v38  ;;  %v534_v39 = vld [vmem:[#allocation2] sm:$0xf8] }
  0xdd   :  { %2200 = vmatpush1.bf16.msra.mxu1 %v2199_v17  ;;  %v403_v17 = vsel %vm387_vm10, %v401_v0, %v402_v1  ;;  %v1943_v1 = vld [vmem:[%s3774_s1 + $0x2a0] sm:$0xff]  ;;  %vm1615_vm10 = vcmask 392192  }
  0xde   :  { %2344 = vmatpush1.bf16.msra.mxu0 %v2343_v18  ;;  %2201 = vmatprep.subr.bf16.mxu1 %v2543_v3  ;;  %v1049_v18 = vrot.slane %v1026_v8, 6 }
  0xdf   :  { %2345 = vmatprep.subr.bf16.mxu0 %v2543_v3 }
  0xe1   :  { %2203 = vmatpush1.bf16.msra.mxu1 %v2202_v23  ;;  %v1054_v23 = vsel %vm1038_vm11, %v1052_v5, %v1053_v7  ;;  %v2056_v5 = vld [vmem:[%s3774_s1 + $0x5a8] sm:$0xff] }
  0xe2   :  { %2347 = vmatpush1.bf16.msra.mxu0 %v2346_v24  ;;  %2204 = vmatprep.subr.bf16.mxu1 %v2543_v3  ;;  %v1057_v24 = vrot.slane %v1029_v12, 6  ;;  %v2058_v12 = vld [vmem:[%s3774_s1 + $0x5b8] sm:$0xff] }
  0xe3   :  { %2348 = vmatprep.subr.bf16.mxu0 %v2543_v3 }
  0xe4   :  { %v1058_v41 = vsel %vm1038_vm11, %v1053_v7, %v1057_v24  ;;  %v2226_v7 = vpack.c.bf16 %v1944_v2, %v1943_v1  ;;  %v1951_v24 = vld [vmem:[%s3774_s1 + $0x2e0] sm:$0xff] }
  0xe5   :  { %2206 = vmatpush1.bf16.msra.mxu1 %v2205_v29  ;;  %v1937_v29 = vld [vmem:[%s3774_s1 + $0x270] sm:$0xff] }
  0xe6   :  { %2350 = vmatpush1.bf16.msra.mxu0 %v2349_v33  ;;  %2207 = vmatprep.subr.bf16.mxu1 %v2543_v3  ;;  %v1051_v33 = vsel %vm1038_vm11, %v1049_v18, %v1050_v19  ;;  %v2217_v43 = vpack.c.bf16 %v1938_v30, %v1937_v29  ;;  %v1949_v18 = vld [vmem:[%s3774_s1 + $0x2d0] sm:$0xff]  ;;  %v1954_v30 = vld [vmem:[%s3774_s1 + $0x2f8] sm:$0xff] }
  0xe7   :  { %2351 = vmatprep.subr.bf16.mxu0 %v2543_v3  ;;  %v1953_v29 = vld [vmem:[%s3774_s1 + $0x2f0] sm:$0xff] }
  0xe8   :  { %510 = vmatmul.mubr.f32.vlgmr.msra.gmra.mrb[0].mxu1 %v390_v56  ;;  %v2052_v56 = vld [vmem:[%s3774_s1 + $0x588] sm:$0xff] }
  0xe9   :  { %1161 = vmatmul.mubr.f32.vlgmr.msra.gmra.mrb[0].mxu0 %v1041_v62  ;;  %1928 = vmatprep.mubr.msk.f32.mxu1 %vm18_vm0, %v397_v63  ;;  %v2364_v58 = vpack.c.bf16 %v2052_v56, %v2051_v55  ;;  %v2054_v62 = vld [vmem:[%s3774_s1 + $0x598] sm:$0xff]  ;;  %v2223_v63 = vpack.c.bf16 %v1942_v60, %v1941_v59  ;;  %v1210_v55 = vrot.slane %v1188_v40, 7  ;;  %v557_v60 = vrot.slane %v536_v52, 3 }
  0xea   :  { %2209 = vmatpush1.bf16.msra.mxu1 %v2208_v53  ;;  %2040 = vmatprep.mubr.msk.f32.mxu0 %vm18_vm0, %v1048_v4  ;;  %v1056_v53 = vsel %vm1038_vm11, %v1050_v19, %v1055_v36  ;;  %v2367_v0 = vpack.c.bf16 %v2054_v62, %v2053_v61  ;;  %v2055_v4 = vld [vmem:[%s3774_s1 + $0x5a0] sm:$0xff]  ;;  %v1950_v19 = vld [vmem:[%s3774_s1 + $0x2d8] sm:$0xff]  ;;  %v537_v36 = vld [vmem:[#allocation2 + $0x28] sm:$0x7]  ;;  %vm1617_vm11 = vcmask 424960  }
  0xeb   :  { %2353 = vmatpush1.bf16.msra.mxu0 %v2352_v48  ;;  %2210 = vmatprep.subr.bf16.mxu1 %v2543_v3  ;;  %v1207_v48 = vsel %vm1201_vm13, %v1205_v49, %v1206_v42  ;;  %v2370_v8 = vpack.c.bf16 %v2056_v5, %v2055_v4  ;;  %v2235_v22 = vpack.c.bf16 %v1950_v19, %v1949_v18  ;;  %v559_v50 = vrot.slane %v537_v36, 3  ;;  %v539_v56 = vld [vmem:[#allocation2 + $0x38] sm:$0xf8]  ;;  %v2073_v62 = vld [vmem:[%s3774_s1 + $0x610] sm:$0xff]  ;;  %v3461_v4 = vld [vmem:[#allocation2 + $0x48] sm:$0xff] }
  0xec   :  { %515 = vmatmul.mubr.f32.gmra.mrb[2].mxu1 %v395_v51  ;;  %2354 = vmatprep.subr.bf16.mxu0 %v2543_v3  ;;  %v564_v2 = vrot.slane %v539_v56, 3  ;;  %v565_v5 = vrot.slane %v3461_v4, 3  ;;  %v1213_v18 = vrot.slane %v3473_v35, 7  ;;  %v2079_v36 = vld [vmem:[%s3774_s1 + $0x640] sm:$0xff]  ;;  %v2542_v40 = vld [vmem:[#allocation2 + $0x18] sm:$0xff] }
  0xed   :  { %1166 = vmatmul.mubr.f32.gmra.mrb[2].mxu0 %v1046_v13  ;;  %1929 = vmatprep.mubr.msk.f32.mxu1 %vm18_vm0, %v403_v17  ;;  %v2376_v17 = vpack.c.bf16 %v2060_v15, %v2059_v6  ;;  %v560_v1 = vsel %vm550_vm12, %v555_v37, %v559_v50  ;;  %v2075_v6 = vld [vmem:[%s3774_s1 + $0x620] sm:$0xff]  ;;  %v2076_v15 = vld [vmem:[%s3774_s1 + $0x628] sm:$0xff] }
  0xee   :  { %2212 = vmatpush1.bf16.msra.mxu1 %v2211_v31  ;;  %2041 = vmatprep.mubr.msk.f32.mxu0 %vm18_vm0, %v1054_v23  ;;  %v1946_v31 = vld [vmem:[%s3774_s1 + $0x2b8] sm:$0xff]  ;;  %v2379_v23 = vpack.c.bf16 %v2062_v21, %v2061_v20  ;;  %v540_v20 = vld [vmem:[#allocation2 + $0x50] sm:$0x7]  ;;  %v2084_v50 = vld [vmem:[%s3774_s1 + $0x668] sm:$0xff] }
  0xef   :  { %2356 = vmatpush1.bf16.msra.mxu0 %v2355_v11  ;;  %2213 = vmatprep.subr.bf16.mxu1 %v2543_v3  ;;  %v2057_v11 = vld [vmem:[%s3774_s1 + $0x5b0] sm:$0xff]  ;;  %v2229_v51 = vpack.c.bf16 %v1946_v31, %v1945_v10  ;;  %v1216_v31 = vrot.slane %v3461_v4, 7  ;;  %v2087_v56 = vld [vmem:[%s3774_s1 + $0x680] sm:$0xff] }
  0xf0   :  { %520 = vmatmul.mubr.f32.gmra.mrb[4].mxu1 %v400_v9  ;;  %2357 = vmatprep.subr.bf16.mxu0 %v2543_v3  ;;  %v2373_v13 = vpack.c.bf16 %v2058_v12, %v2057_v11  ;;  %v2064_v9 = vld [vmem:[%s3774_s1 + $0x5e8] sm:$0xff]  ;;  %v1189_v11 = vld [vmem:[#allocation2 + $0x30] sm:$0x80]  ;;  %v541_v12 = vld [vmem:[#allocation2 + $0x58] sm:$0x7] }
  0xf1   :  { %1171 = vmatmul.mubr.f32.gmra.mrb[4].mxu0 %v1051_v33  ;;  %1930 = vmatprep.mubr.msk.f32.mxu1 %vm18_vm0, %v407_v34  ;;  %v2066_v33 = vld [vmem:[%s3774_s1 + $0x5f8] sm:$0xff]  ;;  %v2241_v34 = vpack.c.bf16 %v1954_v30, %v1953_v29  ;;  %v569_v19 = vrot.slane %v541_v12, 3 }
  0xf2   :  { %2215 = vmatpush1.bf16.msra.mxu1 %v2214_v26  ;;  %2042 = vmatprep.mubr.msk.f32.mxu0 %vm18_vm0, %v1058_v41  ;;  %v2063_v26 = vld [vmem:[%s3774_s1 + $0x5e0] sm:$0xff]  ;;  %v2385_v38 = vpack.c.bf16 %v2066_v33, %v2065_v32  ;;  %v3438_v41 = vld [vmem:[#allocation2 + $0x10] sm:$0xff] }
  0xf3   :  { %2359 = vmatpush1.bf16.msra.mxu0 %v2358_v27  ;;  %2216 = vmatprep.subr.bf16.mxu1 %v2543_v3  ;;  %v2238_v27 = vpack.c.bf16 %v1952_v25, %v1951_v24  ;;  %v2382_v28 = vpack.c.bf16 %v2064_v9, %v2063_v26  ;;  %v1203_v49 = vrot.slane %v3438_v41, 7  ;;  %v2394_v24 = vpack.c.bf16 %v2076_v15, %v2075_v6  ;;  %v2077_v9 = vld [vmem:[%s3774_s1 + $0x630] sm:$0xff] }
  0xf4   :  { %525 = vmatmul.mubr.f32.gmra.mrb[6].mxu1 %v405_v45  ;;  %2360 = vmatprep.subr.bf16.mxu0 %v2543_v3  ;;  %v2071_v45 = vld [vmem:[%s3774_s1 + $0x600] sm:$0xff]  ;;  %v567_v26 = vrot.slane %v540_v20, 3  ;;  %v570_v29 = vsel %vm550_vm12, %v565_v5, %v569_v19 }
  0xf5   :  { %1176 = vmatmul.mubr.f32.gmra.mrb[6].mxu0 %v1056_v53  ;;  %1955 = vmatprep.mubr.msk.f32.mxu1 %vm18_vm0, %v556_v54  ;;  %v1187_v53 = vld [vmem:[#allocation2 + $0x20] sm:$0x7f]  ;;  %v551_v54 = vrot.slane %v534_v39, 3 }
  0xf6   :  { %2218 = vmatpush1.bf16.msra.mxu1 %v2217_v43  ;;  %2067 = vmatprep.mubr.msk.f32.mxu0 %vm18_vm0, %v1207_v48  ;;  %v552_v43 = vrot.slane %v3438_v41, 3  ;;  %v1202_v48 = vrot.slane %v1185_v44, 7  ;;  %v1208_v61 = vrot.slane %v1187_v53, 7  ;;  %v2081_v44 = vld [vmem:[%s3774_s1 + $0x650] sm:$0xff] }
  0xf7   :  { %2362 = vmatpush1.bf16.msra.mxu0 %v2361_v46  ;;  %2219 = vmatprep.subr.bf16.mxu1 %v2543_v3  ;;  %v2072_v46 = vld [vmem:[%s3774_s1 + $0x608] sm:$0xff]  ;;  %v2085_v53 = vld [vmem:[%s3774_s1 + $0x670] sm:$0xff] }
  0xf8   :  { %2363 = vmatprep.subr.bf16.mxu0 %v2543_v3  ;;  %v553_v59 = vsel %vm550_vm12, %v551_v54, %v552_v43  ;;  %v1209_v14 = vsel %vm1201_vm13, %v1203_v49, %v1208_v61  ;;  %v2086_v54 = vld [vmem:[%s3774_s1 + $0x678] sm:$0xff]  ;;  %v2091_v61 = vld [vmem:[%s3774_s1 + $0x6a0] sm:$0xff] }
  0xfa   :  { %2221 = vmatpush1.bf16.msra.mxu1 %v2220_v57  ;;  %v2388_v57 = vpack.c.bf16 %v2072_v46, %v2071_v45  ;;  %v2082_v45 = vld [vmem:[%s3774_s1 + $0x658] sm:$0xff] }
  0xfb   :  { %2365 = vmatpush1.bf16.msra.mxu0 %v2364_v58  ;;  %2222 = vmatprep.subr.bf16.mxu1 %v2543_v3  ;;  %v1190_v58 = vld [vmem:[#allocation2 + $0x38] sm:$0x80]  ;;  %v2403_v46 = vpack.c.bf16 %v2082_v45, %v2081_v44 }
  0xfc   :  { %2366 = vmatprep.subr.bf16.mxu0 %v2543_v3  ;;  %v1215_v10 = vrot.slane %v1190_v58, 7  ;;  %v2089_v58 = vld [vmem:[%s3774_s1 + $0x690] sm:$0xff] }
  0xfe   :  { %2224 = vmatpush1.bf16.msra.mxu1 %v2223_v63  ;;  %v2074_v63 = vld [vmem:[%s3774_s1 + $0x618] sm:$0xff]  ;;  %v1217_v21 = vsel %vm1201_vm13, %v1215_v10, %v1216_v31 }
  0xff   :  { %2368 = vmatpush1.bf16.msra.mxu0 %v2367_v0  ;;  %2225 = vmatprep.subr.bf16.mxu1 %v2543_v3  ;;  %v1204_v0 = vsel %vm1201_vm13, %v1202_v48, %v1203_v49  ;;  %v2391_v37 = vpack.c.bf16 %v2074_v63, %v2073_v62  ;;  %v2083_v49 = vld [vmem:[%s3774_s1 + $0x660] sm:$0xff]  ;;  %v2088_v48 = vld [vmem:[%s3774_s1 + $0x688] sm:$0xff] }
 0x100   :  { %2369 = vmatprep.subr.bf16.mxu0 %v2543_v3  ;;  %v2406_v52 = vpack.c.bf16 %v2084_v50, %v2083_v49  ;;  %v2092_v62 = vld [vmem:[%s3774_s1 + $0x6a8] sm:$0xff] }
 0x101   :  { %v2418_v63 = vpack.c.bf16 %v2092_v62, %v2091_v61 }
 0x102   :  { %2227 = vmatpush1.bf16.msra.mxu1 %v2226_v7  ;;  %v538_v7 = vld [vmem:[#allocation2 + $0x30] sm:$0xf8] }
 0x103   :  { %2371 = vmatpush1.bf16.msra.mxu0 %v2370_v8  ;;  %2228 = vmatprep.subr.bf16.mxu1 %v2543_v3  ;;  %v1211_v8 = vsel %vm1201_vm13, %v1206_v42, %v1210_v55  ;;  %v561_v47 = vrot.slane %v538_v7, 3  ;;  %v562_v42 = vrot.slane %v3473_v35, 3  ;;  %v2409_v55 = vpack.c.bf16 %v2086_v54, %v2085_v53  ;;  %v1348_v7 = vld [vmem:[#allocation2 + $0x20] sm:$0xff] }
 0x104   :  { %2372 = vmatprep.subr.bf16.mxu0 %v2543_v3 }
 0x105   :  { %v563_v25 = vsel %vm550_vm12, %v561_v47, %v562_v42 }
 0x106   :  { %2230 = vmatpush1.bf16.msra.mxu1 %v2229_v51  ;;  %v1192_v51 = vld [vmem:[#allocation2 + $0x58] sm:$0x7f] }
 0x107   :  { %2374 = vmatpush1.bf16.msra.mxu0 %v2373_v13  ;;  %2231 = vmatprep.subr.bf16.mxu1 %v2543_v3  ;;  %v558_v13 = vsel %vm550_vm12, %v552_v43, %v557_v60 }
 0x108   :  { %2375 = vmatprep.subr.bf16.mxu0 %v2543_v3 }
 0x10a   :  { %2233 = vmatpush1.bf16.msra.mxu1 %v2232_v16  ;;  %v566_v16 = vsel %vm550_vm12, %v564_v2, %v565_v5  ;;  %v1351_v5 = vld [vmem:[#allocation2 + $0x58] sm:$0xff] }
 0x10b   :  { %2377 = vmatpush1.bf16.msra.mxu0 %v2376_v17  ;;  %2234 = vmatprep.subr.bf16.mxu1 %v2543_v3  ;;  %v1212_v17 = vrot.slane %v1189_v11, 7 }
 0x10c   :  { %2378 = vmatprep.subr.bf16.mxu0 %v2543_v3 }
 0x10e   :  { %2236 = vmatpush1.bf16.msra.mxu1 %v2235_v22  ;;  %v1220_v22 = vrot.slane %v1192_v51, 7 }
 0x10f   :  { %2380 = vmatpush1.bf16.msra.mxu0 %v2379_v23  ;;  %2237 = vmatprep.subr.bf16.mxu1 %v2543_v3  ;;  %v1191_v23 = vld [vmem:[#allocation2 + $0x50] sm:$0x7f] }
 0x110   :  { %2381 = vmatprep.subr.bf16.mxu0 %v2543_v3  ;;  %v1218_v30 = vrot.slane %v1191_v23, 7  ;;  %v1221_v32 = vsel %vm1201_vm13, %v1216_v31, %v1220_v22 }
 0x112   :  { %2239 = vmatpush1.bf16.msra.mxu1 %v2238_v27  ;;  %v2078_v27 = vld [vmem:[%s3774_s1 + $0x638] sm:$0xff]  ;;  %v1219_v39 = vsel %vm1201_vm13, %v1213_v18, %v1218_v30 }
 0x113   :  { %2383 = vmatpush1.bf16.msra.mxu0 %v2382_v28  ;;  %2240 = vmatprep.subr.bf16.mxu1 %v2543_v3  ;;  %v1214_v28 = vsel %vm1201_vm13, %v1212_v17, %v1213_v18  ;;  %v2397_v33 = vpack.c.bf16 %v2078_v27, %v2077_v9  ;;  %vm1621_vm13 = vcmask 490496  }
 0x114   :  { %2384 = vmatprep.subr.bf16.mxu0 %v2543_v3 }
 0x116   :  { %2242 = vmatpush1.bf16.msra.mxu1 %v2241_v34  ;;  %v568_v34 = vsel %vm550_vm12, %v562_v42, %v567_v26  ;;  %vm1619_vm12 = vcmask 457728  }
 0x117   :  { %2386 = vmatpush1.bf16.msra.mxu0 %v2385_v38  ;;  %2423 = vmatprep.subr.bf16.mxu1 %v2543_v3  ;;  %v2080_v38 = vld [vmem:[%s3774_s1 + $0x648] sm:$0xff] }
 0x118   :  { %2387 = vmatprep.subr.bf16.mxu0 %v2543_v3  ;;  %v2400_v43 = vpack.c.bf16 %v2080_v38, %v2079_v36 }
 0x119   :  { %673 = vmatmul.mubr.f32.vlgmr.msra.gmra.mrb[0].mxu1 %v553_v59  ;;  %v2090_v59 = vld [vmem:[%s3774_s1 + $0x698] sm:$0xff] }
 0x11a   :  { %1324 = vmatmul.mubr.f32.vlgmr.msra.gmra.mrb[0].mxu0 %v1204_v0  ;;  %1956 = vmatprep.mubr.msk.f32.mxu1 %vm18_vm0, %v560_v1  ;;  %v2415_v60 = vpack.c.bf16 %v2090_v59, %v2089_v58  ;;  %v2093_v0 = vld [vmem:[%s3774_s1 + $0x6b0] sm:$0xff]  ;;  %v2094_v1 = vld [vmem:[%s3774_s1 + $0x6b8] sm:$0xff]  ;;  %s2546_s1 = smov 120  }
 0x11b   :  { %2068 = vmatprep.mubr.msk.f32.mxu0 %vm18_vm0, %v1211_v8  ;;  %2389 = vmatpush1.bf16.msra.mxu0 %v2388_v57  ;;  %v2421_v2 = vpack.c.bf16 %v2094_v1, %v2093_v0  ;;  %v1350_v8 = vld [vmem:[#allocation2 + $0x50] sm:$0xff] }
 0x11c   :  { %2435 = vmatpush1.bf16.msra.mxu1 %v2388_v57  ;;  %2390 = vmatprep.subr.bf16.mxu0 %v2543_v3  ;;  %v2412_v57 = vpack.c.bf16 %v2088_v48, %v2087_v56 }
 0x11d   :  { %678 = vmatmul.mubr.f32.gmra.mrb[2].mxu1 %v558_v13  ;;  %2424 = vmatprep.subr.bf16.mxu1 %v2543_v3 }
 0x11e   :  { %1329 = vmatmul.mubr.f32.gmra.mrb[2].mxu0 %v1209_v14  ;;  %1957 = vmatprep.mubr.msk.f32.mxu1 %vm18_vm0, %v566_v16 }
 0x11f   :  { %2069 = vmatprep.mubr.msk.f32.mxu0 %vm18_vm0, %v1217_v21  ;;  %2392 = vmatpush1.bf16.msra.mxu0 %v2391_v37 }
 0x120   :  { %2436 = vmatpush1.bf16.msra.mxu1 %v2391_v37  ;;  %2393 = vmatprep.subr.bf16.mxu0 %v2543_v3 }
 0x121   :  { %683 = vmatmul.mubr.f32.gmra.mrb[4].mxu1 %v563_v25  ;;  %2425 = vmatprep.subr.bf16.mxu1 %v2543_v3 }
 0x122   :  { %1334 = vmatmul.mubr.f32.gmra.mrb[4].mxu0 %v1214_v28  ;;  %1958 = vmatprep.mubr.msk.f32.mxu1 %vm18_vm0, %v570_v29 }
 0x123   :  { %2070 = vmatprep.mubr.msk.f32.mxu0 %vm18_vm0, %v1221_v32  ;;  %2395 = vmatpush1.bf16.msra.mxu0 %v2394_v24 }
 0x124   :  { %2437 = vmatpush1.bf16.msra.mxu1 %v2394_v24  ;;  %2396 = vmatprep.subr.bf16.mxu0 %v2543_v3 }
 0x125   :  { %688 = vmatmul.mubr.f32.gmra.mrb[6].mxu1 %v568_v34  ;;  %2426 = vmatprep.subr.bf16.mxu1 %v2543_v3 }
 0x126   :  { %1339 = vmatmul.mubr.f32.gmra.mrb[6].mxu0 %v1219_v39  ;;  %2097 = vmatprep.mubr.msk.f32.mxu1 %vm18_vm0, %v3461_v4  ;;  %v1349_v4 = vld [vmem:[#allocation2 + $0x28] sm:$0xff] }
 0x127   :  { %2398 = vmatpush1.bf16.msra.mxu0 %v2397_v33  ;;  %2095 = vmatprep.mubr.msk.f32.mxu0 %vm18_vm0, %v2542_v40 }
 0x128   :  { %2438 = vmatpush1.bf16.msra.mxu1 %v2397_v33  ;;  %2399 = vmatprep.subr.bf16.mxu0 %v2543_v3 }
 0x129   :  { %2427 = vmatprep.subr.bf16.mxu1 %v2543_v3 }
 0x12b   :  { %2401 = vmatpush1.bf16.msra.mxu0 %v2400_v43 }
 0x12c   :  { %2439 = vmatpush1.bf16.msra.mxu1 %v2400_v43  ;;  %2402 = vmatprep.subr.bf16.mxu0 %v2543_v3 }
 0x12d   :  { %2428 = vmatprep.subr.bf16.mxu1 %v2543_v3 }
 0x12f   :  { %2404 = vmatpush1.bf16.msra.mxu0 %v2403_v46 }
 0x130   :  { %2440 = vmatpush1.bf16.msra.mxu1 %v2403_v46  ;;  %2405 = vmatprep.subr.bf16.mxu0 %v2543_v3 }
 0x131   :  { %2429 = vmatprep.subr.bf16.mxu1 %v2543_v3 }
 0x133   :  { %2407 = vmatpush1.bf16.msra.mxu0 %v2406_v52 }
 0x134   :  { %2441 = vmatpush1.bf16.msra.mxu1 %v2406_v52  ;;  %2408 = vmatprep.subr.bf16.mxu0 %v2543_v3 }
 0x135   :  { %2430 = vmatprep.subr.bf16.mxu1 %v2543_v3 }
 0x137   :  { %2410 = vmatpush1.bf16.msra.mxu0 %v2409_v55 }
 0x138   :  { %2442 = vmatpush1.bf16.msra.mxu1 %v2409_v55  ;;  %2411 = vmatprep.subr.bf16.mxu0 %v2543_v3 }
 0x139   :  { %2431 = vmatprep.subr.bf16.mxu1 %v2543_v3 }
 0x13b   :  { %2413 = vmatpush1.bf16.msra.mxu0 %v2412_v57 }
 0x13c   :  { %2443 = vmatpush1.bf16.msra.mxu1 %v2412_v57  ;;  %2414 = vmatprep.subr.bf16.mxu0 %v2543_v3 }
 0x13d   :  { %2432 = vmatprep.subr.bf16.mxu1 %v2543_v3 }
 0x13f   :  { %2416 = vmatpush1.bf16.msra.mxu0 %v2415_v60 }
 0x140   :  { %2444 = vmatpush1.bf16.msra.mxu1 %v2415_v60  ;;  %2417 = vmatprep.subr.bf16.mxu0 %v2543_v3 }
 0x141   :  { %2433 = vmatprep.subr.bf16.mxu1 %v2543_v3 }
 0x143   :  { %2419 = vmatpush1.bf16.msra.mxu0 %v2418_v63 }
 0x144   :  { %2445 = vmatpush1.bf16.msra.mxu1 %v2418_v63  ;;  %2420 = vmatprep.subr.bf16.mxu0 %v2543_v3 }
 0x145   :  { %2434 = vmatprep.subr.bf16.mxu1 %v2543_v3 }
 0x147   :  { %2422 = vmatpush1.bf16.msra.mxu0 %v2421_v2 }
 0x148   :  { %2446 = vmatpush1.bf16.msra.mxu1 %v2421_v2 }
 0x14a   :  { %1448 = vmatmul.mubr.f32.vlgmr.msra.gmra.mrb[0].mxu0 %v3438_v41 }
 0x14b   :  { %1458 = vmatmul.mubr.f32.vlgmr.msra.gmra.mrb[8].mxu1 %v3473_v35  ;;  %2096 = vmatprep.mubr.msk.f32.mxu0 %vm18_vm0, %v1349_v4 }
 0x14c   :  { %2098 = vmatprep.mubr.msk.f32.mxu1 %vm18_vm0, %v1351_v5 }
 0x14e   :  { %1453 = vmatmul.mubr.f32.gmra.mrb[2].mxu0 %v1348_v7 }
 0x14f   :  { %1463 = vmatmul.mubr.f32.gmra.mrb[10].mxu1 %v1350_v8 }
 0x1ec   :  { %v674_v10 = vpop.f32.mrb[0].mxu1 }
 0x1ed   :  { %v676_v31 = vpop.f32.mrb[1].mxu1 }
 0x1f0   :  { %v679_v11 = vpop.f32.mrb[2].mxu1 }
 0x1f1   :  { %v681_v3 = vpop.f32.mrb[3].mxu1 }
 0x1f4   :  { %v684_v12 = vpop.f32.mrb[4].mxu1 }
 0x1f5   :  { %v1335_v37 = vpop.f32.mrb[4].mxu0  ;;  %v686_v51 = vpop.f32.mrb[5].mxu1 }
 0x1f6   :  { %v2449_v41 = vadd.f32 %v1335_v37, %v684_v12  ;;  %v1337_v13 = vpop.f32.mrb[5].mxu0 }
 0x1f8   :  { %v689_v14 = vpop.f32.mrb[6].mxu1 }
 0x1f9   :  { %v1340_v47 = vpop.f32.mrb[6].mxu0  ;;  %v691_v35 = vpop.f32.mrb[7].mxu1 }
 0x1fa   :  { %v2451_v42 = vadd.f32 %v1340_v47, %v689_v14  ;;  %v1342_v6 = vpop.f32.mrb[7].mxu0 }
 0x21d   :  { %v1449_v15 = vpop.f32.mrb[0].mxu0 }
 0x21e   :  { %v3577_v16 = vadd.f32 %v1449_v15, %v674_v10  ;;  %v1459_v17 = vpop.f32.mrb[8].mxu1  ;;  %v1451_v18 = vpop.f32.mrb[1].mxu0 }
 0x21f   :  { %v3579_v19 = vadd.f32 %v2449_v41, %v1459_v17  ;;  %v1461_v20 = vpop.f32.mrb[9].mxu1 }
 0x220   :  { %v1472_v9 = vsel %vm18_vm0, %v3577_v16, 0.0 }
 0x221   :  { %v1454_v21 = vpop.f32.mrb[2].mxu0  ;;  %v1475_v29 = vsel %vm18_vm0, %v3579_v19, 0.0 }
 0x222   :  { %v3581_v22 = vadd.f32 %v1454_v21, %v679_v11  ;;  %v1464_v23 = vpop.f32.mrb[10].mxu1  ;;  %v1456_v24 = vpop.f32.mrb[3].mxu0 }
 0x223   :  { %v3583_v25 = vadd.f32 %v2451_v42, %v1464_v23  ;;  %v1466_v26 = vpop.f32.mrb[11].mxu1 }
 0x224   :  { %v1473_v27 = vsel %vm18_vm0, %v3581_v22, 0.0 }
 0x225   :  { %v1474_v28 = vadd.f32 %v1473_v27, %v1472_v9  ;;  %v1477_v32 = vsel %vm18_vm0, %v3583_v25, 0.0 }
 0x227   :  { %v1476_v30 = vadd.f32 %v1475_v29, %v1474_v28  ;;  %v1623_v29 = vlaneseq }
 0x229   :  { %v1478_v33 = vadd.f32 %v1477_v32, %v1476_v30 }
 0x22b   :  { %v1479_v34 = vrot.slane %v1478_v33, 4 }
 0x22d   :  { %v1480_v36 = vadd.f32 %v1479_v34, %v1478_v33 }
 0x22f   :  { %v1481_v38 = vrot.slane %v1480_v36, 2 }
 0x231   :  { %v1482_v39 = vadd.f32 %v1481_v38, %v1480_v36  ;;  %v1624_v36 = vshrl.u32 %v1623_v29, 7 }
 0x233   :  { %v1483_v40 = vrot.slane %v1482_v39, 1 }
 0x235   :  { %v1484_v43 = vadd.f32 %v1483_v40, %v1482_v39 }
 0x237   :  { %1490 = vrot.lane.b32.xlu1 %v1484_v43, %s2546_s1  ;;  %1486 = vrot.lane.b32.xlu0 %v1484_v43, %s2547_s13 }
 0x23b   :  { %1498 = vrot.lane.b32.xlu1 %v1484_v43, %s2548_s14  ;;  %1494 = vrot.lane.b32.xlu0 %v1484_v43, %s2549_s15 }
 0x23f   :  { %1506 = vrot.lane.b32.xlu1 %v1484_v43, %s2550_s16  ;;  %1502 = vrot.lane.b32.xlu0 %v1484_v43, %s2551_s17 }
 0x243   :  { %1514 = vrot.lane.b32.xlu1 %v1484_v43, %s2552_s18  ;;  %1510 = vrot.lane.b32.xlu0 %v1484_v43, %s2553_s19 }
 0x247   :  { %1522 = vrot.lane.b32.xlu1 %v1484_v43, %s2554_s20  ;;  %1518 = vrot.lane.b32.xlu0 %v1484_v43, %s2555_s21 }
 0x24b   :  { %1530 = vrot.lane.b32.xlu1 %v1484_v43, %s2556_s22  ;;  %1526 = vrot.lane.b32.xlu0 %v1484_v43, %s2557_s23 }
 0x24f   :  { %1538 = vrot.lane.b32.xlu1 %v1484_v43, %s2558_s24  ;;  %1534 = vrot.lane.b32.xlu0 %v1484_v43, %s2559_s25 }
 0x253   :  { %1542 = vrot.lane.b32.xlu0 %v1484_v43, %s2560_s26 }
 0x2a9   :  { %v1491_v44 = vpop.permute.xlu1 %1490  ;;  %v1487_v45 = vpop.permute.xlu0 %1486 }
 0x2aa   :  { %v1489_v46 = vadd.f32 %v1487_v45, %v1484_v43 }
 0x2ac   :  { %v1493_v49 = vadd.f32 %v1491_v44, %v1489_v46  ;;  %v3654_v44 = vsub.s32 0, %v1624_v36 }
 0x2ad   :  { %v1499_v50 = vpop.permute.xlu1 %1498  ;;  %v1495_v52 = vpop.permute.xlu0 %1494 }
 0x2ae   :  { %v1497_v53 = vadd.f32 %v1495_v52, %v1493_v49 }
 0x2b0   :  { %v1501_v54 = vadd.f32 %v1499_v50, %v1497_v53 }
 0x2b1   :  { %v1507_v55 = vpop.permute.xlu1 %1506  ;;  %v1503_v56 = vpop.permute.xlu0 %1502 }
 0x2b2   :  { %v1505_v48 = vadd.f32 %v1503_v56, %v1501_v54 }
 0x2b4   :  { %v1509_v57 = vadd.f32 %v1507_v55, %v1505_v48 }
 0x2b5   :  { %v1515_v58 = vpop.permute.xlu1 %1514  ;;  %v1511_v59 = vpop.permute.xlu0 %1510 }
 0x2b6   :  { %v1513_v60 = vadd.f32 %v1511_v59, %v1509_v57 }
 0x2b8   :  { %v1517_v61 = vadd.f32 %v1515_v58, %v1513_v60 }
 0x2b9   :  { %v1523_v62 = vpop.permute.xlu1 %1522  ;;  %v1519_v63 = vpop.permute.xlu0 %1518 }
 0x2ba   :  { %v1521_v0 = vadd.f32 %v1519_v63, %v1517_v61 }
 0x2bc   :  { %v1525_v1 = vadd.f32 %v1523_v62, %v1521_v0 }
 0x2bd   :  { %v1531_v2 = vpop.permute.xlu1 %1530  ;;  %v1527_v4 = vpop.permute.xlu0 %1526 }
 0x2be   :  { %v1529_v5 = vadd.f32 %v1527_v4, %v1525_v1 }
 0x2c0   :  { %v1533_v7 = vadd.f32 %v1531_v2, %v1529_v5 }
 0x2c1   :  { %v1535_v8 = vpop.permute.xlu0 %1534  ;;  %v1539_v31 = vpop.permute.xlu1 %1538 }
 0x2c2   :  { %v1537_v10 = vadd.f32 %v1535_v8, %v1533_v7 }
 0x2c4   :  { %v1541_v11 = vadd.f32 %v1539_v31, %v1537_v10 }
 0x2c5   :  { %v1543_v3 = vpop.permute.xlu0 %1542 }
 0x2c6   :  { %v1545_v12 = vadd.f32 %v1543_v3, %v1541_v11 }
 0x2c8   :  { %v3608_v37 = vmul.f32 0.001953125, %v1545_v12 }
 0x2ca   :  { %1552 = vrot.lane.b32.xlu0 %v3608_v37, %s2561_s27  ;;  %1549 = vrot.lane.b32.xlu1 %v3608_v37, %s2562_s28 }
 0x2ce   :  { %1558 = vrot.lane.b32.xlu0 %v3608_v37, %s2563_s29  ;;  %1555 = vrot.lane.b32.xlu1 %v3608_v37, %s2564_s30 }
 0x2d2   :  { %1564 = vrot.lane.b32.xlu0 %v3608_v37, %s2565_s5  ;;  %1561 = vrot.lane.b32.xlu1 %v3608_v37, %s2566_s6 }
 0x2d6   :  { %1570 = vrot.lane.b32.xlu0 %v3608_v37, %s3778_s0  ;;  %1567 = vrot.lane.b32.xlu1 %v3608_v37, %s2567_s7  ;;  %s2573_s0 = smov 52  }
 0x2da   :  { %1576 = vrot.lane.b32.xlu0 %v3608_v37, %s3780_s8  ;;  %1573 = vrot.lane.b32.xlu1 %v3608_v37, %s2569_s9  ;;  %s2574_s8 = smov 60  }
 0x2de   :  { %1582 = vrot.lane.b32.xlu0 %v3608_v37, %s2570_s10  ;;  %1579 = vrot.lane.b32.xlu1 %v3608_v37, %s2571_s11 }
 0x2e2   :  { %1588 = vrot.lane.b32.xlu0 %v3608_v37, %s2572_s12  ;;  %1585 = vrot.lane.b32.xlu1 %v3608_v37, %s2573_s0 }
 0x2e6   :  { %1591 = vrot.lane.b32.xlu1 %v3608_v37, %s2574_s8 }
 0x33c   :  { %v1553_v51 = vpop.permute.xlu0 %1552  ;;  %v1550_v41 = vpop.permute.xlu1 %1549 }
 0x33d   :  { %v1595_v13 = vsel %vm1594_vm14, %v3608_v37, %v1550_v41 }
 0x33e   :  { %v1597_v47 = vsel %vm1596_vm15, %v1595_v13, %v1553_v51 }
 0x340   :  { %v1559_v14 = vpop.permute.xlu0 %1558  ;;  %v1556_v35 = vpop.permute.xlu1 %1555 }
 0x341   :  { %v1599_v42 = vsel %vm1598_vm1, %v1597_v47, %v1556_v35 }
 0x342   :  { %v1601_v15 = vsel %vm1600_vm2, %v1599_v42, %v1559_v14 }
 0x344   :  { %v1565_v6 = vpop.permute.xlu0 %1564  ;;  %v1562_v17 = vpop.permute.xlu1 %1561 }
 0x345   :  { %v1603_v18 = vsel %vm1602_vm3, %v1601_v15, %v1562_v17 }
 0x346   :  { %v1605_v21 = vsel %vm1604_vm4, %v1603_v18, %v1565_v6 }
 0x348   :  { %v1571_v20 = vpop.permute.xlu0 %1570  ;;  %v1568_v23 = vpop.permute.xlu1 %1567 }
 0x349   :  { %v1607_v24 = vsel %vm1606_vm5, %v1605_v21, %v1568_v23 }
 0x34a   :  { %v1608_v9 = vsel %vm69_vm7, %v1607_v24, %v1571_v20 }
 0x34c   :  { %v1577_v26 = vpop.permute.xlu0 %1576  ;;  %v1574_v27 = vpop.permute.xlu1 %1573 }
 0x34d   :  { %v1610_v28 = vsel %vm1609_vm6, %v1608_v9, %v1574_v27 }
 0x34e   :  { %v1612_v32 = vsel %vm1611_vm8, %v1610_v28, %v1577_v26 }
 0x350   :  { %v1583_v30 = vpop.permute.xlu0 %1582  ;;  %v1580_v33 = vpop.permute.xlu1 %1579 }
 0x351   :  { %v1614_v34 = vsel %vm1613_vm9, %v1612_v32, %v1580_v33 }
 0x352   :  { %v1616_v38 = vsel %vm1615_vm10, %v1614_v34, %v1583_v30 }
 0x354   :  { %v1586_v39 = vpop.permute.xlu1 %1585  ;;  %v1589_v40 = vpop.permute.xlu0 %1588 }
 0x355   :  { %v1618_v43 = vsel %vm1617_vm11, %v1616_v38, %v1586_v39 }
 0x356   :  { %v1620_v45 = vsel %vm1619_vm12, %v1618_v43, %v1589_v40  ;;  %v1710_v43 = vld [vmem:[%s3775_s2] sm:$0x1]  ;;  %s3782_s2 = smov 32  }
 0x358   :  { %v1592_v46 = vpop.permute.xlu1 %1591 }
 0x359   :  { %v1622_v49 = vsel %vm1621_vm13, %v1620_v45, %v1592_v46 }
 0x35a   :  { %v1626_v50 = vrot.slane %v1622_v49, %v3654_v44  ;;  %v1714_v49 = vld [vmem:[%s3776_s3] sm:$0x1]  ;;  %s3783_s3 = smov 40  }
 0x35c   :  { %v1627_v52 = vsub.f32 %v3577_v16, %v1626_v50  ;;  %v1628_v53 = vsub.f32 %v3581_v22, %v1626_v50  ;;  %v1629_v54 = vsub.f32 %v3579_v19, %v1626_v50  ;;  %v1630_v55 = vsub.f32 %v3583_v25, %v1626_v50 }
 0x35e   :  { %v1631_v56 = vmul.f32 %v1627_v52, %v1627_v52  ;;  %v1632_v48 = vmul.f32 %v1628_v53, %v1628_v53  ;;  %v1633_v57 = vmul.f32 %v1629_v54, %v1629_v54  ;;  %v1634_v58 = vmul.f32 %v1630_v55, %v1630_v55 }
 0x360   :  { %v1635_v59 = vsel %vm18_vm0, %v1631_v56, 0.0  ;;  %v1636_v60 = vsel %vm18_vm0, %v1632_v48, 0.0  ;;  %v1638_v62 = vsel %vm18_vm0, %v1633_v57, 0.0  ;;  %v1640_v0 = vsel %vm18_vm0, %v1634_v58, 0.0 }
 0x361   :  { %v1637_v61 = vadd.f32 %v1636_v60, %v1635_v59 }
 0x363   :  { %v1639_v63 = vadd.f32 %v1638_v62, %v1637_v61 }
 0x365   :  { %v1641_v1 = vadd.f32 %v1640_v0, %v1639_v63 }
 0x367   :  { %v1642_v2 = vrot.slane %v1641_v1, 4 }
 0x369   :  { %v1643_v4 = vadd.f32 %v1642_v2, %v1641_v1 }
 0x36b   :  { %v1644_v5 = vrot.slane %v1643_v4, 2 }
 0x36d   :  { %v1645_v7 = vadd.f32 %v1644_v5, %v1643_v4 }
 0x36f   :  { %v1646_v8 = vrot.slane %v1645_v7, 1 }
 0x371   :  { %v1647_v10 = vadd.f32 %v1646_v8, %v1645_v7 }
 0x373   :  { %1653 = vrot.lane.b32.xlu1 %v1647_v10, %s2546_s1  ;;  %1649 = vrot.lane.b32.xlu0 %v1647_v10, %s2547_s13 }
 0x377   :  { %1661 = vrot.lane.b32.xlu1 %v1647_v10, %s2548_s14  ;;  %1657 = vrot.lane.b32.xlu0 %v1647_v10, %s2549_s15 }
 0x37b   :  { %1669 = vrot.lane.b32.xlu1 %v1647_v10, %s2550_s16  ;;  %1665 = vrot.lane.b32.xlu0 %v1647_v10, %s2551_s17 }
 0x37f   :  { %1677 = vrot.lane.b32.xlu1 %v1647_v10, %s2552_s18  ;;  %1673 = vrot.lane.b32.xlu0 %v1647_v10, %s2553_s19 }
 0x383   :  { %1685 = vrot.lane.b32.xlu1 %v1647_v10, %s2554_s20  ;;  %1681 = vrot.lane.b32.xlu0 %v1647_v10, %s2555_s21 }
 0x387   :  { %1693 = vrot.lane.b32.xlu1 %v1647_v10, %s2556_s22  ;;  %1689 = vrot.lane.b32.xlu0 %v1647_v10, %s2557_s23 }
 0x38b   :  { %1701 = vrot.lane.b32.xlu1 %v1647_v10, %s2558_s24  ;;  %1697 = vrot.lane.b32.xlu0 %v1647_v10, %s2559_s25 }
 0x38f   :  { %1705 = vrot.lane.b32.xlu0 %v1647_v10, %s2560_s26 }
 0x3e5   :  { %v1654_v31 = vpop.permute.xlu1 %1653  ;;  %v1650_v11 = vpop.permute.xlu0 %1649 }
 0x3e6   :  { %v1652_v3 = vadd.f32 %v1650_v11, %v1647_v10 }
 0x3e8   :  { %v1656_v12 = vadd.f32 %v1654_v31, %v1652_v3 }
 0x3e9   :  { %v1662_v51 = vpop.permute.xlu1 %1661  ;;  %v1658_v41 = vpop.permute.xlu0 %1657 }
 0x3ea   :  { %v1660_v13 = vadd.f32 %v1658_v41, %v1656_v12 }
 0x3ec   :  { %v1664_v14 = vadd.f32 %v1662_v51, %v1660_v13 }
 0x3ed   :  { %v1670_v47 = vpop.permute.xlu1 %1669  ;;  %v1666_v35 = vpop.permute.xlu0 %1665 }
 0x3ee   :  { %v1668_v42 = vadd.f32 %v1666_v35, %v1664_v14 }
 0x3f0   :  { %v1672_v6 = vadd.f32 %v1670_v47, %v1668_v42 }
 0x3f1   :  { %v1678_v15 = vpop.permute.xlu1 %1677  ;;  %v1674_v17 = vpop.permute.xlu0 %1673 }
 0x3f2   :  { %v1676_v18 = vadd.f32 %v1674_v17, %v1672_v6 }
 0x3f4   :  { %v1680_v20 = vadd.f32 %v1678_v15, %v1676_v18 }
 0x3f5   :  { %v1686_v21 = vpop.permute.xlu1 %1685  ;;  %v1682_v23 = vpop.permute.xlu0 %1681 }
 0x3f6   :  { %v1684_v24 = vadd.f32 %v1682_v23, %v1680_v20 }
 0x3f8   :  { %v1688_v26 = vadd.f32 %v1686_v21, %v1684_v24 }
 0x3f9   :  { %v1694_v9 = vpop.permute.xlu1 %1693  ;;  %v1690_v27 = vpop.permute.xlu0 %1689 }
 0x3fa   :  { %v1692_v28 = vadd.f32 %v1690_v27, %v1688_v26 }
 0x3fc   :  { %v1696_v29 = vadd.f32 %v1694_v9, %v1692_v28 }
 0x3fd   :  { %v1698_v30 = vpop.permute.xlu0 %1697  ;;  %v1702_v33 = vpop.permute.xlu1 %1701 }
 0x3fe   :  { %v1700_v32 = vadd.f32 %v1698_v30, %v1696_v29 }
 0x400   :  { %v1704_v34 = vadd.f32 %v1702_v33, %v1700_v32 }
 0x401   :  { %v1706_v36 = vpop.permute.xlu0 %1705 }
 0x402   :  { %v1708_v38 = vadd.f32 %v1706_v36, %v1704_v34 }
 0x404   :  { %v1709_v39 = vmul.f32 0.001953125, %v1708_v38 }
 0x406   :  { %v1711_v40 = vadd.f32 1e-05, %v1709_v39 }
 0x408   :  { %2537 = vrsqrt.f32 %v1711_v40 }
 0x412   :  { %v2538_v45 = vpop.eup %2537 }
 0x413   :  { %v1713_v46 = vmul.f32 %v2538_v45, %v1710_v43 }
 0x415   :  { %v1715_v50 = vmul.f32 %v1713_v46, %v3608_v37  ;;  %v1721_v52 = vrot.slane %v1713_v46, %v3654_v44 }
 0x417   :  { %v1716_v53 = vsub.f32 %v1714_v49, %v1715_v50  ;;  %1725 = vrot.lane.b32.xlu0 %v1721_v52, %s2561_s27  ;;  %1722 = vrot.lane.b32.xlu1 %v1721_v52, %s2562_s28 }
 0x419   :  { %v1786_v54 = vrot.slane %v1716_v53, %v3654_v44 }
 0x41b   :  { %1728 = vrot.lane.b32.xlu1 %v1721_v52, %s2564_s30  ;;  %1787 = vrot.lane.b32.xlu0 %v1786_v54, %s2562_s28 }
 0x41f   :  { %1731 = vrot.lane.b32.xlu1 %v1721_v52, %s2563_s29  ;;  %1790 = vrot.lane.b32.xlu0 %v1786_v54, %s2561_s27 }
 0x423   :  { %1734 = vrot.lane.b32.xlu1 %v1721_v52, %s2566_s6  ;;  %1793 = vrot.lane.b32.xlu0 %v1786_v54, %s2564_s30 }
 0x427   :  { %1737 = vrot.lane.b32.xlu1 %v1721_v52, %s2565_s5  ;;  %1796 = vrot.lane.b32.xlu0 %v1786_v54, %s2563_s29 }
 0x42b   :  { %1740 = vrot.lane.b32.xlu1 %v1721_v52, %s2567_s7  ;;  %1799 = vrot.lane.b32.xlu0 %v1786_v54, %s2566_s6 }
 0x42f   :  { %1743 = vrot.lane.b32.xlu1 %v1721_v52, %s3782_s2  ;;  %1802 = vrot.lane.b32.xlu0 %v1786_v54, %s2565_s5 }
 0x433   :  { %1746 = vrot.lane.b32.xlu1 %v1721_v52, %s2569_s9  ;;  %1805 = vrot.lane.b32.xlu0 %v1786_v54, %s2567_s7 }
 0x437   :  { %1749 = vrot.lane.b32.xlu1 %v1721_v52, %s3783_s3  ;;  %1808 = vrot.lane.b32.xlu0 %v1786_v54, %s3782_s2 }
 0x43b   :  { %1752 = vrot.lane.b32.xlu1 %v1721_v52, %s2571_s11  ;;  %1811 = vrot.lane.b32.xlu0 %v1786_v54, %s2569_s9 }
 0x43f   :  { %1755 = vrot.lane.b32.xlu1 %v1721_v52, %s2570_s10  ;;  %1814 = vrot.lane.b32.xlu0 %v1786_v54, %s3783_s3 }
 0x443   :  { %1758 = vrot.lane.b32.xlu1 %v1721_v52, %s2573_s0  ;;  %1817 = vrot.lane.b32.xlu0 %v1786_v54, %s2571_s11 }
 0x447   :  { %1761 = vrot.lane.b32.xlu1 %v1721_v52, %s2572_s12  ;;  %1820 = vrot.lane.b32.xlu0 %v1786_v54, %s2570_s10 }
 0x44b   :  { %1764 = vrot.lane.b32.xlu1 %v1721_v52, %s2574_s8  ;;  %1823 = vrot.lane.b32.xlu0 %v1786_v54, %s2573_s0 }
 0x44f   :  { %1826 = vrot.lane.b32.xlu1 %v1786_v54, %s2572_s12  ;;  %1829 = vrot.lane.b32.xlu0 %v1786_v54, %s2574_s8 }
 0x489   :  { %v1726_v37 = vpop.permute.xlu0 %1725  ;;  %v1723_v55 = vpop.permute.xlu1 %1722 }
 0x48a   :  { %v1767_v11 = vsel %vm1594_vm14, %v1713_v46, %v1723_v55 }
 0x48b   :  { %v1768_v3 = vsel %vm1596_vm15, %v1767_v11, %v1726_v37 }
 0x48d   :  { %v1729_v56 = vpop.permute.xlu1 %1728  ;;  %v1788_v48 = vpop.permute.xlu0 %1787 }
 0x48e   :  { %v1769_v41 = vsel %vm1598_vm1, %v1768_v3, %v1729_v56  ;;  %v1832_v47 = vsel %vm1594_vm14, %v1716_v53, %v1788_v48 }
 0x491   :  { %v1732_v57 = vpop.permute.xlu1 %1731  ;;  %v1791_v58 = vpop.permute.xlu0 %1790 }
 0x492   :  { %v1770_v13 = vsel %vm1600_vm2, %v1769_v41, %v1732_v57  ;;  %v1833_v15 = vsel %vm1596_vm15, %v1832_v47, %v1791_v58 }
 0x495   :  { %v1735_v59 = vpop.permute.xlu1 %1734  ;;  %v1794_v60 = vpop.permute.xlu0 %1793 }
 0x496   :  { %v1771_v14 = vsel %vm1602_vm3, %v1770_v13, %v1735_v59  ;;  %v1834_v18 = vsel %vm1598_vm1, %v1833_v15, %v1794_v60 }
 0x499   :  { %v1738_v61 = vpop.permute.xlu1 %1737  ;;  %v1797_v62 = vpop.permute.xlu0 %1796 }
 0x49a   :  { %v1772_v35 = vsel %vm1604_vm4, %v1771_v14, %v1738_v61  ;;  %v1835_v21 = vsel %vm1600_vm2, %v1834_v18, %v1797_v62 }
 0x49d   :  { %v1741_v63 = vpop.permute.xlu1 %1740  ;;  %v1800_v0 = vpop.permute.xlu0 %1799 }
 0x49e   :  { %v1773_v17 = vsel %vm1606_vm5, %v1772_v35, %v1741_v63  ;;  %v1836_v24 = vsel %vm1602_vm3, %v1835_v21, %v1800_v0 }
 0x4a1   :  { %v1744_v1 = vpop.permute.xlu1 %1743  ;;  %v1803_v2 = vpop.permute.xlu0 %1802 }
 0x4a2   :  { %v1774_v20 = vsel %vm69_vm7, %v1773_v17, %v1744_v1  ;;  %v1837_v28 = vsel %vm1604_vm4, %v1836_v24, %v1803_v2 }
 0x4a5   :  { %v1747_v4 = vpop.permute.xlu1 %1746  ;;  %v1806_v5 = vpop.permute.xlu0 %1805 }
 0x4a6   :  { %v1775_v23 = vsel %vm1609_vm6, %v1774_v20, %v1747_v4  ;;  %v1838_v30 = vsel %vm1606_vm5, %v1837_v28, %v1806_v5 }
 0x4a9   :  { %v1750_v7 = vpop.permute.xlu1 %1749  ;;  %v1809_v8 = vpop.permute.xlu0 %1808 }
 0x4aa   :  { %v1776_v26 = vsel %vm1611_vm8, %v1775_v23, %v1750_v7  ;;  %v1839_v33 = vsel %vm69_vm7, %v1838_v30, %v1809_v8 }
 0x4ad   :  { %v1753_v10 = vpop.permute.xlu1 %1752  ;;  %v1812_v31 = vpop.permute.xlu0 %1811 }
 0x4ae   :  { %v1777_v29 = vsel %vm1613_vm9, %v1776_v26, %v1753_v10  ;;  %v1840_v36 = vsel %vm1609_vm6, %v1839_v33, %v1812_v31 }
 0x4b1   :  { %v1756_v12 = vpop.permute.xlu1 %1755  ;;  %v1815_v51 = vpop.permute.xlu0 %1814 }
 0x4b2   :  { %v1778_v32 = vsel %vm1615_vm10, %v1777_v29, %v1756_v12  ;;  %v1841_v43 = vsel %vm1611_vm8, %v1840_v36, %v1815_v51 }
 0x4b5   :  { %v1759_v42 = vpop.permute.xlu1 %1758  ;;  %v1818_v6 = vpop.permute.xlu0 %1817 }
 0x4b6   :  { %v1779_v34 = vsel %vm1617_vm11, %v1778_v32, %v1759_v42  ;;  %v1842_v46 = vsel %vm1613_vm9, %v1841_v43, %v1818_v6 }
 0x4b9   :  { %v1762_v9 = vpop.permute.xlu1 %1761  ;;  %v1821_v27 = vpop.permute.xlu0 %1820 }
 0x4ba   :  { %v1780_v38 = vsel %vm1619_vm12, %v1779_v34, %v1762_v9  ;;  %v1843_v50 = vsel %vm1615_vm10, %v1842_v46, %v1821_v27 }
 0x4bd   :  { %v1765_v39 = vpop.permute.xlu1 %1764  ;;  %v1824_v40 = vpop.permute.xlu0 %1823 }
 0x4be   :  { %v1781_v45 = vsel %vm1621_vm13, %v1780_v38, %v1765_v39  ;;  %v1844_v52 = vsel %vm1617_vm11, %v1843_v50, %v1824_v40 }
 0x4bf   :  { %v1850_v49 = vrot.slane %v1781_v45, %v3654_v44 }
 0x4c1   :  { %v1827_v53 = vpop.permute.xlu1 %1826  ;;  %v1830_v54 = vpop.permute.xlu0 %1829  ;;  %v1851_v55 = vmul.f32 %v3577_v16, %v1850_v49  ;;  %v1852_v48 = vmul.f32 %v3581_v22, %v1850_v49  ;;  %v1853_v57 = vmul.f32 %v3579_v19, %v1850_v49  ;;  %v1854_v58 = vmul.f32 %v3583_v25, %v1850_v49 }
 0x4c2   :  { %v1845_v37 = vsel %vm1619_vm12, %v1844_v52, %v1827_v53 }
 0x4c3   :  { %v1846_v56 = vsel %vm1621_vm13, %v1845_v37, %v1830_v54 }
 0x4c4   :  { %v1858_v59 = vrot.slane %v1846_v56, %v3654_v44 }
 0x4c6   :  { %v1859_v60 = vadd.f32 %v1858_v59, %v1851_v55  ;;  %v1860_v61 = vadd.f32 %v1858_v59, %v1852_v48  ;;  %v1861_v62 = vadd.f32 %v1858_v59, %v1853_v57  ;;  %v1862_v63 = vadd.f32 %v1858_v59, %v1854_v58 }
 0x4c8   :  { %1863 = vst.msk [vmem:[%s3777_s4] sm:$0xff] %vm18_vm0, %v1859_v60  ;;  %1864 = vst.msk [vmem:[%s3777_s4 + $0x8] sm:$0xff] %vm18_vm0, %v1860_v61 }
 0x4c9   :  { %1865 = vst.msk [vmem:[%s3777_s4 + $0x10] sm:$0xff] %vm18_vm0, %v1861_v62  ;;  %1866 = vst.msk [vmem:[%s3777_s4 + $0x18] sm:$0xff] %vm18_vm0, %v1862_v63 }

</bundles_post_ra>
